<compile_context>
chip_gen: v6e
topology: v6e:2x2x1
jax: 0.10.0
libtpu: 0.0.40
codegen_flags: <defaults>
</compile_context>

<pallas_src>
import functools

import numpy as np
import jax
import jax.numpy as jnp
from jax import lax
from jax.experimental import pallas as pl
from jax.experimental.pallas import tpu as pltpu

_LN_EPS = 1e-5                    # PyTorch LayerNorm default
_MATMUL_DTYPE = jnp.bfloat16      # MXU-native; jnp.float32 for bit-tighter numerics
_OUT_DTYPE = jnp.float32          # jnp.bfloat16 halves output writeback (v5e knob)
_PARAMS_PER_LEVEL = 13            # 4 bottom_up + 4 top_down + 5 error_unit tensors


def _round_up(x, m):
    return ((x + m - 1) // m) * m


def _max_batch_tile():
    """Per-generation cap on the batch tile."""
    try:
        kind = jax.devices()[0].device_kind.lower()
    except Exception:
        return 256
    if "v7" in kind:
        # 64 MiB VMEM + 2 TensorCores: keep tiles at 128 so large batches give
        # >=2 grid tiles for the "parallel" axis to shard across both cores.
        return 128
    return 512  # v5e/v6e: single TC, serial grid -> bigger tiles amortize step cost


def _choose_batch_tiling(batch):
    """Return (batch_tile, padded_batch).

    Small batches run as a single tile (rounded up to 8 sublanes).  Larger
    batches are padded to a multiple of a >=128-row tile, so awkward batch
    sizes (e.g. 264) never collapse to bt=8 / dozens of grid steps.
    """
    if batch <= 128:
        bt = _round_up(max(batch, 1), 8)
        return bt, bt
    bt = _max_batch_tile()
    while bt > 128 and batch % bt != 0:
        bt //= 2
    return bt, _round_up(batch, bt)


def _hpc_fused_kernel(x_ref, *refs, n, dims, pad_w, pad_off, matmul_dtype, out_dtype):
    """Fused hierarchical predictive coding forward pass (one batch tile).

    refs layout per level i: [bu_w, bu_b, bu_g, bu_beta,
                              td_w, td_b, td_g, td_beta,    (column-padded to pad_w[i])
                              w1a, w1b, b1, w2, b2]         (w2 / b2 column-padded)
    followed by: prec_ref (SMEM, (n,)), pred_ref, err_ref (lane-dense slabs).
    """
    param_refs = refs[: _PARAMS_PER_LEVEL * n]
    prec_ref = refs[_PARAMS_PER_LEVEL * n]
    pred_ref = refs[_PARAMS_PER_LEVEL * n + 1]
    err_ref = refs[_PARAMS_PER_LEVEL * n + 2]

    def _dot(a_mm, w_ref):
        # operands already in matmul dtype; explicit f32 accumulation on the MXU
        return jnp.dot(a_mm, w_ref[...], preferred_element_type=jnp.float32)

    def _layernorm(y, g_ref, beta_ref, d):
        # One-pass LN: sum and sum-of-squares issue back-to-back on the XLU.
        # Divisor is the *true* width d, so zero pad lanes (from column-padded
        # weights) do not perturb the statistics.
        inv_d = 1.0 / float(d)
        s = jnp.sum(y, axis=-1, keepdims=True)
        ss = jnp.sum(y * y, axis=-1, keepdims=True)
        mean = s * inv_d
        var = jnp.maximum(ss * inv_d - mean * mean, 0.0)
        return (y - mean) * lax.rsqrt(var + _LN_EPS) * g_ref[...] + beta_ref[...]

    # ---- bottom-up sweep: Linear -> LayerNorm -> ReLU (reps stay in VMEM) ----
    x = x_ref[...].astype(jnp.float32)
    reps = [x]
    reps_mm = [x.astype(matmul_dtype)]     # cast hoisted: each rep feeds 2-3 dots
    for i in range(n):
        bu_w, bu_b, bu_g, bu_beta = param_refs[_PARAMS_PER_LEVEL * i:
                                               _PARAMS_PER_LEVEL * i + 4]
        y = _dot(reps_mm[i], bu_w) + bu_b[...]
        h = jnp.maximum(_layernorm(y, bu_g, bu_beta, dims[i + 1]), 0.0)
        # TODO(synk): nn.Dropout(0.1) after the ReLU is identity in eval mode;
        # training-mode dropout masking is not modeled here.
        reps.append(h)
        reps_mm.append(h.astype(matmul_dtype))

    # ---- top-down predictions + precision-weighted error units ----
    for i in range(n):
        base = _PARAMS_PER_LEVEL * i
        (td_w, td_b, td_g, td_beta,
         w1a, w1b, b1, w2, b2) = param_refs[base + 4: base + 13]
        d, pw, off = dims[i], pad_w[i], pad_off[i]

        # prediction = Tanh(LayerNorm(Linear(rep_{i+1}))).  td weights are
        # column-padded with zeros, so pad lanes are exactly 0 and the slab
        # store below is a full-width unmasked vst (no concat / VMEM copy).
        pred = jnp.tanh(_layernorm(_dot(reps_mm[i + 1], td_w) + td_b[...],
                                   td_g, td_beta, d))
        pred_ref[:, off:off + pw] = pred.astype(out_dtype)

        # weighted_error = (rep_i - pred) * sigmoid(precision_i)  (scalar in SMEM)
        pred_d = pred[:, :d] if pw > d else pred
        sig = jax.nn.sigmoid(jnp.full((1, 1), prec_ref[i], jnp.float32))
        werr = (reps[i] - pred_d) * sig

        # error_units: Linear(cat([rep, werr])) -> ReLU -> Linear.
        # concat folded into two matmuls against the split first-layer weight;
        # w2/b2 are column-padded so perr is produced lane-dense directly.
        hid = _dot(reps_mm[i], w1a) + _dot(werr.astype(matmul_dtype), w1b) + b1[...]
        hid = jnp.maximum(hid, 0.0)
        perr = _dot(hid.astype(matmul_dtype), w2) + b2[...]
        err_ref[:, off:off + pw] = perr.astype(out_dtype)


def _flatten_params(params, dims, pad_w, matmul_dtype):
    """Flatten per-level params in kernel order.

    Matmul weights are cast to matmul_dtype.  Tensors that feed the output
    slabs (top_down Linear/LayerNorm params and error-unit w2/b2) are
    zero-padded along their output axis to pad_w[i] lanes so the kernel never
    concatenates zero columns.
    """
    flat = []
    n = len(params["bottom_up"])
    for i in range(n):
        bu = params["bottom_up"][i]
        td = params["top_down"][i]
        eu = params["error_units"][i]
        pad_cols = pad_w[i] - dims[i]

        def padc(a, pc=pad_cols):
            return a if pc == 0 else jnp.pad(a, ((0, 0), (0, pc)))

        flat += [
            bu["w"].astype(matmul_dtype), bu["b"], bu["gamma"], bu["beta"],
            padc(td["w"]).astype(matmul_dtype), padc(td["b"]),
            padc(td["gamma"]), padc(td["beta"]),
            eu["w1a"].astype(matmul_dtype), eu["w1b"].astype(matmul_dtype),
            eu["b1"], padc(eu["w2"]).astype(matmul_dtype), padc(eu["b2"]),
        ]
    return flat


def hpc_forward(x, params):
    """Mirrors HierarchicalPredictiveCoding.forward (eval mode), single pallas_call."""
    n = len(params["bottom_up"])
    dims = [params["bottom_up"][0]["w"].shape[0]] + \
           [params["bottom_up"][i]["w"].shape[1] for i in range(n)]

    batch = x.shape[0]
    bt, padded_batch = _choose_batch_tiling(batch)
    n_tiles = padded_batch // bt
    x = x.astype(jnp.float32)
    if padded_batch != batch:
        x = jnp.pad(x, ((0, padded_batch - batch), (0, 0)))

    # lane-dense output slab: each level padded to a multiple of 128 lanes
    pad_w = tuple(_round_up(dims[i], 128) for i in range(n))
    pad_off, acc = [], 0
    for w in pad_w:
        pad_off.append(acc)
        acc += w
    pad_off = tuple(pad_off)
    total_pad = acc

    flat = _flatten_params(params, dims, pad_w, _MATMUL_DTYPE)
    prec = jnp.concatenate(
        [jnp.reshape(p, (-1,)) for p in params["precision"][:n]]).astype(jnp.float32)

    # advisory cost estimate for XLA's scheduler
    flops = 0
    for i in range(n):
        din, dout = dims[i], dims[i + 1]
        flops += 2 * 2 * padded_batch * din * dout       # bottom-up + top-down matmuls
        flops += 3 * 2 * padded_batch * din * din        # error-unit matmuls
    transcendentals = padded_batch * (sum(dims[:n]) + 2 * (n + 1)) + 8 * n
    out_item = np.dtype(_OUT_DTYPE).itemsize
    mm_item = np.dtype(_MATMUL_DTYPE).itemsize
    weight_bytes = sum(int(p.size) * p.dtype.itemsize for p in flat)
    bytes_accessed = (int(x.size) * x.dtype.itemsize + weight_bytes
                      + int(prec.size) * 4
                      + 2 * padded_batch * total_pad * out_item)
    cost = pl.CostEstimate(flops=int(flops), transcendentals=int(transcendentals),
                           bytes_accessed=int(bytes_accessed))

    # explicit VMEM budget: double-buffered x tile + output slabs, weights (x2
    # for the pipeline's second buffer), live intermediates, plus margin.
    vmem_est = (2 * bt * dims[0] * 4
                + 2 * 2 * bt * total_pad * out_item
                + 2 * weight_bytes
                + bt * sum(dims) * (4 + mm_item)
                + 6 * bt * max(pad_w) * 4
                + (4 << 20))
    vmem_limit = int(min(max(vmem_est, 32 << 20), 128 << 20))

    in_specs = [pl.BlockSpec((bt, dims[0]), lambda i: (i, 0))]           # x (batch-tiled)
    for p in flat:                                                       # weights: whole-array VMEM blocks
        in_specs.append(pl.BlockSpec(p.shape, lambda i: (0, 0)))
    in_specs.append(pl.BlockSpec(memory_space=pltpu.MemorySpace.SMEM))   # precision scalars
    out_specs = (pl.BlockSpec((bt, total_pad), lambda i: (i, 0)),
                 pl.BlockSpec((bt, total_pad), lambda i: (i, 0)))
    out_shape = (jax.ShapeDtypeStruct((padded_batch, total_pad), _OUT_DTYPE),
                 jax.ShapeDtypeStruct((padded_batch, total_pad), _OUT_DTYPE))

    kernel = functools.partial(_hpc_fused_kernel, n=n, dims=tuple(dims),
                               pad_w=pad_w, pad_off=pad_off,
                               matmul_dtype=_MATMUL_DTYPE, out_dtype=_OUT_DTYPE)

    pred_slab, err_slab = pl.pallas_call(
        kernel,
        grid=(n_tiles,),
        in_specs=in_specs,
        out_specs=out_specs,
        out_shape=out_shape,
        compiler_params=pltpu.CompilerParams(
            dimension_semantics=("parallel",),    # batch tiles shard across v7x's 2 TCs
            vmem_limit_bytes=vmem_limit),
        cost_estimate=cost,
    )(x, *flat, prec)

    predictions = [pred_slab[:batch, pad_off[i]:pad_off[i] + dims[i]] for i in range(n)]
    errors = [err_slab[:batch, pad_off[i]:pad_off[i] + dims[i]] for i in range(n)]
    return predictions, errors


def init_params(key, input_dim, hidden_dims):
    """Deterministic parameter init matching the module's __init__ shapes."""
    dims = [input_dim] + list(hidden_dims)
    params = {"bottom_up": [], "top_down": [], "error_units": [], "precision": []}
    for i in range(len(dims) - 1):
        d_in, d_out = dims[i], dims[i + 1]
        key, k1, k2, k3, k4, k5, k6, k7, k8 = jax.random.split(key, 9)

        bu_bound = 1.0 / float(d_in) ** 0.5
        params["bottom_up"].append({
            "w": jax.random.uniform(k1, (d_in, d_out), jnp.float32, -bu_bound, bu_bound),
            "b": jax.random.uniform(k2, (1, d_out), jnp.float32, -bu_bound, bu_bound),
            "gamma": jnp.ones((1, d_out), jnp.float32),
            "beta": jnp.zeros((1, d_out), jnp.float32),
        })

        td_bound = 1.0 / float(d_out) ** 0.5
        params["top_down"].append({
            "w": jax.random.uniform(k3, (d_out, d_in), jnp.float32, -td_bound, td_bound),
            "b": jax.random.uniform(k4, (1, d_in), jnp.float32, -td_bound, td_bound),
            "gamma": jnp.ones((1, d_in), jnp.float32),
            "beta": jnp.zeros((1, d_in), jnp.float32),
        })

        # TODO(synk): w1a/w1b are the rep-half / werr-half of PyTorch's
        # Linear(2*d_in, d_in).weight (transposed); when porting trained weights
        # split W along the input axis instead of re-sampling.
        eu_b1 = 1.0 / float(2 * d_in) ** 0.5
        eu_b2 = 1.0 / float(d_in) ** 0.5
        params["error_units"].append({
            "w1a": jax.random.uniform(k5, (d_in, d_in), jnp.float32, -eu_b1, eu_b1),
            "w1b": jax.random.uniform(k6, (d_in, d_in), jnp.float32, -eu_b1, eu_b1),
            "b1": jax.random.uniform(k7, (1, d_in), jnp.float32, -eu_b1, eu_b1),
            "w2": jax.random.uniform(k8, (d_in, d_in), jnp.float32, -eu_b2, eu_b2),
            "b2": jnp.zeros((1, d_in), jnp.float32),
        })

        # nn.Parameter(torch.ones(1) * 0.5)
        params["precision"].append(jnp.full((1,), 0.5, jnp.float32))
    return params


def hpc_forward_ref(x, params):
    """Pure-JAX f32 reference mirroring the PyTorch module (eval mode)."""
    n = len(params["bottom_up"])

    def ln(y, g, b):
        m = jnp.mean(y, -1, keepdims=True)
        v = jnp.mean((y - m) ** 2, -1, keepdims=True)
        return (y - m) / jnp.sqrt(v + _LN_EPS) * g + b

    reps = [x]
    h = x
    for i in range(n):
        bu = params["bottom_up"][i]
        h = jnp.maximum(ln(h @ bu["w"] + bu["b"], bu["gamma"], bu["beta"]), 0.0)
        reps.append(h)
    preds, errs = [], []
    for i in range(n):
        td = params["top_down"][i]
        eu = params["error_units"][i]
        pred = jnp.tanh(ln(reps[i + 1] @ td["w"] + td["b"], td["gamma"], td["beta"]))
        werr = (reps[i] - pred) * jax.nn.sigmoid(params["precision"][i][0])
        hid = jnp.maximum(reps[i] @ eu["w1a"] + werr @ eu["w1b"] + eu["b1"], 0.0)
        preds.append(pred)
        errs.append(hid @ eu["w2"] + eu["b2"])
    return preds, errs


if __name__ == "__main__":
    # Small shapes consistent with the module (defaults are 512 / [256,128,64,32]).
    BATCH = 8
    INPUT_DIM = 256
    HIDDEN_DIMS = [128, 64, 32, 16]

    key = jax.random.PRNGKey(0)
    k_params, k_input = jax.random.split(key)
    params = init_params(k_params, INPUT_DIM, HIDDEN_DIMS)
    x = jax.random.normal(k_input, (BATCH, INPUT_DIM), jnp.float32)

    fwd = jax.jit(hpc_forward)
    predictions, errors = fwd(x, params)
    jax.block_until_ready((predictions, errors))

    # sanity: shapes match the PyTorch module's returned per-level tensors
    dims = [INPUT_DIM] + HIDDEN_DIMS
    n_levels = len(HIDDEN_DIMS)
    assert [tuple(p.shape) for p in predictions] == [(BATCH, dims[i]) for i in range(n_levels)]
    assert [tuple(e.shape) for e in errors] == [(BATCH, dims[i]) for i in range(n_levels)]

    # tolerance check vs pure-JAX f32 reference (bf16 MXU operands -> loose tol)
    ref_p, ref_e = hpc_forward_ref(x, params)
    max_diff = max(
        max(float(jnp.max(jnp.abs(p.astype(jnp.float32) - r))) for p, r in zip(predictions, ref_p)),
        max(float(jnp.max(jnp.abs(e.astype(jnp.float32) - r))) for e, r in zip(errors, ref_e)))
    assert max_diff < 0.25, f"mismatch vs reference: max |diff| = {max_diff}"

    print("KERNEL_OK")
</pallas_src>

<mosaic_0001>
module attributes {stable_mosaic.version = 11 : i64} {
  func.func @_hpc_fused_kernel(%arg0: i32, %arg1: memref<8x256xf32, #tpu.memory_space<vmem>>, %arg2: memref<256x128xbf16, #tpu.memory_space<vmem>>, %arg3: memref<1x128xf32, #tpu.memory_space<vmem>>, %arg4: memref<1x128xf32, #tpu.memory_space<vmem>>, %arg5: memref<1x128xf32, #tpu.memory_space<vmem>>, %arg6: memref<128x256xbf16, #tpu.memory_space<vmem>>, %arg7: memref<1x256xf32, #tpu.memory_space<vmem>>, %arg8: memref<1x256xf32, #tpu.memory_space<vmem>>, %arg9: memref<1x256xf32, #tpu.memory_space<vmem>>, %arg10: memref<256x256xbf16, #tpu.memory_space<vmem>>, %arg11: memref<256x256xbf16, #tpu.memory_space<vmem>>, %arg12: memref<1x256xf32, #tpu.memory_space<vmem>>, %arg13: memref<256x256xbf16, #tpu.memory_space<vmem>>, %arg14: memref<1x256xf32, #tpu.memory_space<vmem>>, %arg15: memref<128x64xbf16, #tpu.memory_space<vmem>>, %arg16: memref<1x64xf32, #tpu.memory_space<vmem>>, %arg17: memref<1x64xf32, #tpu.memory_space<vmem>>, %arg18: memref<1x64xf32, #tpu.memory_space<vmem>>, %arg19: memref<64x128xbf16, #tpu.memory_space<vmem>>, %arg20: memref<1x128xf32, #tpu.memory_space<vmem>>, %arg21: memref<1x128xf32, #tpu.memory_space<vmem>>, %arg22: memref<1x128xf32, #tpu.memory_space<vmem>>, %arg23: memref<128x128xbf16, #tpu.memory_space<vmem>>, %arg24: memref<128x128xbf16, #tpu.memory_space<vmem>>, %arg25: memref<1x128xf32, #tpu.memory_space<vmem>>, %arg26: memref<128x128xbf16, #tpu.memory_space<vmem>>, %arg27: memref<1x128xf32, #tpu.memory_space<vmem>>, %arg28: memref<64x32xbf16, #tpu.memory_space<vmem>>, %arg29: memref<1x32xf32, #tpu.memory_space<vmem>>, %arg30: memref<1x32xf32, #tpu.memory_space<vmem>>, %arg31: memref<1x32xf32, #tpu.memory_space<vmem>>, %arg32: memref<32x128xbf16, #tpu.memory_space<vmem>>, %arg33: memref<1x128xf32, #tpu.memory_space<vmem>>, %arg34: memref<1x128xf32, #tpu.memory_space<vmem>>, %arg35: memref<1x128xf32, #tpu.memory_space<vmem>>, %arg36: memref<64x64xbf16, #tpu.memory_space<vmem>>, %arg37: memref<64x64xbf16, #tpu.memory_space<vmem>>, %arg38: memref<1x64xf32, #tpu.memory_space<vmem>>, %arg39: memref<64x128xbf16, #tpu.memory_space<vmem>>, %arg40: memref<1x128xf32, #tpu.memory_space<vmem>>, %arg41: memref<32x16xbf16, #tpu.memory_space<vmem>>, %arg42: memref<1x16xf32, #tpu.memory_space<vmem>>, %arg43: memref<1x16xf32, #tpu.memory_space<vmem>>, %arg44: memref<1x16xf32, #tpu.memory_space<vmem>>, %arg45: memref<16x128xbf16, #tpu.memory_space<vmem>>, %arg46: memref<1x128xf32, #tpu.memory_space<vmem>>, %arg47: memref<1x128xf32, #tpu.memory_space<vmem>>, %arg48: memref<1x128xf32, #tpu.memory_space<vmem>>, %arg49: memref<32x32xbf16, #tpu.memory_space<vmem>>, %arg50: memref<32x32xbf16, #tpu.memory_space<vmem>>, %arg51: memref<1x32xf32, #tpu.memory_space<vmem>>, %arg52: memref<32x128xbf16, #tpu.memory_space<vmem>>, %arg53: memref<1x128xf32, #tpu.memory_space<vmem>>, %arg54: memref<4xf32, #tpu.memory_space<smem>>, %arg55: memref<8x640xf32, #tpu.memory_space<vmem>>, %arg56: memref<8x640xf32, #tpu.memory_space<vmem>>) attributes {dimension_semantics = [#tpu.dimension_semantics<parallel>], iteration_bounds = array<i64: 1>, scalar_prefetch = 0 : i64, scratch_operands = 0 : i64, tpu.core_type = #tpu.core_type<tc>, window_params = [{transform_indices = @transform_0, window_bounds = array<i64: 8, 256>}, {pipeline_mode = #tpu.pipeline_mode<synchronous>, transform_indices = @transform_1, window_bounds = array<i64: 256, 128>}, {pipeline_mode = #tpu.pipeline_mode<synchronous>, transform_indices = @transform_2, window_bounds = array<i64: 1, 128>}, {pipeline_mode = #tpu.pipeline_mode<synchronous>, transform_indices = @transform_3, window_bounds = array<i64: 1, 128>}, {pipeline_mode = #tpu.pipeline_mode<synchronous>, transform_indices = @transform_4, window_bounds = array<i64: 1, 128>}, {pipeline_mode = #tpu.pipeline_mode<synchronous>, transform_indices = @transform_5, window_bounds = array<i64: 128, 256>}, {pipeline_mode = #tpu.pipeline_mode<synchronous>, transform_indices = @transform_6, window_bounds = array<i64: 1, 256>}, {pipeline_mode = #tpu.pipeline_mode<synchronous>, transform_indices = @transform_7, window_bounds = array<i64: 1, 256>}, {pipeline_mode = #tpu.pipeline_mode<synchronous>, transform_indices = @transform_8, window_bounds = array<i64: 1, 256>}, {pipeline_mode = #tpu.pipeline_mode<synchronous>, transform_indices = @transform_9, window_bounds = array<i64: 256, 256>}, {pipeline_mode = #tpu.pipeline_mode<synchronous>, transform_indices = @transform_10, window_bounds = array<i64: 256, 256>}, {pipeline_mode = #tpu.pipeline_mode<synchronous>, transform_indices = @transform_11, window_bounds = array<i64: 1, 256>}, {pipeline_mode = #tpu.pipeline_mode<synchronous>, transform_indices = @transform_12, window_bounds = array<i64: 256, 256>}, {pipeline_mode = #tpu.pipeline_mode<synchronous>, transform_indices = @transform_13, window_bounds = array<i64: 1, 256>}, {pipeline_mode = #tpu.pipeline_mode<synchronous>, transform_indices = @transform_14, window_bounds = array<i64: 128, 64>}, {pipeline_mode = #tpu.pipeline_mode<synchronous>, transform_indices = @transform_15, window_bounds = array<i64: 1, 64>}, {pipeline_mode = #tpu.pipeline_mode<synchronous>, transform_indices = @transform_16, window_bounds = array<i64: 1, 64>}, {pipeline_mode = #tpu.pipeline_mode<synchronous>, transform_indices = @transform_17, window_bounds = array<i64: 1, 64>}, {pipeline_mode = #tpu.pipeline_mode<synchronous>, transform_indices = @transform_18, window_bounds = array<i64: 64, 128>}, {pipeline_mode = #tpu.pipeline_mode<synchronous>, transform_indices = @transform_19, window_bounds = array<i64: 1, 128>}, {pipeline_mode = #tpu.pipeline_mode<synchronous>, transform_indices = @transform_20, window_bounds = array<i64: 1, 128>}, {pipeline_mode = #tpu.pipeline_mode<synchronous>, transform_indices = @transform_21, window_bounds = array<i64: 1, 128>}, {pipeline_mode = #tpu.pipeline_mode<synchronous>, transform_indices = @transform_22, window_bounds = array<i64: 128, 128>}, {pipeline_mode = #tpu.pipeline_mode<synchronous>, transform_indices = @transform_23, window_bounds = array<i64: 128, 128>}, {pipeline_mode = #tpu.pipeline_mode<synchronous>, transform_indices = @transform_24, window_bounds = array<i64: 1, 128>}, {pipeline_mode = #tpu.pipeline_mode<synchronous>, transform_indices = @transform_25, window_bounds = array<i64: 128, 128>}, {pipeline_mode = #tpu.pipeline_mode<synchronous>, transform_indices = @transform_26, window_bounds = array<i64: 1, 128>}, {pipeline_mode = #tpu.pipeline_mode<synchronous>, transform_indices = @transform_27, window_bounds = array<i64: 64, 32>}, {pipeline_mode = #tpu.pipeline_mode<synchronous>, transform_indices = @transform_28, window_bounds = array<i64: 1, 32>}, {pipeline_mode = #tpu.pipeline_mode<synchronous>, transform_indices = @transform_29, window_bounds = array<i64: 1, 32>}, {pipeline_mode = #tpu.pipeline_mode<synchronous>, transform_indices = @transform_30, window_bounds = array<i64: 1, 32>}, {pipeline_mode = #tpu.pipeline_mode<synchronous>, transform_indices = @transform_31, window_bounds = array<i64: 32, 128>}, {pipeline_mode = #tpu.pipeline_mode<synchronous>, transform_indices = @transform_32, window_bounds = array<i64: 1, 128>}, {pipeline_mode = #tpu.pipeline_mode<synchronous>, transform_indices = @transform_33, window_bounds = array<i64: 1, 128>}, {pipeline_mode = #tpu.pipeline_mode<synchronous>, transform_indices = @transform_34, window_bounds = array<i64: 1, 128>}, {pipeline_mode = #tpu.pipeline_mode<synchronous>, transform_indices = @transform_35, window_bounds = array<i64: 64, 64>}, {pipeline_mode = #tpu.pipeline_mode<synchronous>, transform_indices = @transform_36, window_bounds = array<i64: 64, 64>}, {pipeline_mode = #tpu.pipeline_mode<synchronous>, transform_indices = @transform_37, window_bounds = array<i64: 1, 64>}, {pipeline_mode = #tpu.pipeline_mode<synchronous>, transform_indices = @transform_38, window_bounds = array<i64: 64, 128>}, {pipeline_mode = #tpu.pipeline_mode<synchronous>, transform_indices = @transform_39, window_bounds = array<i64: 1, 128>}, {pipeline_mode = #tpu.pipeline_mode<synchronous>, transform_indices = @transform_40, window_bounds = array<i64: 32, 16>}, {pipeline_mode = #tpu.pipeline_mode<synchronous>, transform_indices = @transform_41, window_bounds = array<i64: 1, 16>}, {pipeline_mode = #tpu.pipeline_mode<synchronous>, transform_indices = @transform_42, window_bounds = array<i64: 1, 16>}, {pipeline_mode = #tpu.pipeline_mode<synchronous>, transform_indices = @transform_43, window_bounds = array<i64: 1, 16>}, {pipeline_mode = #tpu.pipeline_mode<synchronous>, transform_indices = @transform_44, window_bounds = array<i64: 16, 128>}, {pipeline_mode = #tpu.pipeline_mode<synchronous>, transform_indices = @transform_45, window_bounds = array<i64: 1, 128>}, {pipeline_mode = #tpu.pipeline_mode<synchronous>, transform_indices = @transform_46, window_bounds = array<i64: 1, 128>}, {pipeline_mode = #tpu.pipeline_mode<synchronous>, transform_indices = @transform_47, window_bounds = array<i64: 1, 128>}, {pipeline_mode = #tpu.pipeline_mode<synchronous>, transform_indices = @transform_48, window_bounds = array<i64: 32, 32>}, {pipeline_mode = #tpu.pipeline_mode<synchronous>, transform_indices = @transform_49, window_bounds = array<i64: 32, 32>}, {pipeline_mode = #tpu.pipeline_mode<synchronous>, transform_indices = @transform_50, window_bounds = array<i64: 1, 32>}, {pipeline_mode = #tpu.pipeline_mode<synchronous>, transform_indices = @transform_51, window_bounds = array<i64: 32, 128>}, {pipeline_mode = #tpu.pipeline_mode<synchronous>, transform_indices = @transform_52, window_bounds = array<i64: 1, 128>}, {transform_indices = @transform_53, window_bounds = array<i64: 4>}, {transform_indices = @transform_54, window_bounds = array<i64: 8, 640>}, {transform_indices = @transform_55, window_bounds = array<i64: 8, 640>}]} {
    %c0 = arith.constant 0 : index
    %c0_0 = arith.constant 0 : index
    %0 = vector.load %arg1[%c0, %c0_0] : memref<8x256xf32, #tpu.memory_space<vmem>>, vector<8x256xf32>
    %1 = arith.truncf %0 : vector<8x256xf32> to vector<8x256xbf16>
    %c0_1 = arith.constant 0 : index
    %c0_2 = arith.constant 0 : index
    %2 = vector.load %arg2[%c0_1, %c0_2] : memref<256x128xbf16, #tpu.memory_space<vmem>>, vector<256x128xbf16>
    %cst = arith.constant dense<0.000000e+00> : vector<8x128xf32>
    %3 = tpu.matmul %1, %2, %cst {dimension_numbers = #tpu.dot_dimension_numbers<[1], [0], [0], [1], [0, 0, 1, 1], [], []>} : vector<8x256xbf16>, vector<256x128xbf16>, vector<8x128xf32> -> vector<8x128xf32>
    %c0_3 = arith.constant 0 : index
    %c0_4 = arith.constant 0 : index
    %4 = vector.load %arg3[%c0_3, %c0_4] : memref<1x128xf32, #tpu.memory_space<vmem>>, vector<1x128xf32>
    %5 = vector.broadcast %4 : vector<1x128xf32> to vector<8x128xf32>
    %6 = arith.addf %3, %5 : vector<8x128xf32>
    %cst_5 = arith.constant dense<0.000000e+00> : vector<8xf32>
    %7 = vector.multi_reduction <add>, %6, %cst_5 [1] : vector<8x128xf32> to vector<8xf32>
    %8 = vector.shape_cast %7 : vector<8xf32> to vector<8x1xf32>
    %9 = arith.mulf %6, %6 : vector<8x128xf32>
    %cst_6 = arith.constant dense<0.000000e+00> : vector<8xf32>
    %10 = vector.multi_reduction <add>, %9, %cst_6 [1] : vector<8x128xf32> to vector<8xf32>
    %11 = vector.shape_cast %10 : vector<8xf32> to vector<8x1xf32>
    %cst_7 = arith.constant 7.812500e-03 : f32
    %12 = vector.broadcast %cst_7 : f32 to vector<8x1xf32>
    %13 = arith.mulf %8, %12 : vector<8x1xf32>
    %cst_8 = arith.constant 7.812500e-03 : f32
    %14 = vector.broadcast %cst_8 : f32 to vector<8x1xf32>
    %15 = arith.mulf %11, %14 : vector<8x1xf32>
    %16 = arith.mulf %13, %13 : vector<8x1xf32>
    %17 = arith.subf %15, %16 : vector<8x1xf32>
    %cst_9 = arith.constant 0.000000e+00 : f32
    %18 = vector.broadcast %cst_9 : f32 to vector<8x1xf32>
    %19 = arith.maximumf %17, %18 : vector<8x1xf32>
    %20 = vector.broadcast %13 : vector<8x1xf32> to vector<8x128xf32>
    %21 = arith.subf %6, %20 : vector<8x128xf32>
    %cst_10 = arith.constant 9.99999974E-6 : f32
    %22 = vector.broadcast %cst_10 : f32 to vector<8x1xf32>
    %23 = arith.addf %19, %22 : vector<8x1xf32>
    %24 = math.rsqrt %23 : vector<8x1xf32>
    %25 = vector.broadcast %24 : vector<8x1xf32> to vector<8x128xf32>
    %26 = arith.mulf %21, %25 : vector<8x128xf32>
    %c0_11 = arith.constant 0 : index
    %c0_12 = arith.constant 0 : index
    %27 = vector.load %arg4[%c0_11, %c0_12] : memref<1x128xf32, #tpu.memory_space<vmem>>, vector<1x128xf32>
    %28 = vector.broadcast %27 : vector<1x128xf32> to vector<8x128xf32>
    %29 = arith.mulf %26, %28 : vector<8x128xf32>
    %c0_13 = arith.constant 0 : index
    %c0_14 = arith.constant 0 : index
    %30 = vector.load %arg5[%c0_13, %c0_14] : memref<1x128xf32, #tpu.memory_space<vmem>>, vector<1x128xf32>
    %31 = vector.broadcast %30 : vector<1x128xf32> to vector<8x128xf32>
    %32 = arith.addf %29, %31 : vector<8x128xf32>
    %cst_15 = arith.constant 0.000000e+00 : f32
    %33 = vector.broadcast %cst_15 : f32 to vector<8x128xf32>
    %34 = arith.maximumf %32, %33 : vector<8x128xf32>
    %35 = arith.truncf %34 : vector<8x128xf32> to vector<8x128xbf16>
    %c0_16 = arith.constant 0 : index
    %c0_17 = arith.constant 0 : index
    %36 = vector.load %arg15[%c0_16, %c0_17] : memref<128x64xbf16, #tpu.memory_space<vmem>>, vector<128x64xbf16>
    %cst_18 = arith.constant dense<0.000000e+00> : vector<8x64xf32>
    %37 = tpu.matmul %35, %36, %cst_18 {dimension_numbers = #tpu.dot_dimension_numbers<[1], [0], [0], [1], [0, 0, 1, 1], [], []>} : vector<8x128xbf16>, vector<128x64xbf16>, vector<8x64xf32> -> vector<8x64xf32>
    %c0_19 = arith.constant 0 : index
    %c0_20 = arith.constant 0 : index
    %38 = vector.load %arg16[%c0_19, %c0_20] : memref<1x64xf32, #tpu.memory_space<vmem>>, vector<1x64xf32>
    %39 = vector.broadcast %38 : vector<1x64xf32> to vector<8x64xf32>
    %40 = arith.addf %37, %39 : vector<8x64xf32>
    %cst_21 = arith.constant dense<0.000000e+00> : vector<8xf32>
    %41 = vector.multi_reduction <add>, %40, %cst_21 [1] : vector<8x64xf32> to vector<8xf32>
    %42 = vector.shape_cast %41 : vector<8xf32> to vector<8x1xf32>
    %43 = arith.mulf %40, %40 : vector<8x64xf32>
    %cst_22 = arith.constant dense<0.000000e+00> : vector<8xf32>
    %44 = vector.multi_reduction <add>, %43, %cst_22 [1] : vector<8x64xf32> to vector<8xf32>
    %45 = vector.shape_cast %44 : vector<8xf32> to vector<8x1xf32>
    %cst_23 = arith.constant 1.562500e-02 : f32
    %46 = vector.broadcast %cst_23 : f32 to vector<8x1xf32>
    %47 = arith.mulf %42, %46 : vector<8x1xf32>
    %cst_24 = arith.constant 1.562500e-02 : f32
    %48 = vector.broadcast %cst_24 : f32 to vector<8x1xf32>
    %49 = arith.mulf %45, %48 : vector<8x1xf32>
    %50 = arith.mulf %47, %47 : vector<8x1xf32>
    %51 = arith.subf %49, %50 : vector<8x1xf32>
    %cst_25 = arith.constant 0.000000e+00 : f32
    %52 = vector.broadcast %cst_25 : f32 to vector<8x1xf32>
    %53 = arith.maximumf %51, %52 : vector<8x1xf32>
    %54 = vector.broadcast %47 : vector<8x1xf32> to vector<8x64xf32>
    %55 = arith.subf %40, %54 : vector<8x64xf32>
    %cst_26 = arith.constant 9.99999974E-6 : f32
    %56 = vector.broadcast %cst_26 : f32 to vector<8x1xf32>
    %57 = arith.addf %53, %56 : vector<8x1xf32>
    %58 = math.rsqrt %57 : vector<8x1xf32>
    %59 = vector.broadcast %58 : vector<8x1xf32> to vector<8x64xf32>
    %60 = arith.mulf %55, %59 : vector<8x64xf32>
    %c0_27 = arith.constant 0 : index
    %c0_28 = arith.constant 0 : index
    %61 = vector.load %arg17[%c0_27, %c0_28] : memref<1x64xf32, #tpu.memory_space<vmem>>, vector<1x64xf32>
    %62 = vector.broadcast %61 : vector<1x64xf32> to vector<8x64xf32>
    %63 = arith.mulf %60, %62 : vector<8x64xf32>
    %c0_29 = arith.constant 0 : index
    %c0_30 = arith.constant 0 : index
    %64 = vector.load %arg18[%c0_29, %c0_30] : memref<1x64xf32, #tpu.memory_space<vmem>>, vector<1x64xf32>
    %65 = vector.broadcast %64 : vector<1x64xf32> to vector<8x64xf32>
    %66 = arith.addf %63, %65 : vector<8x64xf32>
    %cst_31 = arith.constant 0.000000e+00 : f32
    %67 = vector.broadcast %cst_31 : f32 to vector<8x64xf32>
    %68 = arith.maximumf %66, %67 : vector<8x64xf32>
    %69 = arith.truncf %68 : vector<8x64xf32> to vector<8x64xbf16>
    %c0_32 = arith.constant 0 : index
    %c0_33 = arith.constant 0 : index
    %70 = vector.load %arg28[%c0_32, %c0_33] : memref<64x32xbf16, #tpu.memory_space<vmem>>, vector<64x32xbf16>
    %cst_34 = arith.constant dense<0.000000e+00> : vector<8x32xf32>
    %71 = tpu.matmul %69, %70, %cst_34 {dimension_numbers = #tpu.dot_dimension_numbers<[1], [0], [0], [1], [0, 0, 1, 1], [], []>} : vector<8x64xbf16>, vector<64x32xbf16>, vector<8x32xf32> -> vector<8x32xf32>
    %c0_35 = arith.constant 0 : index
    %c0_36 = arith.constant 0 : index
    %72 = vector.load %arg29[%c0_35, %c0_36] : memref<1x32xf32, #tpu.memory_space<vmem>>, vector<1x32xf32>
    %73 = vector.broadcast %72 : vector<1x32xf32> to vector<8x32xf32>
    %74 = arith.addf %71, %73 : vector<8x32xf32>
    %cst_37 = arith.constant dense<0.000000e+00> : vector<8xf32>
    %75 = vector.multi_reduction <add>, %74, %cst_37 [1] : vector<8x32xf32> to vector<8xf32>
    %76 = vector.shape_cast %75 : vector<8xf32> to vector<8x1xf32>
    %77 = arith.mulf %74, %74 : vector<8x32xf32>
    %cst_38 = arith.constant dense<0.000000e+00> : vector<8xf32>
    %78 = vector.multi_reduction <add>, %77, %cst_38 [1] : vector<8x32xf32> to vector<8xf32>
    %79 = vector.shape_cast %78 : vector<8xf32> to vector<8x1xf32>
    %cst_39 = arith.constant 3.125000e-02 : f32
    %80 = vector.broadcast %cst_39 : f32 to vector<8x1xf32>
    %81 = arith.mulf %76, %80 : vector<8x1xf32>
    %cst_40 = arith.constant 3.125000e-02 : f32
    %82 = vector.broadcast %cst_40 : f32 to vector<8x1xf32>
    %83 = arith.mulf %79, %82 : vector<8x1xf32>
    %84 = arith.mulf %81, %81 : vector<8x1xf32>
    %85 = arith.subf %83, %84 : vector<8x1xf32>
    %cst_41 = arith.constant 0.000000e+00 : f32
    %86 = vector.broadcast %cst_41 : f32 to vector<8x1xf32>
    %87 = arith.maximumf %85, %86 : vector<8x1xf32>
    %88 = vector.broadcast %81 : vector<8x1xf32> to vector<8x32xf32>
    %89 = arith.subf %74, %88 : vector<8x32xf32>
    %cst_42 = arith.constant 9.99999974E-6 : f32
    %90 = vector.broadcast %cst_42 : f32 to vector<8x1xf32>
    %91 = arith.addf %87, %90 : vector<8x1xf32>
    %92 = math.rsqrt %91 : vector<8x1xf32>
    %93 = vector.broadcast %92 : vector<8x1xf32> to vector<8x32xf32>
    %94 = arith.mulf %89, %93 : vector<8x32xf32>
    %c0_43 = arith.constant 0 : index
    %c0_44 = arith.constant 0 : index
    %95 = vector.load %arg30[%c0_43, %c0_44] : memref<1x32xf32, #tpu.memory_space<vmem>>, vector<1x32xf32>
    %96 = vector.broadcast %95 : vector<1x32xf32> to vector<8x32xf32>
    %97 = arith.mulf %94, %96 : vector<8x32xf32>
    %c0_45 = arith.constant 0 : index
    %c0_46 = arith.constant 0 : index
    %98 = vector.load %arg31[%c0_45, %c0_46] : memref<1x32xf32, #tpu.memory_space<vmem>>, vector<1x32xf32>
    %99 = vector.broadcast %98 : vector<1x32xf32> to vector<8x32xf32>
    %100 = arith.addf %97, %99 : vector<8x32xf32>
    %cst_47 = arith.constant 0.000000e+00 : f32
    %101 = vector.broadcast %cst_47 : f32 to vector<8x32xf32>
    %102 = arith.maximumf %100, %101 : vector<8x32xf32>
    %103 = arith.truncf %102 : vector<8x32xf32> to vector<8x32xbf16>
    %c0_48 = arith.constant 0 : index
    %c0_49 = arith.constant 0 : index
    %104 = vector.load %arg41[%c0_48, %c0_49] : memref<32x16xbf16, #tpu.memory_space<vmem>>, vector<32x16xbf16>
    %cst_50 = arith.constant dense<0.000000e+00> : vector<8x16xf32>
    %105 = tpu.matmul %103, %104, %cst_50 {dimension_numbers = #tpu.dot_dimension_numbers<[1], [0], [0], [1], [0, 0, 1, 1], [], []>} : vector<8x32xbf16>, vector<32x16xbf16>, vector<8x16xf32> -> vector<8x16xf32>
    %c0_51 = arith.constant 0 : index
    %c0_52 = arith.constant 0 : index
    %106 = vector.load %arg42[%c0_51, %c0_52] : memref<1x16xf32, #tpu.memory_space<vmem>>, vector<1x16xf32>
    %107 = vector.broadcast %106 : vector<1x16xf32> to vector<8x16xf32>
    %108 = arith.addf %105, %107 : vector<8x16xf32>
    %cst_53 = arith.constant dense<0.000000e+00> : vector<8xf32>
    %109 = vector.multi_reduction <add>, %108, %cst_53 [1] : vector<8x16xf32> to vector<8xf32>
    %110 = vector.shape_cast %109 : vector<8xf32> to vector<8x1xf32>
    %111 = arith.mulf %108, %108 : vector<8x16xf32>
    %cst_54 = arith.constant dense<0.000000e+00> : vector<8xf32>
    %112 = vector.multi_reduction <add>, %111, %cst_54 [1] : vector<8x16xf32> to vector<8xf32>
    %113 = vector.shape_cast %112 : vector<8xf32> to vector<8x1xf32>
    %cst_55 = arith.constant 6.250000e-02 : f32
    %114 = vector.broadcast %cst_55 : f32 to vector<8x1xf32>
    %115 = arith.mulf %110, %114 : vector<8x1xf32>
    %cst_56 = arith.constant 6.250000e-02 : f32
    %116 = vector.broadcast %cst_56 : f32 to vector<8x1xf32>
    %117 = arith.mulf %113, %116 : vector<8x1xf32>
    %118 = arith.mulf %115, %115 : vector<8x1xf32>
    %119 = arith.subf %117, %118 : vector<8x1xf32>
    %cst_57 = arith.constant 0.000000e+00 : f32
    %120 = vector.broadcast %cst_57 : f32 to vector<8x1xf32>
    %121 = arith.maximumf %119, %120 : vector<8x1xf32>
    %122 = vector.broadcast %115 : vector<8x1xf32> to vector<8x16xf32>
    %123 = arith.subf %108, %122 : vector<8x16xf32>
    %cst_58 = arith.constant 9.99999974E-6 : f32
    %124 = vector.broadcast %cst_58 : f32 to vector<8x1xf32>
    %125 = arith.addf %121, %124 : vector<8x1xf32>
    %126 = math.rsqrt %125 : vector<8x1xf32>
    %127 = vector.broadcast %126 : vector<8x1xf32> to vector<8x16xf32>
    %128 = arith.mulf %123, %127 : vector<8x16xf32>
    %c0_59 = arith.constant 0 : index
    %c0_60 = arith.constant 0 : index
    %129 = vector.load %arg43[%c0_59, %c0_60] : memref<1x16xf32, #tpu.memory_space<vmem>>, vector<1x16xf32>
    %130 = vector.broadcast %129 : vector<1x16xf32> to vector<8x16xf32>
    %131 = arith.mulf %128, %130 : vector<8x16xf32>
    %c0_61 = arith.constant 0 : index
    %c0_62 = arith.constant 0 : index
    %132 = vector.load %arg44[%c0_61, %c0_62] : memref<1x16xf32, #tpu.memory_space<vmem>>, vector<1x16xf32>
    %133 = vector.broadcast %132 : vector<1x16xf32> to vector<8x16xf32>
    %134 = arith.addf %131, %133 : vector<8x16xf32>
    %cst_63 = arith.constant 0.000000e+00 : f32
    %135 = vector.broadcast %cst_63 : f32 to vector<8x16xf32>
    %136 = arith.maximumf %134, %135 : vector<8x16xf32>
    %137 = arith.truncf %136 : vector<8x16xf32> to vector<8x16xbf16>
    %c0_64 = arith.constant 0 : index
    %c0_65 = arith.constant 0 : index
    %138 = vector.load %arg6[%c0_64, %c0_65] : memref<128x256xbf16, #tpu.memory_space<vmem>>, vector<128x256xbf16>
    %cst_66 = arith.constant dense<0.000000e+00> : vector<8x256xf32>
    %139 = tpu.matmul %35, %138, %cst_66 {dimension_numbers = #tpu.dot_dimension_numbers<[1], [0], [0], [1], [0, 0, 1, 1], [], []>} : vector<8x128xbf16>, vector<128x256xbf16>, vector<8x256xf32> -> vector<8x256xf32>
    %c0_67 = arith.constant 0 : index
    %c0_68 = arith.constant 0 : index
    %140 = vector.load %arg7[%c0_67, %c0_68] : memref<1x256xf32, #tpu.memory_space<vmem>>, vector<1x256xf32>
    %141 = vector.broadcast %140 : vector<1x256xf32> to vector<8x256xf32>
    %142 = arith.addf %139, %141 : vector<8x256xf32>
    %cst_69 = arith.constant dense<0.000000e+00> : vector<8xf32>
    %143 = vector.multi_reduction <add>, %142, %cst_69 [1] : vector<8x256xf32> to vector<8xf32>
    %144 = vector.shape_cast %143 : vector<8xf32> to vector<8x1xf32>
    %145 = arith.mulf %142, %142 : vector<8x256xf32>
    %cst_70 = arith.constant dense<0.000000e+00> : vector<8xf32>
    %146 = vector.multi_reduction <add>, %145, %cst_70 [1] : vector<8x256xf32> to vector<8xf32>
    %147 = vector.shape_cast %146 : vector<8xf32> to vector<8x1xf32>
    %cst_71 = arith.constant 3.906250e-03 : f32
    %148 = vector.broadcast %cst_71 : f32 to vector<8x1xf32>
    %149 = arith.mulf %144, %148 : vector<8x1xf32>
    %cst_72 = arith.constant 3.906250e-03 : f32
    %150 = vector.broadcast %cst_72 : f32 to vector<8x1xf32>
    %151 = arith.mulf %147, %150 : vector<8x1xf32>
    %152 = arith.mulf %149, %149 : vector<8x1xf32>
    %153 = arith.subf %151, %152 : vector<8x1xf32>
    %cst_73 = arith.constant 0.000000e+00 : f32
    %154 = vector.broadcast %cst_73 : f32 to vector<8x1xf32>
    %155 = arith.maximumf %153, %154 : vector<8x1xf32>
    %156 = vector.broadcast %149 : vector<8x1xf32> to vector<8x256xf32>
    %157 = arith.subf %142, %156 : vector<8x256xf32>
    %cst_74 = arith.constant 9.99999974E-6 : f32
    %158 = vector.broadcast %cst_74 : f32 to vector<8x1xf32>
    %159 = arith.addf %155, %158 : vector<8x1xf32>
    %160 = math.rsqrt %159 : vector<8x1xf32>
    %161 = vector.broadcast %160 : vector<8x1xf32> to vector<8x256xf32>
    %162 = arith.mulf %157, %161 : vector<8x256xf32>
    %c0_75 = arith.constant 0 : index
    %c0_76 = arith.constant 0 : index
    %163 = vector.load %arg8[%c0_75, %c0_76] : memref<1x256xf32, #tpu.memory_space<vmem>>, vector<1x256xf32>
    %164 = vector.broadcast %163 : vector<1x256xf32> to vector<8x256xf32>
    %165 = arith.mulf %162, %164 : vector<8x256xf32>
    %c0_77 = arith.constant 0 : index
    %c0_78 = arith.constant 0 : index
    %166 = vector.load %arg9[%c0_77, %c0_78] : memref<1x256xf32, #tpu.memory_space<vmem>>, vector<1x256xf32>
    %167 = vector.broadcast %166 : vector<1x256xf32> to vector<8x256xf32>
    %168 = arith.addf %165, %167 : vector<8x256xf32>
    %169 = math.tanh %168 : vector<8x256xf32>
    %c0_79 = arith.constant 0 : index
    %c0_80 = arith.constant 0 : index
    %170 = vector.load %arg55[%c0_79, %c0_80] : memref<8x640xf32, #tpu.memory_space<vmem>>, vector<8x256xf32>
    tpu.vector_store %arg55[%c0_79, %c0_80], %169 {strides = array<i32>} : memref<8x640xf32, #tpu.memory_space<vmem>>, vector<8x256xf32>,
    %c0_81 = arith.constant 0 : index
    %171 = memref.load %arg54[%c0_81] : memref<4xf32, #tpu.memory_space<smem>>
    %172 = vector.broadcast %171 : f32 to vector<1x1xf32>
    %173 = arith.negf %172 : vector<1x1xf32>
    %174 = math.exp %173 : vector<1x1xf32>
    %cst_82 = arith.constant 1.000000e+00 : f32
    %175 = vector.broadcast %cst_82 : f32 to vector<1x1xf32>
    %176 = arith.addf %175, %174 : vector<1x1xf32>
    %177 = arith.divf %175, %176 : vector<1x1xf32>
    %178 = arith.subf %0, %169 : vector<8x256xf32>
    %179 = vector.broadcast %177 : vector<1x1xf32> to vector<8x256xf32>
    %180 = arith.mulf %178, %179 : vector<8x256xf32>
    %c0_83 = arith.constant 0 : index
    %c0_84 = arith.constant 0 : index
    %181 = vector.load %arg10[%c0_83, %c0_84] : memref<256x256xbf16, #tpu.memory_space<vmem>>, vector<256x256xbf16>
    %cst_85 = arith.constant dense<0.000000e+00> : vector<8x256xf32>
    %182 = tpu.matmul %1, %181, %cst_85 {dimension_numbers = #tpu.dot_dimension_numbers<[1], [0], [0], [1], [0, 0, 1, 1], [], []>} : vector<8x256xbf16>, vector<256x256xbf16>, vector<8x256xf32> -> vector<8x256xf32>
    %183 = arith.truncf %180 : vector<8x256xf32> to vector<8x256xbf16>
    %c0_86 = arith.constant 0 : index
    %c0_87 = arith.constant 0 : index
    %184 = vector.load %arg11[%c0_86, %c0_87] : memref<256x256xbf16, #tpu.memory_space<vmem>>, vector<256x256xbf16>
    %cst_88 = arith.constant dense<0.000000e+00> : vector<8x256xf32>
    %185 = tpu.matmul %183, %184, %cst_88 {dimension_numbers = #tpu.dot_dimension_numbers<[1], [0], [0], [1], [0, 0, 1, 1], [], []>} : vector<8x256xbf16>, vector<256x256xbf16>, vector<8x256xf32> -> vector<8x256xf32>
    %186 = arith.addf %182, %185 : vector<8x256xf32>
    %c0_89 = arith.constant 0 : index
    %c0_90 = arith.constant 0 : index
    %187 = vector.load %arg12[%c0_89, %c0_90] : memref<1x256xf32, #tpu.memory_space<vmem>>, vector<1x256xf32>
    %188 = vector.broadcast %187 : vector<1x256xf32> to vector<8x256xf32>
    %189 = arith.addf %186, %188 : vector<8x256xf32>
    %cst_91 = arith.constant 0.000000e+00 : f32
    %190 = vector.broadcast %cst_91 : f32 to vector<8x256xf32>
    %191 = arith.maximumf %189, %190 : vector<8x256xf32>
    %192 = arith.truncf %191 : vector<8x256xf32> to vector<8x256xbf16>
    %c0_92 = arith.constant 0 : index
    %c0_93 = arith.constant 0 : index
    %193 = vector.load %arg13[%c0_92, %c0_93] : memref<256x256xbf16, #tpu.memory_space<vmem>>, vector<256x256xbf16>
    %cst_94 = arith.constant dense<0.000000e+00> : vector<8x256xf32>
    %194 = tpu.matmul %192, %193, %cst_94 {dimension_numbers = #tpu.dot_dimension_numbers<[1], [0], [0], [1], [0, 0, 1, 1], [], []>} : vector<8x256xbf16>, vector<256x256xbf16>, vector<8x256xf32> -> vector<8x256xf32>
    %c0_95 = arith.constant 0 : index
    %c0_96 = arith.constant 0 : index
    %195 = vector.load %arg14[%c0_95, %c0_96] : memref<1x256xf32, #tpu.memory_space<vmem>>, vector<1x256xf32>
    %196 = vector.broadcast %195 : vector<1x256xf32> to vector<8x256xf32>
    %197 = arith.addf %194, %196 : vector<8x256xf32>
    %c0_97 = arith.constant 0 : index
    %c0_98 = arith.constant 0 : index
    %198 = vector.load %arg56[%c0_97, %c0_98] : memref<8x640xf32, #tpu.memory_space<vmem>>, vector<8x256xf32>
    tpu.vector_store %arg56[%c0_97, %c0_98], %197 {strides = array<i32>} : memref<8x640xf32, #tpu.memory_space<vmem>>, vector<8x256xf32>,
    %c0_99 = arith.constant 0 : index
    %c0_100 = arith.constant 0 : index
    %199 = vector.load %arg19[%c0_99, %c0_100] : memref<64x128xbf16, #tpu.memory_space<vmem>>, vector<64x128xbf16>
    %cst_101 = arith.constant dense<0.000000e+00> : vector<8x128xf32>
    %200 = tpu.matmul %69, %199, %cst_101 {dimension_numbers = #tpu.dot_dimension_numbers<[1], [0], [0], [1], [0, 0, 1, 1], [], []>} : vector<8x64xbf16>, vector<64x128xbf16>, vector<8x128xf32> -> vector<8x128xf32>
    %c0_102 = arith.constant 0 : index
    %c0_103 = arith.constant 0 : index
    %201 = vector.load %arg20[%c0_102, %c0_103] : memref<1x128xf32, #tpu.memory_space<vmem>>, vector<1x128xf32>
    %202 = vector.broadcast %201 : vector<1x128xf32> to vector<8x128xf32>
    %203 = arith.addf %200, %202 : vector<8x128xf32>
    %cst_104 = arith.constant dense<0.000000e+00> : vector<8xf32>
    %204 = vector.multi_reduction <add>, %203, %cst_104 [1] : vector<8x128xf32> to vector<8xf32>
    %205 = vector.shape_cast %204 : vector<8xf32> to vector<8x1xf32>
    %206 = arith.mulf %203, %203 : vector<8x128xf32>
    %cst_105 = arith.constant dense<0.000000e+00> : vector<8xf32>
    %207 = vector.multi_reduction <add>, %206, %cst_105 [1] : vector<8x128xf32> to vector<8xf32>
    %208 = vector.shape_cast %207 : vector<8xf32> to vector<8x1xf32>
    %cst_106 = arith.constant 7.812500e-03 : f32
    %209 = vector.broadcast %cst_106 : f32 to vector<8x1xf32>
    %210 = arith.mulf %205, %209 : vector<8x1xf32>
    %cst_107 = arith.constant 7.812500e-03 : f32
    %211 = vector.broadcast %cst_107 : f32 to vector<8x1xf32>
    %212 = arith.mulf %208, %211 : vector<8x1xf32>
    %213 = arith.mulf %210, %210 : vector<8x1xf32>
    %214 = arith.subf %212, %213 : vector<8x1xf32>
    %cst_108 = arith.constant 0.000000e+00 : f32
    %215 = vector.broadcast %cst_108 : f32 to vector<8x1xf32>
    %216 = arith.maximumf %214, %215 : vector<8x1xf32>
    %217 = vector.broadcast %210 : vector<8x1xf32> to vector<8x128xf32>
    %218 = arith.subf %203, %217 : vector<8x128xf32>
    %cst_109 = arith.constant 9.99999974E-6 : f32
    %219 = vector.broadcast %cst_109 : f32 to vector<8x1xf32>
    %220 = arith.addf %216, %219 : vector<8x1xf32>
    %221 = math.rsqrt %220 : vector<8x1xf32>
    %222 = vector.broadcast %221 : vector<8x1xf32> to vector<8x128xf32>
    %223 = arith.mulf %218, %222 : vector<8x128xf32>
    %c0_110 = arith.constant 0 : index
    %c0_111 = arith.constant 0 : index
    %224 = vector.load %arg21[%c0_110, %c0_111] : memref<1x128xf32, #tpu.memory_space<vmem>>, vector<1x128xf32>
    %225 = vector.broadcast %224 : vector<1x128xf32> to vector<8x128xf32>
    %226 = arith.mulf %223, %225 : vector<8x128xf32>
    %c0_112 = arith.constant 0 : index
    %c0_113 = arith.constant 0 : index
    %227 = vector.load %arg22[%c0_112, %c0_113] : memref<1x128xf32, #tpu.memory_space<vmem>>, vector<1x128xf32>
    %228 = vector.broadcast %227 : vector<1x128xf32> to vector<8x128xf32>
    %229 = arith.addf %226, %228 : vector<8x128xf32>
    %230 = math.tanh %229 : vector<8x128xf32>
    %c0_114 = arith.constant 0 : index
    %c256 = arith.constant 256 : index
    %231 = vector.load %arg55[%c0_114, %c256] : memref<8x640xf32, #tpu.memory_space<vmem>>, vector<8x128xf32>
    tpu.vector_store %arg55[%c0_114, %c256], %230 {strides = array<i32>} : memref<8x640xf32, #tpu.memory_space<vmem>>, vector<8x128xf32>,
    %c1 = arith.constant 1 : index
    %232 = memref.load %arg54[%c1] : memref<4xf32, #tpu.memory_space<smem>>
    %233 = vector.broadcast %232 : f32 to vector<1x1xf32>
    %234 = arith.negf %233 : vector<1x1xf32>
    %235 = math.exp %234 : vector<1x1xf32>
    %cst_115 = arith.constant 1.000000e+00 : f32
    %236 = vector.broadcast %cst_115 : f32 to vector<1x1xf32>
    %237 = arith.addf %236, %235 : vector<1x1xf32>
    %238 = arith.divf %236, %237 : vector<1x1xf32>
    %239 = arith.subf %34, %230 : vector<8x128xf32>
    %240 = vector.broadcast %238 : vector<1x1xf32> to vector<8x128xf32>
    %241 = arith.mulf %239, %240 : vector<8x128xf32>
    %c0_116 = arith.constant 0 : index
    %c0_117 = arith.constant 0 : index
    %242 = vector.load %arg23[%c0_116, %c0_117] : memref<128x128xbf16, #tpu.memory_space<vmem>>, vector<128x128xbf16>
    %cst_118 = arith.constant dense<0.000000e+00> : vector<8x128xf32>
    %243 = tpu.matmul %35, %242, %cst_118 {dimension_numbers = #tpu.dot_dimension_numbers<[1], [0], [0], [1], [0, 0, 1, 1], [], []>} : vector<8x128xbf16>, vector<128x128xbf16>, vector<8x128xf32> -> vector<8x128xf32>
    %244 = arith.truncf %241 : vector<8x128xf32> to vector<8x128xbf16>
    %c0_119 = arith.constant 0 : index
    %c0_120 = arith.constant 0 : index
    %245 = vector.load %arg24[%c0_119, %c0_120] : memref<128x128xbf16, #tpu.memory_space<vmem>>, vector<128x128xbf16>
    %cst_121 = arith.constant dense<0.000000e+00> : vector<8x128xf32>
    %246 = tpu.matmul %244, %245, %cst_121 {dimension_numbers = #tpu.dot_dimension_numbers<[1], [0], [0], [1], [0, 0, 1, 1], [], []>} : vector<8x128xbf16>, vector<128x128xbf16>, vector<8x128xf32> -> vector<8x128xf32>
    %247 = arith.addf %243, %246 : vector<8x128xf32>
    %c0_122 = arith.constant 0 : index
    %c0_123 = arith.constant 0 : index
    %248 = vector.load %arg25[%c0_122, %c0_123] : memref<1x128xf32, #tpu.memory_space<vmem>>, vector<1x128xf32>
    %249 = vector.broadcast %248 : vector<1x128xf32> to vector<8x128xf32>
    %250 = arith.addf %247, %249 : vector<8x128xf32>
    %cst_124 = arith.constant 0.000000e+00 : f32
    %251 = vector.broadcast %cst_124 : f32 to vector<8x128xf32>
    %252 = arith.maximumf %250, %251 : vector<8x128xf32>
    %253 = arith.truncf %252 : vector<8x128xf32> to vector<8x128xbf16>
    %c0_125 = arith.constant 0 : index
    %c0_126 = arith.constant 0 : index
    %254 = vector.load %arg26[%c0_125, %c0_126] : memref<128x128xbf16, #tpu.memory_space<vmem>>, vector<128x128xbf16>
    %cst_127 = arith.constant dense<0.000000e+00> : vector<8x128xf32>
    %255 = tpu.matmul %253, %254, %cst_127 {dimension_numbers = #tpu.dot_dimension_numbers<[1], [0], [0], [1], [0, 0, 1, 1], [], []>} : vector<8x128xbf16>, vector<128x128xbf16>, vector<8x128xf32> -> vector<8x128xf32>
    %c0_128 = arith.constant 0 : index
    %c0_129 = arith.constant 0 : index
    %256 = vector.load %arg27[%c0_128, %c0_129] : memref<1x128xf32, #tpu.memory_space<vmem>>, vector<1x128xf32>
    %257 = vector.broadcast %256 : vector<1x128xf32> to vector<8x128xf32>
    %258 = arith.addf %255, %257 : vector<8x128xf32>
    %c0_130 = arith.constant 0 : index
    %c256_131 = arith.constant 256 : index
    %259 = vector.load %arg56[%c0_130, %c256_131] : memref<8x640xf32, #tpu.memory_space<vmem>>, vector<8x128xf32>
    tpu.vector_store %arg56[%c0_130, %c256_131], %258 {strides = array<i32>} : memref<8x640xf32, #tpu.memory_space<vmem>>, vector<8x128xf32>,
    %c0_132 = arith.constant 0 : index
    %c0_133 = arith.constant 0 : index
    %260 = vector.load %arg32[%c0_132, %c0_133] : memref<32x128xbf16, #tpu.memory_space<vmem>>, vector<32x128xbf16>
    %cst_134 = arith.constant dense<0.000000e+00> : vector<8x128xf32>
    %261 = tpu.matmul %103, %260, %cst_134 {dimension_numbers = #tpu.dot_dimension_numbers<[1], [0], [0], [1], [0, 0, 1, 1], [], []>} : vector<8x32xbf16>, vector<32x128xbf16>, vector<8x128xf32> -> vector<8x128xf32>
    %c0_135 = arith.constant 0 : index
    %c0_136 = arith.constant 0 : index
    %262 = vector.load %arg33[%c0_135, %c0_136] : memref<1x128xf32, #tpu.memory_space<vmem>>, vector<1x128xf32>
    %263 = vector.broadcast %262 : vector<1x128xf32> to vector<8x128xf32>
    %264 = arith.addf %261, %263 : vector<8x128xf32>
    %cst_137 = arith.constant dense<0.000000e+00> : vector<8xf32>
    %265 = vector.multi_reduction <add>, %264, %cst_137 [1] : vector<8x128xf32> to vector<8xf32>
    %266 = vector.shape_cast %265 : vector<8xf32> to vector<8x1xf32>
    %267 = arith.mulf %264, %264 : vector<8x128xf32>
    %cst_138 = arith.constant dense<0.000000e+00> : vector<8xf32>
    %268 = vector.multi_reduction <add>, %267, %cst_138 [1] : vector<8x128xf32> to vector<8xf32>
    %269 = vector.shape_cast %268 : vector<8xf32> to vector<8x1xf32>
    %cst_139 = arith.constant 1.562500e-02 : f32
    %270 = vector.broadcast %cst_139 : f32 to vector<8x1xf32>
    %271 = arith.mulf %266, %270 : vector<8x1xf32>
    %cst_140 = arith.constant 1.562500e-02 : f32
    %272 = vector.broadcast %cst_140 : f32 to vector<8x1xf32>
    %273 = arith.mulf %269, %272 : vector<8x1xf32>
    %274 = arith.mulf %271, %271 : vector<8x1xf32>
    %275 = arith.subf %273, %274 : vector<8x1xf32>
    %cst_141 = arith.constant 0.000000e+00 : f32
    %276 = vector.broadcast %cst_141 : f32 to vector<8x1xf32>
    %277 = arith.maximumf %275, %276 : vector<8x1xf32>
    %278 = vector.broadcast %271 : vector<8x1xf32> to vector<8x128xf32>
    %279 = arith.subf %264, %278 : vector<8x128xf32>
    %cst_142 = arith.constant 9.99999974E-6 : f32
    %280 = vector.broadcast %cst_142 : f32 to vector<8x1xf32>
    %281 = arith.addf %277, %280 : vector<8x1xf32>
    %282 = math.rsqrt %281 : vector<8x1xf32>
    %283 = vector.broadcast %282 : vector<8x1xf32> to vector<8x128xf32>
    %284 = arith.mulf %279, %283 : vector<8x128xf32>
    %c0_143 = arith.constant 0 : index
    %c0_144 = arith.constant 0 : index
    %285 = vector.load %arg34[%c0_143, %c0_144] : memref<1x128xf32, #tpu.memory_space<vmem>>, vector<1x128xf32>
    %286 = vector.broadcast %285 : vector<1x128xf32> to vector<8x128xf32>
    %287 = arith.mulf %284, %286 : vector<8x128xf32>
    %c0_145 = arith.constant 0 : index
    %c0_146 = arith.constant 0 : index
    %288 = vector.load %arg35[%c0_145, %c0_146] : memref<1x128xf32, #tpu.memory_space<vmem>>, vector<1x128xf32>
    %289 = vector.broadcast %288 : vector<1x128xf32> to vector<8x128xf32>
    %290 = arith.addf %287, %289 : vector<8x128xf32>
    %291 = math.tanh %290 : vector<8x128xf32>
    %c0_147 = arith.constant 0 : index
    %c384 = arith.constant 384 : index
    %292 = vector.load %arg55[%c0_147, %c384] : memref<8x640xf32, #tpu.memory_space<vmem>>, vector<8x128xf32>
    tpu.vector_store %arg55[%c0_147, %c384], %291 {strides = array<i32>} : memref<8x640xf32, #tpu.memory_space<vmem>>, vector<8x128xf32>,
    %293 = vector.extract_strided_slice %291 {offsets = [0, 0], sizes = [8, 64], strides = [1, 1]} : vector<8x128xf32> to vector<8x64xf32>
    %c2 = arith.constant 2 : index
    %294 = memref.load %arg54[%c2] : memref<4xf32, #tpu.memory_space<smem>>
    %295 = vector.broadcast %294 : f32 to vector<1x1xf32>
    %296 = arith.negf %295 : vector<1x1xf32>
    %297 = math.exp %296 : vector<1x1xf32>
    %cst_148 = arith.constant 1.000000e+00 : f32
    %298 = vector.broadcast %cst_148 : f32 to vector<1x1xf32>
    %299 = arith.addf %298, %297 : vector<1x1xf32>
    %300 = arith.divf %298, %299 : vector<1x1xf32>
    %301 = arith.subf %68, %293 : vector<8x64xf32>
    %302 = vector.broadcast %300 : vector<1x1xf32> to vector<8x64xf32>
    %303 = arith.mulf %301, %302 : vector<8x64xf32>
    %c0_149 = arith.constant 0 : index
    %c0_150 = arith.constant 0 : index
    %304 = vector.load %arg36[%c0_149, %c0_150] : memref<64x64xbf16, #tpu.memory_space<vmem>>, vector<64x64xbf16>
    %cst_151 = arith.constant dense<0.000000e+00> : vector<8x64xf32>
    %305 = tpu.matmul %69, %304, %cst_151 {dimension_numbers = #tpu.dot_dimension_numbers<[1], [0], [0], [1], [0, 0, 1, 1], [], []>} : vector<8x64xbf16>, vector<64x64xbf16>, vector<8x64xf32> -> vector<8x64xf32>
    %306 = arith.truncf %303 : vector<8x64xf32> to vector<8x64xbf16>
    %c0_152 = arith.constant 0 : index
    %c0_153 = arith.constant 0 : index
    %307 = vector.load %arg37[%c0_152, %c0_153] : memref<64x64xbf16, #tpu.memory_space<vmem>>, vector<64x64xbf16>
    %cst_154 = arith.constant dense<0.000000e+00> : vector<8x64xf32>
    %308 = tpu.matmul %306, %307, %cst_154 {dimension_numbers = #tpu.dot_dimension_numbers<[1], [0], [0], [1], [0, 0, 1, 1], [], []>} : vector<8x64xbf16>, vector<64x64xbf16>, vector<8x64xf32> -> vector<8x64xf32>
    %309 = arith.addf %305, %308 : vector<8x64xf32>
    %c0_155 = arith.constant 0 : index
    %c0_156 = arith.constant 0 : index
    %310 = vector.load %arg38[%c0_155, %c0_156] : memref<1x64xf32, #tpu.memory_space<vmem>>, vector<1x64xf32>
    %311 = vector.broadcast %310 : vector<1x64xf32> to vector<8x64xf32>
    %312 = arith.addf %309, %311 : vector<8x64xf32>
    %cst_157 = arith.constant 0.000000e+00 : f32
    %313 = vector.broadcast %cst_157 : f32 to vector<8x64xf32>
    %314 = arith.maximumf %312, %313 : vector<8x64xf32>
    %315 = arith.truncf %314 : vector<8x64xf32> to vector<8x64xbf16>
    %c0_158 = arith.constant 0 : index
    %c0_159 = arith.constant 0 : index
    %316 = vector.load %arg39[%c0_158, %c0_159] : memref<64x128xbf16, #tpu.memory_space<vmem>>, vector<64x128xbf16>
    %cst_160 = arith.constant dense<0.000000e+00> : vector<8x128xf32>
    %317 = tpu.matmul %315, %316, %cst_160 {dimension_numbers = #tpu.dot_dimension_numbers<[1], [0], [0], [1], [0, 0, 1, 1], [], []>} : vector<8x64xbf16>, vector<64x128xbf16>, vector<8x128xf32> -> vector<8x128xf32>
    %c0_161 = arith.constant 0 : index
    %c0_162 = arith.constant 0 : index
    %318 = vector.load %arg40[%c0_161, %c0_162] : memref<1x128xf32, #tpu.memory_space<vmem>>, vector<1x128xf32>
    %319 = vector.broadcast %318 : vector<1x128xf32> to vector<8x128xf32>
    %320 = arith.addf %317, %319 : vector<8x128xf32>
    %c0_163 = arith.constant 0 : index
    %c384_164 = arith.constant 384 : index
    %321 = vector.load %arg56[%c0_163, %c384_164] : memref<8x640xf32, #tpu.memory_space<vmem>>, vector<8x128xf32>
    tpu.vector_store %arg56[%c0_163, %c384_164], %320 {strides = array<i32>} : memref<8x640xf32, #tpu.memory_space<vmem>>, vector<8x128xf32>,
    %c0_165 = arith.constant 0 : index
    %c0_166 = arith.constant 0 : index
    %322 = vector.load %arg45[%c0_165, %c0_166] : memref<16x128xbf16, #tpu.memory_space<vmem>>, vector<16x128xbf16>
    %cst_167 = arith.constant dense<0.000000e+00> : vector<8x128xf32>
    %323 = tpu.matmul %137, %322, %cst_167 {dimension_numbers = #tpu.dot_dimension_numbers<[1], [0], [0], [1], [0, 0, 1, 1], [], []>} : vector<8x16xbf16>, vector<16x128xbf16>, vector<8x128xf32> -> vector<8x128xf32>
    %c0_168 = arith.constant 0 : index
    %c0_169 = arith.constant 0 : index
    %324 = vector.load %arg46[%c0_168, %c0_169] : memref<1x128xf32, #tpu.memory_space<vmem>>, vector<1x128xf32>
    %325 = vector.broadcast %324 : vector<1x128xf32> to vector<8x128xf32>
    %326 = arith.addf %323, %325 : vector<8x128xf32>
    %cst_170 = arith.constant dense<0.000000e+00> : vector<8xf32>
    %327 = vector.multi_reduction <add>, %326, %cst_170 [1] : vector<8x128xf32> to vector<8xf32>
    %328 = vector.shape_cast %327 : vector<8xf32> to vector<8x1xf32>
    %329 = arith.mulf %326, %326 : vector<8x128xf32>
    %cst_171 = arith.constant dense<0.000000e+00> : vector<8xf32>
    %330 = vector.multi_reduction <add>, %329, %cst_171 [1] : vector<8x128xf32> to vector<8xf32>
    %331 = vector.shape_cast %330 : vector<8xf32> to vector<8x1xf32>
    %cst_172 = arith.constant 3.125000e-02 : f32
    %332 = vector.broadcast %cst_172 : f32 to vector<8x1xf32>
    %333 = arith.mulf %328, %332 : vector<8x1xf32>
    %cst_173 = arith.constant 3.125000e-02 : f32
    %334 = vector.broadcast %cst_173 : f32 to vector<8x1xf32>
    %335 = arith.mulf %331, %334 : vector<8x1xf32>
    %336 = arith.mulf %333, %333 : vector<8x1xf32>
    %337 = arith.subf %335, %336 : vector<8x1xf32>
    %cst_174 = arith.constant 0.000000e+00 : f32
    %338 = vector.broadcast %cst_174 : f32 to vector<8x1xf32>
    %339 = arith.maximumf %337, %338 : vector<8x1xf32>
    %340 = vector.broadcast %333 : vector<8x1xf32> to vector<8x128xf32>
    %341 = arith.subf %326, %340 : vector<8x128xf32>
    %cst_175 = arith.constant 9.99999974E-6 : f32
    %342 = vector.broadcast %cst_175 : f32 to vector<8x1xf32>
    %343 = arith.addf %339, %342 : vector<8x1xf32>
    %344 = math.rsqrt %343 : vector<8x1xf32>
    %345 = vector.broadcast %344 : vector<8x1xf32> to vector<8x128xf32>
    %346 = arith.mulf %341, %345 : vector<8x128xf32>
    %c0_176 = arith.constant 0 : index
    %c0_177 = arith.constant 0 : index
    %347 = vector.load %arg47[%c0_176, %c0_177] : memref<1x128xf32, #tpu.memory_space<vmem>>, vector<1x128xf32>
    %348 = vector.broadcast %347 : vector<1x128xf32> to vector<8x128xf32>
    %349 = arith.mulf %346, %348 : vector<8x128xf32>
    %c0_178 = arith.constant 0 : index
    %c0_179 = arith.constant 0 : index
    %350 = vector.load %arg48[%c0_178, %c0_179] : memref<1x128xf32, #tpu.memory_space<vmem>>, vector<1x128xf32>
    %351 = vector.broadcast %350 : vector<1x128xf32> to vector<8x128xf32>
    %352 = arith.addf %349, %351 : vector<8x128xf32>
    %353 = math.tanh %352 : vector<8x128xf32>
    %c0_180 = arith.constant 0 : index
    %c512 = arith.constant 512 : index
    %354 = vector.load %arg55[%c0_180, %c512] : memref<8x640xf32, #tpu.memory_space<vmem>>, vector<8x128xf32>
    tpu.vector_store %arg55[%c0_180, %c512], %353 {strides = array<i32>} : memref<8x640xf32, #tpu.memory_space<vmem>>, vector<8x128xf32>,
    %355 = vector.extract_strided_slice %353 {offsets = [0, 0], sizes = [8, 32], strides = [1, 1]} : vector<8x128xf32> to vector<8x32xf32>
    %c3 = arith.constant 3 : index
    %356 = memref.load %arg54[%c3] : memref<4xf32, #tpu.memory_space<smem>>
    %357 = vector.broadcast %356 : f32 to vector<1x1xf32>
    %358 = arith.negf %357 : vector<1x1xf32>
    %359 = math.exp %358 : vector<1x1xf32>
    %cst_181 = arith.constant 1.000000e+00 : f32
    %360 = vector.broadcast %cst_181 : f32 to vector<1x1xf32>
    %361 = arith.addf %360, %359 : vector<1x1xf32>
    %362 = arith.divf %360, %361 : vector<1x1xf32>
    %363 = arith.subf %102, %355 : vector<8x32xf32>
    %364 = vector.broadcast %362 : vector<1x1xf32> to vector<8x32xf32>
    %365 = arith.mulf %363, %364 : vector<8x32xf32>
    %c0_182 = arith.constant 0 : index
    %c0_183 = arith.constant 0 : index
    %366 = vector.load %arg49[%c0_182, %c0_183] : memref<32x32xbf16, #tpu.memory_space<vmem>>, vector<32x32xbf16>
    %cst_184 = arith.constant dense<0.000000e+00> : vector<8x32xf32>
    %367 = tpu.matmul %103, %366, %cst_184 {dimension_numbers = #tpu.dot_dimension_numbers<[1], [0], [0], [1], [0, 0, 1, 1], [], []>} : vector<8x32xbf16>, vector<32x32xbf16>, vector<8x32xf32> -> vector<8x32xf32>
    %368 = arith.truncf %365 : vector<8x32xf32> to vector<8x32xbf16>
    %c0_185 = arith.constant 0 : index
    %c0_186 = arith.constant 0 : index
    %369 = vector.load %arg50[%c0_185, %c0_186] : memref<32x32xbf16, #tpu.memory_space<vmem>>, vector<32x32xbf16>
    %cst_187 = arith.constant dense<0.000000e+00> : vector<8x32xf32>
    %370 = tpu.matmul %368, %369, %cst_187 {dimension_numbers = #tpu.dot_dimension_numbers<[1], [0], [0], [1], [0, 0, 1, 1], [], []>} : vector<8x32xbf16>, vector<32x32xbf16>, vector<8x32xf32> -> vector<8x32xf32>
    %371 = arith.addf %367, %370 : vector<8x32xf32>
    %c0_188 = arith.constant 0 : index
    %c0_189 = arith.constant 0 : index
    %372 = vector.load %arg51[%c0_188, %c0_189] : memref<1x32xf32, #tpu.memory_space<vmem>>, vector<1x32xf32>
    %373 = vector.broadcast %372 : vector<1x32xf32> to vector<8x32xf32>
    %374 = arith.addf %371, %373 : vector<8x32xf32>
    %cst_190 = arith.constant 0.000000e+00 : f32
    %375 = vector.broadcast %cst_190 : f32 to vector<8x32xf32>
    %376 = arith.maximumf %374, %375 : vector<8x32xf32>
    %377 = arith.truncf %376 : vector<8x32xf32> to vector<8x32xbf16>
    %c0_191 = arith.constant 0 : index
    %c0_192 = arith.constant 0 : index
    %378 = vector.load %arg52[%c0_191, %c0_192] : memref<32x128xbf16, #tpu.memory_space<vmem>>, vector<32x128xbf16>
    %cst_193 = arith.constant dense<0.000000e+00> : vector<8x128xf32>
    %379 = tpu.matmul %377, %378, %cst_193 {dimension_numbers = #tpu.dot_dimension_numbers<[1], [0], [0], [1], [0, 0, 1, 1], [], []>} : vector<8x32xbf16>, vector<32x128xbf16>, vector<8x128xf32> -> vector<8x128xf32>
    %c0_194 = arith.constant 0 : index
    %c0_195 = arith.constant 0 : index
    %380 = vector.load %arg53[%c0_194, %c0_195] : memref<1x128xf32, #tpu.memory_space<vmem>>, vector<1x128xf32>
    %381 = vector.broadcast %380 : vector<1x128xf32> to vector<8x128xf32>
    %382 = arith.addf %379, %381 : vector<8x128xf32>
    %c0_196 = arith.constant 0 : index
    %c512_197 = arith.constant 512 : index
    %383 = vector.load %arg56[%c0_196, %c512_197] : memref<8x640xf32, #tpu.memory_space<vmem>>, vector<8x128xf32>
    tpu.vector_store %arg56[%c0_196, %c512_197], %382 {strides = array<i32>} : memref<8x640xf32, #tpu.memory_space<vmem>>, vector<8x128xf32>,
    return
  }
  func.func @transform_0(%arg0: i32) -> (i32, i32) {
    %c0_i32 = arith.constant 0 : i32
    %c0_i32_0 = arith.constant 0 : i32
    return %arg0, %c0_i32 : i32, i32
  }
  func.func @transform_1(%arg0: i32) -> (i32, i32) {
    %c0_i32 = arith.constant 0 : i32
    %c0_i32_0 = arith.constant 0 : i32
    %c0_i32_1 = arith.constant 0 : i32
    return %c0_i32, %c0_i32_0 : i32, i32
  }
  func.func @transform_2(%arg0: i32) -> (i32, i32) {
    %c0_i32 = arith.constant 0 : i32
    %c0_i32_0 = arith.constant 0 : i32
    %c0_i32_1 = arith.constant 0 : i32
    return %c0_i32, %c0_i32_0 : i32, i32
  }
  func.func @transform_3(%arg0: i32) -> (i32, i32) {
    %c0_i32 = arith.constant 0 : i32
    %c0_i32_0 = arith.constant 0 : i32
    %c0_i32_1 = arith.constant 0 : i32
    return %c0_i32, %c0_i32_0 : i32, i32
  }
  func.func @transform_4(%arg0: i32) -> (i32, i32) {
    %c0_i32 = arith.constant 0 : i32
    %c0_i32_0 = arith.constant 0 : i32
    %c0_i32_1 = arith.constant 0 : i32
    return %c0_i32, %c0_i32_0 : i32, i32
  }
  func.func @transform_5(%arg0: i32) -> (i32, i32) {
    %c0_i32 = arith.constant 0 : i32
    %c0_i32_0 = arith.constant 0 : i32
    %c0_i32_1 = arith.constant 0 : i32
    return %c0_i32, %c0_i32_0 : i32, i32
  }
  func.func @transform_6(%arg0: i32) -> (i32, i32) {
    %c0_i32 = arith.constant 0 : i32
    %c0_i32_0 = arith.constant 0 : i32
    %c0_i32_1 = arith.constant 0 : i32
    return %c0_i32, %c0_i32_0 : i32, i32
  }
  func.func @transform_7(%arg0: i32) -> (i32, i32) {
    %c0_i32 = arith.constant 0 : i32
    %c0_i32_0 = arith.constant 0 : i32
    %c0_i32_1 = arith.constant 0 : i32
    return %c0_i32, %c0_i32_0 : i32, i32
  }
  func.func @transform_8(%arg0: i32) -> (i32, i32) {
    %c0_i32 = arith.constant 0 : i32
    %c0_i32_0 = arith.constant 0 : i32
    %c0_i32_1 = arith.constant 0 : i32
    return %c0_i32, %c0_i32_0 : i32, i32
  }
  func.func @transform_9(%arg0: i32) -> (i32, i32) {
    %c0_i32 = arith.constant 0 : i32
    %c0_i32_0 = arith.constant 0 : i32
    %c0_i32_1 = arith.constant 0 : i32
    return %c0_i32, %c0_i32_0 : i32, i32
  }
  func.func @transform_10(%arg0: i32) -> (i32, i32) {
    %c0_i32 = arith.constant 0 : i32
    %c0_i32_0 = arith.constant 0 : i32
    %c0_i32_1 = arith.constant 0 : i32
    return %c0_i32, %c0_i32_0 : i32, i32
  }
  func.func @transform_11(%arg0: i32) -> (i32, i32) {
    %c0_i32 = arith.constant 0 : i32
    %c0_i32_0 = arith.constant 0 : i32
    %c0_i32_1 = arith.constant 0 : i32
    return %c0_i32, %c0_i32_0 : i32, i32
  }
  func.func @transform_12(%arg0: i32) -> (i32, i32) {
    %c0_i32 = arith.constant 0 : i32
    %c0_i32_0 = arith.constant 0 : i32
    %c0_i32_1 = arith.constant 0 : i32
    return %c0_i32, %c0_i32_0 : i32, i32
  }
  func.func @transform_13(%arg0: i32) -> (i32, i32) {
    %c0_i32 = arith.constant 0 : i32
    %c0_i32_0 = arith.constant 0 : i32
    %c0_i32_1 = arith.constant 0 : i32
    return %c0_i32, %c0_i32_0 : i32, i32
  }
  func.func @transform_14(%arg0: i32) -> (i32, i32) {
    %c0_i32 = arith.constant 0 : i32
    %c0_i32_0 = arith.constant 0 : i32
    %c0_i32_1 = arith.constant 0 : i32
    return %c0_i32, %c0_i32_0 : i32, i32
  }
  func.func @transform_15(%arg0: i32) -> (i32, i32) {
    %c0_i32 = arith.constant 0 : i32
    %c0_i32_0 = arith.constant 0 : i32
    %c0_i32_1 = arith.constant 0 : i32
    return %c0_i32, %c0_i32_0 : i32, i32
  }
  func.func @transform_16(%arg0: i32) -> (i32, i32) {
    %c0_i32 = arith.constant 0 : i32
    %c0_i32_0 = arith.constant 0 : i32
    %c0_i32_1 = arith.constant 0 : i32
    return %c0_i32, %c0_i32_0 : i32, i32
  }
  func.func @transform_17(%arg0: i32) -> (i32, i32) {
    %c0_i32 = arith.constant 0 : i32
    %c0_i32_0 = arith.constant 0 : i32
    %c0_i32_1 = arith.constant 0 : i32
    return %c0_i32, %c0_i32_0 : i32, i32
  }
  func.func @transform_18(%arg0: i32) -> (i32, i32) {
    %c0_i32 = arith.constant 0 : i32
    %c0_i32_0 = arith.constant 0 : i32
    %c0_i32_1 = arith.constant 0 : i32
    return %c0_i32, %c0_i32_0 : i32, i32
  }
  func.func @transform_19(%arg0: i32) -> (i32, i32) {
    %c0_i32 = arith.constant 0 : i32
    %c0_i32_0 = arith.constant 0 : i32
    %c0_i32_1 = arith.constant 0 : i32
    return %c0_i32, %c0_i32_0 : i32, i32
  }
  func.func @transform_20(%arg0: i32) -> (i32, i32) {
    %c0_i32 = arith.constant 0 : i32
    %c0_i32_0 = arith.constant 0 : i32
    %c0_i32_1 = arith.constant 0 : i32
    return %c0_i32, %c0_i32_0 : i32, i32
  }
  func.func @transform_21(%arg0: i32) -> (i32, i32) {
    %c0_i32 = arith.constant 0 : i32
    %c0_i32_0 = arith.constant 0 : i32
    %c0_i32_1 = arith.constant 0 : i32
    return %c0_i32, %c0_i32_0 : i32, i32
  }
  func.func @transform_22(%arg0: i32) -> (i32, i32) {
    %c0_i32 = arith.constant 0 : i32
    %c0_i32_0 = arith.constant 0 : i32
    %c0_i32_1 = arith.constant 0 : i32
    return %c0_i32, %c0_i32_0 : i32, i32
  }
  func.func @transform_23(%arg0: i32) -> (i32, i32) {
    %c0_i32 = arith.constant 0 : i32
    %c0_i32_0 = arith.constant 0 : i32
    %c0_i32_1 = arith.constant 0 : i32
    return %c0_i32, %c0_i32_0 : i32, i32
  }
  func.func @transform_24(%arg0: i32) -> (i32, i32) {
    %c0_i32 = arith.constant 0 : i32
    %c0_i32_0 = arith.constant 0 : i32
    %c0_i32_1 = arith.constant 0 : i32
    return %c0_i32, %c0_i32_0 : i32, i32
  }
  func.func @transform_25(%arg0: i32) -> (i32, i32) {
    %c0_i32 = arith.constant 0 : i32
    %c0_i32_0 = arith.constant 0 : i32
    %c0_i32_1 = arith.constant 0 : i32
    return %c0_i32, %c0_i32_0 : i32, i32
  }
  func.func @transform_26(%arg0: i32) -> (i32, i32) {
    %c0_i32 = arith.constant 0 : i32
    %c0_i32_0 = arith.constant 0 : i32
    %c0_i32_1 = arith.constant 0 : i32
    return %c0_i32, %c0_i32_0 : i32, i32
  }
  func.func @transform_27(%arg0: i32) -> (i32, i32) {
    %c0_i32 = arith.constant 0 : i32
    %c0_i32_0 = arith.constant 0 : i32
    %c0_i32_1 = arith.constant 0 : i32
    return %c0_i32, %c0_i32_0 : i32, i32
  }
  func.func @transform_28(%arg0: i32) -> (i32, i32) {
    %c0_i32 = arith.constant 0 : i32
    %c0_i32_0 = arith.constant 0 : i32
    %c0_i32_1 = arith.constant 0 : i32
    return %c0_i32, %c0_i32_0 : i32, i32
  }
  func.func @transform_29(%arg0: i32) -> (i32, i32) {
    %c0_i32 = arith.constant 0 : i32
    %c0_i32_0 = arith.constant 0 : i32
    %c0_i32_1 = arith.constant 0 : i32
    return %c0_i32, %c0_i32_0 : i32, i32
  }
  func.func @transform_30(%arg0: i32) -> (i32, i32) {
    %c0_i32 = arith.constant 0 : i32
    %c0_i32_0 = arith.constant 0 : i32
    %c0_i32_1 = arith.constant 0 : i32
    return %c0_i32, %c0_i32_0 : i32, i32
  }
  func.func @transform_31(%arg0: i32) -> (i32, i32) {
    %c0_i32 = arith.constant 0 : i32
    %c0_i32_0 = arith.constant 0 : i32
    %c0_i32_1 = arith.constant 0 : i32
    return %c0_i32, %c0_i32_0 : i32, i32
  }
  func.func @transform_32(%arg0: i32) -> (i32, i32) {
    %c0_i32 = arith.constant 0 : i32
    %c0_i32_0 = arith.constant 0 : i32
    %c0_i32_1 = arith.constant 0 : i32
    return %c0_i32, %c0_i32_0 : i32, i32
  }
  func.func @transform_33(%arg0: i32) -> (i32, i32) {
    %c0_i32 = arith.constant 0 : i32
    %c0_i32_0 = arith.constant 0 : i32
    %c0_i32_1 = arith.constant 0 : i32
    return %c0_i32, %c0_i32_0 : i32, i32
  }
  func.func @transform_34(%arg0: i32) -> (i32, i32) {
    %c0_i32 = arith.constant 0 : i32
    %c0_i32_0 = arith.constant 0 : i32
    %c0_i32_1 = arith.constant 0 : i32
    return %c0_i32, %c0_i32_0 : i32, i32
  }
  func.func @transform_35(%arg0: i32) -> (i32, i32) {
    %c0_i32 = arith.constant 0 : i32
    %c0_i32_0 = arith.constant 0 : i32
    %c0_i32_1 = arith.constant 0 : i32
    return %c0_i32, %c0_i32_0 : i32, i32
  }
  func.func @transform_36(%arg0: i32) -> (i32, i32) {
    %c0_i32 = arith.constant 0 : i32
    %c0_i32_0 = arith.constant 0 : i32
    %c0_i32_1 = arith.constant 0 : i32
    return %c0_i32, %c0_i32_0 : i32, i32
  }
  func.func @transform_37(%arg0: i32) -> (i32, i32) {
    %c0_i32 = arith.constant 0 : i32
    %c0_i32_0 = arith.constant 0 : i32
    %c0_i32_1 = arith.constant 0 : i32
    return %c0_i32, %c0_i32_0 : i32, i32
  }
  func.func @transform_38(%arg0: i32) -> (i32, i32) {
    %c0_i32 = arith.constant 0 : i32
    %c0_i32_0 = arith.constant 0 : i32
    %c0_i32_1 = arith.constant 0 : i32
    return %c0_i32, %c0_i32_0 : i32, i32
  }
  func.func @transform_39(%arg0: i32) -> (i32, i32) {
    %c0_i32 = arith.constant 0 : i32
    %c0_i32_0 = arith.constant 0 : i32
    %c0_i32_1 = arith.constant 0 : i32
    return %c0_i32, %c0_i32_0 : i32, i32
  }
  func.func @transform_40(%arg0: i32) -> (i32, i32) {
    %c0_i32 = arith.constant 0 : i32
    %c0_i32_0 = arith.constant 0 : i32
    %c0_i32_1 = arith.constant 0 : i32
    return %c0_i32, %c0_i32_0 : i32, i32
  }
  func.func @transform_41(%arg0: i32) -> (i32, i32) {
    %c0_i32 = arith.constant 0 : i32
    %c0_i32_0 = arith.constant 0 : i32
    %c0_i32_1 = arith.constant 0 : i32
    return %c0_i32, %c0_i32_0 : i32, i32
  }
  func.func @transform_42(%arg0: i32) -> (i32, i32) {
    %c0_i32 = arith.constant 0 : i32
    %c0_i32_0 = arith.constant 0 : i32
    %c0_i32_1 = arith.constant 0 : i32
    return %c0_i32, %c0_i32_0 : i32, i32
  }
  func.func @transform_43(%arg0: i32) -> (i32, i32) {
    %c0_i32 = arith.constant 0 : i32
    %c0_i32_0 = arith.constant 0 : i32
    %c0_i32_1 = arith.constant 0 : i32
    return %c0_i32, %c0_i32_0 : i32, i32
  }
  func.func @transform_44(%arg0: i32) -> (i32, i32) {
    %c0_i32 = arith.constant 0 : i32
    %c0_i32_0 = arith.constant 0 : i32
    %c0_i32_1 = arith.constant 0 : i32
    return %c0_i32, %c0_i32_0 : i32, i32
  }
  func.func @transform_45(%arg0: i32) -> (i32, i32) {
    %c0_i32 = arith.constant 0 : i32
    %c0_i32_0 = arith.constant 0 : i32
    %c0_i32_1 = arith.constant 0 : i32
    return %c0_i32, %c0_i32_0 : i32, i32
  }
  func.func @transform_46(%arg0: i32) -> (i32, i32) {
    %c0_i32 = arith.constant 0 : i32
    %c0_i32_0 = arith.constant 0 : i32
    %c0_i32_1 = arith.constant 0 : i32
    return %c0_i32, %c0_i32_0 : i32, i32
  }
  func.func @transform_47(%arg0: i32) -> (i32, i32) {
    %c0_i32 = arith.constant 0 : i32
    %c0_i32_0 = arith.constant 0 : i32
    %c0_i32_1 = arith.constant 0 : i32
    return %c0_i32, %c0_i32_0 : i32, i32
  }
  func.func @transform_48(%arg0: i32) -> (i32, i32) {
    %c0_i32 = arith.constant 0 : i32
    %c0_i32_0 = arith.constant 0 : i32
    %c0_i32_1 = arith.constant 0 : i32
    return %c0_i32, %c0_i32_0 : i32, i32
  }
  func.func @transform_49(%arg0: i32) -> (i32, i32) {
    %c0_i32 = arith.constant 0 : i32
    %c0_i32_0 = arith.constant 0 : i32
    %c0_i32_1 = arith.constant 0 : i32
    return %c0_i32, %c0_i32_0 : i32, i32
  }
  func.func @transform_50(%arg0: i32) -> (i32, i32) {
    %c0_i32 = arith.constant 0 : i32
    %c0_i32_0 = arith.constant 0 : i32
    %c0_i32_1 = arith.constant 0 : i32
    return %c0_i32, %c0_i32_0 : i32, i32
  }
  func.func @transform_51(%arg0: i32) -> (i32, i32) {
    %c0_i32 = arith.constant 0 : i32
    %c0_i32_0 = arith.constant 0 : i32
    %c0_i32_1 = arith.constant 0 : i32
    return %c0_i32, %c0_i32_0 : i32, i32
  }
  func.func @transform_52(%arg0: i32) -> (i32, i32) {
    %c0_i32 = arith.constant 0 : i32
    %c0_i32_0 = arith.constant 0 : i32
    %c0_i32_1 = arith.constant 0 : i32
    return %c0_i32, %c0_i32_0 : i32, i32
  }
  func.func @transform_53(%arg0: i32) -> i32 {
    %c0_i32 = arith.constant 0 : i32
    %c0_i32_0 = arith.constant 0 : i32
    return %c0_i32 : i32
  }
  func.func @transform_54(%arg0: i32) -> (i32, i32) {
    %c0_i32 = arith.constant 0 : i32
    %c0_i32_0 = arith.constant 0 : i32
    return %arg0, %c0_i32 : i32, i32
  }
  func.func @transform_55(%arg0: i32) -> (i32, i32) {
    %c0_i32 = arith.constant 0 : i32
    %c0_i32_0 = arith.constant 0 : i32
    return %arg0, %c0_i32 : i32, i32
  }
}

</mosaic_0001>

<bundles_post_ra>
// kernel: hpc_forward.1
= control target key start
LH: loop header
LB: loop body
LE: loop exit
PB: predicated region body
PF: predicated region fallthrough
CT: control target
= control target key end

     0   :  { %s3800_s6 = smov 1   ;;  %s3801_s10 = smov 2   ;;  %s4580_s0 = inlined_call_operand.smem [shape: u32[56], index: -1, kind: input, shape index: {}] }
   0x1   :  { %s3867_s5 = sld [smem:[%s4580_s0]]   ;;  %s3802_s14 = smov 3  }
   0x2   :  { %s3872_s9 = sld [smem:[%s4580_s0 + %s3800_s6]]   ;;  %s3803_s18 = smov 4  }
   0x3   :  { %s3877_s13 = sld [smem:[%s4580_s0 + %s3801_s10]]   ;;  %s3804_s22 = smov 5  }
   0x4   :  { %s3882_s17 = sld [smem:[%s4580_s0 + %s3802_s14]]   ;;  %s3805_s26 = smov 6  }
   0x5   :  { %s3887_s21 = sld [smem:[%s4580_s0 + %s3803_s18]]   ;;  %s3806_s30 = smov 7  }
   0x6   :  { %s3892_s25 = sld [smem:[%s4580_s0 + %s3804_s22]]   ;;  %s3807_s4 = smov 8  }
   0x7   :  { %s3897_s29 = sld [smem:[%s4580_s0 + %s3805_s26]]   ;;  %s3808_s10 = smov 9  }
   0x8   :  { %s3902_s3 = sld [smem:[%s4580_s0 + %s3806_s30]]   ;;  %s3809_s15 = smov 10  }
   0x9   :  { %s3907_s8 = sld [smem:[%s4580_s0 + %s3807_s4]]   ;;  %s3810_s20 = smov 11  }
   0xa   :  { %s3912_s14 = sld [smem:[%s4580_s0 + %s3808_s10]]   ;;  %s3811_s26 = smov 12  }
   0xb   :  { %s3917_s19 = sld [smem:[%s4580_s0 + %s3809_s15]]   ;;  %s3812_s1 = smov 13  }
   0xc   :  { %s3922_s24 = sld [smem:[%s4580_s0 + %s3810_s20]]   ;;  %s3813_s7 = smov 14  }
   0xd   :  { %4595 = sst [smem:[#allocation5_spill]] %s3897_s29  ;;  %s3814_s15 = smov 15  }
   0xe   :  { %4596 = sst [smem:[#allocation6_spill]] %s3902_s3  ;;  %s3815_s22 = smov 16  }
   0xf   :  { %4597 = sst [smem:[#allocation7_spill]] %s3907_s8  ;;  %s3816_s28 = smov 17  }
  0x10   :  { %4598 = sst [smem:[#allocation8_spill]] %s3912_s14  ;;  %s3853_s10 = smov 54  }
  0x11   :  { %4599 = sst [smem:[#allocation9_spill]] %s3917_s19  ;;  %s3854_s16 = smov 55  }
  0x12   :  { %4600 = sst [smem:[#allocation10_spill]] %s3922_s24 }
  0x13   :  { %s3927_s30 = sld [smem:[%s4580_s0 + %s3811_s26]]  }
  0x14   :  { %s3932_s6 = sld [smem:[%s4580_s0 + %s3812_s1]]  }
  0x15   :  { %s3937_s12 = sld [smem:[%s4580_s0 + %s3813_s7]]   ;;  %s3817_s7 = smov 18  }
  0x16   :  { %s3942_s20 = sld [smem:[%s4580_s0 + %s3814_s15]]   ;;  %s3818_s15 = smov 19  }
  0x17   :  { %s3947_s27 = sld [smem:[%s4580_s0 + %s3815_s22]]   ;;  %s3819_s22 = smov 20  }
  0x18   :  { %s3952_s4 = sld [smem:[%s4580_s0 + %s3816_s28]]   ;;  %s3820_s28 = smov 21  }
  0x19   :  { %4601 = sst [smem:[#allocation11_spill]] %s3927_s30 }
  0x1a   :  { %4602 = sst [smem:[#allocation12_spill]] %s3932_s6 }
  0x1b   :  { %s3957_s6 = sld [smem:[%s4580_s0 + %s3817_s7]]   ;;  %s3821_s7 = smov 22  }
  0x1c   :  { %s3962_s24 = sld [smem:[%s4580_s0 + %s3818_s15]]   ;;  %s3822_s15 = smov 23  }
  0x1d   :  { %s3967_s8 = sld [smem:[%s4580_s0 + %s3819_s22]]   ;;  %s3823_s22 = smov 24  }
  0x1e   :  { %s3972_s3 = sld [smem:[%s4580_s0 + %s3820_s28]]   ;;  %s3824_s28 = smov 25  }
  0x1f   :  { %s3977_s30 = sld [smem:[%s4580_s0 + %s3821_s7]]   ;;  %s3825_s7 = smov 26  }
  0x21   :  { %4603 = sst [smem:[#allocation13_spill]] %s3957_s6 }
  0x22   :  { %4604 = sst [smem:[#allocation14_spill]] %s3962_s24 }
  0x23   :  { %4605 = sst [smem:[#allocation15_spill]] %s3967_s8 }
  0x24   :  { %4606 = sst [smem:[#allocation16_spill]] %s3972_s3 }
  0x25   :  { %4607 = sst [smem:[#allocation17_spill]] %s3977_s30 }
  0x26   :  { %s3982_s24 = sld [smem:[%s4580_s0 + %s3822_s15]]   ;;  %s3826_s15 = smov 27  }
  0x27   :  { %s3987_s8 = sld [smem:[%s4580_s0 + %s3823_s22]]   ;;  %s3827_s22 = smov 28  }
  0x28   :  { %s3992_s3 = sld [smem:[%s4580_s0 + %s3824_s28]]   ;;  %s3828_s28 = smov 29  }
  0x29   :  { %s3997_s30 = sld [smem:[%s4580_s0 + %s3825_s7]]   ;;  %s3829_s7 = smov 30  }
  0x2c   :  { %4608 = sst [smem:[#allocation18_spill]] %s3982_s24 }
  0x2d   :  { %4609 = sst [smem:[#allocation19_spill]] %s3987_s8 }
  0x2e   :  { %4610 = sst [smem:[#allocation20_spill]] %s3992_s3 }
  0x2f   :  { %4611 = sst [smem:[#allocation21_spill]] %s3997_s30 }
  0x30   :  { %s4002_s24 = sld [smem:[%s4580_s0 + %s3826_s15]]   ;;  %s3830_s15 = smov 31  }
  0x31   :  { %s4007_s8 = sld [smem:[%s4580_s0 + %s3827_s22]]   ;;  %s3831_s22 = smov 32  }
  0x32   :  { %s4012_s3 = sld [smem:[%s4580_s0 + %s3828_s28]]   ;;  %s3832_s28 = smov 33  }
  0x33   :  { %s4017_s30 = sld [smem:[%s4580_s0 + %s3829_s7]]   ;;  %s3833_s7 = smov 34  }
  0x34   :  { %s4022_s29 = sld [smem:[%s4580_s0 + %s3830_s15]]   ;;  %s3834_s15 = smov 35  }
  0x35   :  { %s4027_s19 = sld [smem:[%s4580_s0 + %s3831_s22]]   ;;  %s3835_s22 = smov 36  }
  0x36   :  { %s4032_s6 = sld [smem:[%s4580_s0 + %s3832_s28]]   ;;  %s3836_s28 = smov 37  }
  0x37   :  { %s4037_s14 = sld [smem:[%s4580_s0 + %s3833_s7]]   ;;  %s3837_s7 = smov 38  }
  0x39   :  { %4612 = sst [smem:[#allocation22_spill]] %s4017_s30 }
  0x3a   :  { %4613 = sst [smem:[#allocation23_spill]] %s4022_s29 }
  0x3b   :  { %4614 = sst [smem:[#allocation24_spill]] %s4027_s19 }
  0x3c   :  { %4615 = sst [smem:[#allocation25_spill]] %s4032_s6 }
  0x3d   :  { %4616 = sst [smem:[#allocation26_spill]] %s4037_s14 }
  0x3e   :  { %s4042_s29 = sld [smem:[%s4580_s0 + %s3834_s15]]   ;;  %s3838_s15 = smov 39  }
  0x3f   :  { %s4047_s19 = sld [smem:[%s4580_s0 + %s3835_s22]]   ;;  %s3839_s22 = smov 40  }
  0x40   :  { %s4052_s6 = sld [smem:[%s4580_s0 + %s3836_s28]]   ;;  %s3840_s28 = smov 41  }
  0x41   :  { %s4057_s14 = sld [smem:[%s4580_s0 + %s3837_s7]]   ;;  %s3841_s7 = smov 42  }
  0x44   :  { %4617 = sst [smem:[#allocation27_spill]] %s4042_s29 }
  0x45   :  { %4618 = sst [smem:[#allocation28_spill]] %s4047_s19 }
  0x46   :  { %4619 = sst [smem:[#allocation29_spill]] %s4052_s6 }
  0x47   :  { %4620 = sst [smem:[#allocation30_spill]] %s4057_s14 }
  0x48   :  { %s4062_s29 = sld [smem:[%s4580_s0 + %s3838_s15]]   ;;  %s3842_s15 = smov 43  }
  0x49   :  { %s4067_s19 = sld [smem:[%s4580_s0 + %s3839_s22]]   ;;  %s3843_s22 = smov 44  }
  0x4a   :  { %s4072_s6 = sld [smem:[%s4580_s0 + %s3840_s28]]   ;;  %s3844_s28 = smov 45  }
  0x4b   :  { %s4077_s14 = sld [smem:[%s4580_s0 + %s3841_s7]]   ;;  %s3845_s7 = smov 46  }
  0x4c   :  { %s4087_s30 = sld [smem:[%s4580_s0 + %s3843_s22]]   ;;  %s3847_s22 = smov 48  }
  0x4e   :  { %4621 = sst [smem:[#allocation31_spill]] %s4062_s29 }
  0x4f   :  { %s4082_s29 = sld [smem:[%s4580_s0 + %s3842_s15]]   ;;  %s3846_s15 = smov 47  }
  0x50   :  { %4622 = sst [smem:[#allocation32_spill]] %s4072_s6 }
  0x51   :  { %4623 = sst [smem:[#allocation33_spill]] %s4077_s14 }
  0x52   :  { %4625 = sst [smem:[#allocation35_spill]] %s4087_s30 }
  0x53   :  { %s4092_s6 = sld [smem:[%s4580_s0 + %s3844_s28]]   ;;  %s3848_s28 = smov 49  }
  0x54   :  { %s4097_s14 = sld [smem:[%s4580_s0 + %s3845_s7]]   ;;  %s3849_s7 = smov 50  }
  0x55   :  { %4624 = sst [smem:[#allocation34_spill]] %s4082_s29 }
  0x56   :  { %s4102_s29 = sld [smem:[%s4580_s0 + %s3846_s15]]   ;;  %s3850_s15 = smov 51  }
  0x57   :  { %s4107_s30 = sld [smem:[%s4580_s0 + %s3847_s22]]   ;;  %s3851_s22 = smov 52  }
  0x59   :  { %4626 = sst [smem:[#allocation36_spill]] %s4092_s6 }
  0x5a   :  { %4627 = sst [smem:[#allocation37_spill]] %s4097_s14 }
  0x5b   :  { %s4112_s6 = sld [smem:[%s4580_s0 + %s3848_s28]]   ;;  %s3852_s28 = smov 53  }
  0x5c   :  { %4628 = sst [smem:[#allocation38_spill]] %s4102_s29 }
  0x5d   :  { %4629 = sst [smem:[#allocation39_spill]] %s4107_s30 }
  0x5e   :  { %s4117_s14 = sld [smem:[%s4580_s0 + %s3849_s7]]  }
  0x5f   :  { %s4122_s29 = sld [smem:[%s4580_s0 + %s3850_s15]]  }
  0x60   :  { %s4127_s30 = sld [smem:[%s4580_s0 + %s3851_s22]]  }
  0x61   :  { %4630 = sst [smem:[#allocation40_spill]] %s4112_s6 }
  0x62   :  { %s2911_s6 = sld [smem:[%s4580_s0 + %s3852_s28]]  }
  0x64   :  { %4631 = sst [smem:[#allocation41_spill]] %s4117_s14 }
  0x65   :  { %4632 = sst [smem:[#allocation42_spill]] %s4122_s29 }
  0x66   :  { %s4135_s14 = sld [smem:[%s4580_s0 + %s3853_s10]]  }
  0x67   :  { %s4140_s29 = sld [smem:[%s4580_s0 + %s3854_s16]]  }
  0x68   :  { %117 = vsyncpa [#allocation3], 0  ;;  %s230_s22 = sshll.u32 %s2911_s6, 4  ;;  %s231_s22 = int_to_ptr.vmem [resolvable:$true] %s230_s22 }
  0x69   :  { %s3786_s23 = scalar_lea.vmem %s231_s22, 16  ;;  %p3791_p1 = scmp.lt.s32.totalorder %s231_s22, %s231_s22 }
  0x6a   :  { %p3787_p0 = scmp.ne.s32.totalorder %s231_s22, %s3786_s23  ;;  %p3792_p2 = scmp.lt.s32.totalorder %s3786_s23, %s3786_s23 }
  0x6c   :  { %p3793_p3 = por %p3792_p2, %p3791_p1 }
  0x6e   :  { %p3794_p4 = pnand %p3793_p3, %p3787_p0 }
  0x70   :  { %3797 = shalt.err (!%p3794_p4)
}
  0x71   :  { %s3855_s26 = smov [#allocation2]  }
  0x72   :  { %233 = dma.vmem_to_smem %s231_s22, 16, %s3855_s26, [#allocation3]  }
  0x73   :  { %3798 = dma.done.wait [#allocation3], 16  }
  0x74   :  { %3799 = vsyncadd [#allocation3], 4294967280 }
  0x75   :  { %237 = sfence }
  0x76   :  { %v3495_v0 = vld [vmem:[%s3872_s9 + $0x78] sm:$0xff]   ;;  %v3497_v2 = vld [vmem:[%s3872_s9 + $0x70] sm:$0xff]   ;;  %v3499_v4 = vld [vmem:[%s3872_s9 + $0x68] sm:$0xff]   ;;  %v3856_v29 = vmov 0.0   ;;  %vm3857_vm0 = vmmov 0   ;;  %vm561_vm1 = vcmask 523264  }
  0x77   :  { %v3496_v1 = vld [vmem:[%s3872_s9 + $0x38] sm:$0xff]   ;;  %3150 = vmatprep.subr.bf16.mxu0 %v3495_v0  ;;  %v3498_v3 = vld [vmem:[%s3872_s9 + $0x30] sm:$0xff]   ;;  %v3500_v5 = vld [vmem:[%s3872_s9 + $0x28] sm:$0xff]   ;;  %3250 = vmatprep.subr.bf16.mxu1 %v3856_v29  ;;  %vm678_vm2 = vcmask 261120   ;;  %s4633_s0 = sld [smem:[#allocation22_spill]]  ;;  %vm779_vm3 = vcmask 130048  }
  0x78   :  { %3151 = vmatpush3.bf16.msra.mxu0 %v3496_v1  ;;  %v3501_v6 = vld [vmem:[%s3872_s9 + $0x60] sm:$0xff]   ;;  %v3503_v8 = vld [vmem:[%s3872_s9 + $0x58] sm:$0xff]   ;;  %v3505_v10 = vld [vmem:[%s3872_s9 + $0x50] sm:$0xff]   ;;  %3266 = vmatprep.mubr.msk.bf16.mxu1 %vm3857_vm0, %v3856_v29  ;;  %s4642_s6 = sld [smem:[#allocation6_spill]] }
  0x79   :  { %3152 = vmatprep.subr.bf16.mxu0 %v3497_v2  ;;  %v3502_v7 = vld [vmem:[%s3872_s9 + $0x20] sm:$0xff]   ;;  %v3504_v9 = vld [vmem:[%s3872_s9 + $0x18] sm:$0xff]   ;;  %v240_v11 = vld [vmem:[%s3867_s5 + $0x8] sm:$0xff]  ;;  %s4647_s28 = sld [smem:[#allocation17_spill]] }
  0x7a   :  { %v3506_v12 = vld [vmem:[%s3872_s9 + $0x10] sm:$0xff]   ;;  %v4155_v13 = vpack.c.bf16 %v240_v11, %v240_v11  ;;  %v3507_v14 = vld [vmem:[%s3872_s9 + $0x48] sm:$0xff]   ;;  %v3509_v16 = vld [vmem:[%s3872_s9 + $0x40] sm:$0xff]   ;;  %s4648_s1 = sld [smem:[#allocation23_spill]] }
  0x7b   :  { %v3508_v15 = vld [vmem:[%s3872_s9 + $0x8] sm:$0xff]   ;;  %v3510_v17 = vld [vmem:[%s3872_s9] sm:$0xff]   ;;  %v3511_v28 = vld [vmem:[%s3937_s12 + $0x38] sm:$0xff]   ;;  %s4634_s9 = sld [smem:[#allocation8_spill]] }
  0x7c   :  { %3153 = vmatpush3.bf16.msra.mxu0 %v3498_v3  ;;  %410 = vmatprep.mubr.bf16.mxu0 %v4155_v13  ;;  %v239_v18 = vld [vmem:[%s3867_s5] sm:$0xff]  ;;  %v3512_v30 = vld [vmem:[%s3937_s12 + $0x30] sm:$0xff]   ;;  %v3513_v31 = vld [vmem:[%s3937_s12 + $0x28] sm:$0xff]   ;;  %s4649_s2 = sld [smem:[#allocation20_spill]] }
  0x7d   :  { %3154 = vmatprep.subr.bf16.mxu0 %v3499_v4  ;;  %v4163_v19 = vpack.c.bf16 %v239_v18, %v239_v18  ;;  %v2914_v21 = vld [vmem:[%s3877_s13] ss:$0 sm:$0xff]  ;;  %3251 = vmatpush3.bf16.msra.mxu1 %v3511_v28  ;;  %v3515_v33 = vld [vmem:[%s3937_s12 + $0x18] sm:$0xff]   ;;  %v3516_v34 = vld [vmem:[%s3937_s12 + $0x10] sm:$0xff]   ;;  %s4635_s13 = sld [smem:[#allocation13_spill]] }
  0x7e   :  { %3252 = vmatprep.subr.bf16.mxu1 %v3856_v29  ;;  %v3514_v32 = vld [vmem:[%s3937_s12 + $0x20] sm:$0xff]   ;;  %v3517_v35 = vld [vmem:[%s3937_s12 + $0x8] sm:$0xff]   ;;  %v3519_v63 = vld [vmem:[%s4002_s24 + $0x18] sm:$0xff]   ;;  %s4650_s10 = sld [smem:[#allocation12_spill]] }
  0x7f   :  { %v3518_v36 = vld [vmem:[%s3937_s12] sm:$0xff]   ;;  %v3520_v0 = vld [vmem:[%s4002_s24 + $0x10] sm:$0xff]   ;;  %v3521_v1 = vld [vmem:[%s4002_s24 + $0x8] sm:$0xff]   ;;  %s4643_s12 = sld [smem:[#allocation7_spill]] }
  0x80   :  { %3155 = vmatpush3.bf16.msra.mxu0 %v3500_v5  ;;  %v2931_v47 = vld [vmem:[%s3882_s17] ss:$0 sm:$0xff]  ;;  %s4636_s17 = sld [smem:[#allocation9_spill]] }
  0x81   :  { %3156 = vmatprep.subr.bf16.mxu0 %v3501_v6  ;;  %3253 = vmatpush3.bf16.msra.mxu1 %v3512_v30  ;;  %v2932_v49 = vld [vmem:[%s3887_s21] ss:$0 sm:$0xff]  ;;  %s4637_s21 = sld [smem:[#allocation5_spill]] }
  0x82   :  { %3254 = vmatprep.subr.bf16.mxu1 %v3856_v29  ;;  %v2933_v54 = vld [vmem:[%s3942_s20] ss:$0 sm:$0xff]  ;;  %s4644_s20 = sld [smem:[#allocation15_spill]] }
  0x83   :  { %v3522_v2 = vld [vmem:[%s4002_s24] sm:$0xff]   ;;  %s1014_s24 = sld [smem:[#allocation2]] }
  0x84   :  { %3157 = vmatpush3.bf16.msra.mxu0 %v3502_v7  ;;  %s4651_s7 = sld [smem:[#allocation19_spill]] }
  0x85   :  { %3158 = vmatprep.subr.bf16.mxu0 %v3503_v8  ;;  %3255 = vmatpush3.bf16.msra.mxu1 %v3513_v31  ;;  %s4652_s11 = sld [smem:[#allocation24_spill]] }
  0x86   :  { %3256 = vmatprep.subr.bf16.mxu1 %v3856_v29  ;;  %s4653_s16 = sld [smem:[#allocation27_spill]] }
  0x87   :  { %s4654_s15 = sld [smem:[#allocation33_spill]] }
  0x88   :  { %3159 = vmatpush3.bf16.msra.mxu0 %v3504_v9  ;;  %s4655_s18 = sld [smem:[#allocation34_spill]] }
  0x89   :  { %3160 = vmatprep.subr.bf16.mxu0 %v3505_v10  ;;  %3257 = vmatpush3.bf16.msra.mxu1 %v3514_v32  ;;  %v3523_v32 = vld [vmem:[%s4067_s19 + $0x8] sm:$0xff]   ;;  %s4656_s22 = sld [smem:[#allocation35_spill]] }
  0x8a   :  { %3258 = vmatprep.subr.bf16.mxu1 %v3856_v29  ;;  %s4657_s23 = sld [smem:[#allocation28_spill]] }
  0x8b   :  { %s3113_s26 = sld [smem:[#allocation2 + $0x2]] }
  0x8c   :  { %3161 = vmatpush3.bf16.msra.mxu0 %v3506_v12 }
  0x8d   :  { %3162 = vmatprep.subr.bf16.mxu0 %v3507_v14  ;;  %3259 = vmatpush3.bf16.msra.mxu1 %v3515_v33  ;;  %v2942_v14 = vld [vmem:[%s3947_s27] ss:$0 sm:$0xff]  ;;  %s4645_s27 = sld [smem:[#allocation16_spill]] }
  0x8e   :  { %3260 = vmatprep.subr.bf16.mxu1 %v3856_v29  ;;  %v3524_v33 = vld [vmem:[%s4067_s19] sm:$0xff]   ;;  %s4641_s19 = sld [smem:[#allocation11_spill]] }
  0x90   :  { %3163 = vmatpush3.bf16.msra.mxu0 %v3508_v15 }
  0x91   :  { %3164 = vmatprep.subr.bf16.mxu0 %v3509_v16  ;;  %3261 = vmatpush3.bf16.msra.mxu1 %v3516_v34  ;;  %v2943_v16 = vld [vmem:[%s3952_s4] ss:$0 sm:$0xff]  ;;  %v3527_v34 = vld [vmem:[%s3892_s25 + $0x74] ss:$8 sps:$4 sm:$0xff]   ;;  %s4646_s4 = sld [smem:[#allocation10_spill]] }
  0x92   :  { %3262 = vmatprep.subr.bf16.mxu1 %v3856_v29 }
  0x94   :  { %3165 = vmatpush3.bf16.msra.mxu0 %v3510_v17 }
  0x95   :  { %3270 = vmatprep.subr.bf16.mxu0 %v3856_v29  ;;  %3263 = vmatpush3.bf16.msra.mxu1 %v3517_v35 }
  0x96   :  { %3264 = vmatprep.subr.bf16.mxu1 %v3856_v29 }
  0x97   :  { %411 = vmatmul.mubr.bf16.vlgmr.msra.gmra.mxu0 %v4163_v19 }
  0x98   :  { %3278 = vmatprep.mubr.msk.bf16.mxu0 %vm3857_vm0, %v3856_v29  ;;  %3271 = vmatpush3.bf16.msra.mxu0 %v3519_v63  ;;  %v3537_v63 = vld [vmem:[%s3892_s25 + $0x30] ss:$8 sps:$4 sm:$0xff]  }
  0x99   :  { %3265 = vmatpush3.bf16.msra.mxu1 %v3518_v36  ;;  %3272 = vmatprep.subr.bf16.mxu0 %v3856_v29 }
  0x9a   :  { %3282 = vmatprep.subr.bf16.mxu1 %v3856_v29 }
  0x9c   :  { %3273 = vmatpush3.bf16.msra.mxu0 %v3520_v0  ;;  %v3542_v0 = vld [vmem:[%s3892_s25 + $0x24] ss:$8 sps:$4 sm:$0xff]  }
  0x9d   :  { %3274 = vmatprep.subr.bf16.mxu0 %v3856_v29 }
  0xa0   :  { %3275 = vmatpush3.bf16.msra.mxu0 %v3521_v1  ;;  %v3540_v1 = vld [vmem:[%s3892_s25 + $0x20] ss:$8 sps:$4 sm:$0xff]  }
  0xa1   :  { %3276 = vmatprep.subr.bf16.mxu0 %v3856_v29 }
  0xa4   :  { %3277 = vmatpush3.bf16.msra.mxu0 %v3522_v2  ;;  %v3545_v2 = vld [vmem:[%s3892_s25 + $0x14] ss:$8 sps:$4 sm:$0xff]  }
 0x157   :  { %v3166_v20 = vpop.f32.mrf.mxu0 }
 0x159   :  { %v3167_v22 = vpop.f32.mrf.mxu0 }
 0x15a   :  { %v3168_v23 = vadd.f32 %v3167_v22, %v3166_v20  ;;  %v2944_v22 = vld [vmem:[%s4007_s8] ss:$0 sm:$0xff]  ;;  %s4640_s8 = sld [smem:[#allocation18_spill]] }
 0x15b   :  { %v3169_v24 = vpop.f32.mrf.mxu0 }
 0x15c   :  { %v413_v25 = vadd.f32 %v3168_v23, %v2914_v21 }
 0x15d   :  { %v3170_v26 = vpop.f32.mrf.mxu0 }
 0x15e   :  { %418 = vadd.xlane.f32.xlu0 %v413_v25  ;;  %v420_v27 = vmul.f32 %v413_v25, %v413_v25 }
 0x162   :  { %421 = vadd.xlane.f32.xlu0 %v420_v27 }
 0x1e7   :  { %v419_v37 = vpop.xlane.xlu0 %418 }
 0x1e8   :  { %v423_v38 = vmul.f32 0.0078125, %v419_v37 }
 0x1ea   :  { %v425_v40 = vmul.f32 %v423_v38, %v423_v38  ;;  %v428_v45 = vsub.f32 %v413_v25, %v423_v38 }
 0x1eb   :  { %v422_v39 = vpop.xlane.xlu0 %421 }
 0x1ec   :  { %v424_v41 = vmul.f32 0.0078125, %v422_v39 }
 0x1ee   :  { %v426_v42 = vsub.f32 %v424_v41, %v425_v40 }
 0x1f0   :  { %v427_v43 = vmax.f32 %v426_v42, 0.0 }
 0x1f2   :  { %v429_v44 = vadd.f32 1e-05, %v427_v43 }
 0x1f4   :  { %3742 = vrsqrt.f32 %v429_v44 }
 0x201   :  { %v3743_v46 = vpop.eup %3742 }
 0x202   :  { %v431_v48 = vmul.f32 %v3743_v46, %v428_v45  ;;  %v2950_v45 = vld [vmem:[%s4012_s3] ss:$0 sm:$0xff]  ;;  %s4639_s3 = sld [smem:[#allocation14_spill]] }
 0x204   :  { %v439_v50 = vmul.f32 %v2931_v47, %v431_v48  ;;  %v2951_v47 = vld [vmem:[%s4633_s0] ss:$0 sm:$0xff]  ;;  %s4658_s0 = sld [smem:[#allocation25_spill]] }
 0x206   :  { %v447_v51 = vadd.f32 %v2932_v49, %v439_v50 }
 0x208   :  { %v4191_v52 = vmax.f32 %v447_v51, 0.0  ;;  %v3525_v51 = vld [vmem:[%s3892_s25 + $0x70] ss:$8 sps:$4 sm:$0xff]  }
 0x20a   :  { %v4195_v53 = vpack.c.bf16 %v4191_v52, %v4191_v52 }
 0x20c   :  { %3267 = vmatmul.mubr.bf16.vlgmr.msra.gmra.mxu1 %v4195_v53 }
 0x20d   :  { %3286 = vmatprep.mubr.msk.bf16.mxu1 %vm3857_vm0, %v3856_v29  ;;  %3283 = vmatpush3.bf16.msra.mxu1 %v3523_v32  ;;  %v3584_v32 = vld [vmem:[%s4634_s9 + $0xc4] ss:$8 sps:$4 sm:$0xff]  }
 0x20e   :  { %3284 = vmatprep.subr.bf16.mxu1 %v3856_v29 }
 0x211   :  { %3285 = vmatpush3.bf16.msra.mxu1 %v3524_v33  ;;  %v3582_v33 = vld [vmem:[%s4634_s9 + $0xc0] ss:$8 sps:$4 sm:$0xff]  }
 0x212   :  { %922 = vmatprep.subr.bf16.mxu1 %v3527_v34  ;;  %v3587_v34 = vld [vmem:[%s4634_s9 + $0xb4] ss:$8 sps:$4 sm:$0xff]  }
 0x2cc   :  { %v555_v55 = vpop.f32.mrf.mxu1 }
 0x2cd   :  { %v556_v56 = vadd.f32 %v2933_v54, %v555_v55  ;;  %v3530_v55 = vld [vmem:[%s3892_s25 + $0x64] ss:$8 sps:$4 sm:$0xff]  }
 0x2ce   :  { %v3268_v57 = vpop.f32.mrf.mxu1 }
 0x2cf   :  { %v562_v58 = vsel %vm561_vm1, %v556_v56, 0.0  ;;  %v565_v59 = vmul.f32 %v556_v56, %v556_v56  ;;  %v3858_v57 = vmov 0  }
 0x2d0   :  { %563 = vadd.xlane.f32.xlu1 %v562_v58  ;;  %v558_v60 = vpop.f32.mrf.mxu1  ;;  %v3533_v58 = vld [vmem:[%s3892_s25 + $0x54] ss:$8 sps:$4 sm:$0xff]  }
 0x2d1   :  { %v566_v62 = vsel %vm561_vm1, %v565_v59, 0.0  ;;  %v3531_v59 = vld [vmem:[%s3892_s25 + $0x50] ss:$8 sps:$4 sm:$0xff]   ;;  %v3536_v60 = vld [vmem:[%s3892_s25 + $0x44] ss:$8 sps:$4 sm:$0xff]  }
 0x2d2   :  { %v3269_v61 = vpop.f32.mrf.mxu1 }
 0x2d3   :  { %v3534_v61 = vld [vmem:[%s3892_s25 + $0x40] ss:$8 sps:$4 sm:$0xff]  }
 0x2d4   :  { %567 = vadd.xlane.f32.xlu1 %v566_v62  ;;  %v3539_v62 = vld [vmem:[%s3892_s25 + $0x34] ss:$8 sps:$4 sm:$0xff]  }
 0x359   :  { %v564_v3 = vpop.xlane.xlu1 %563 }
 0x35a   :  { %v569_v4 = vmul.f32 0.015625, %v564_v3  ;;  %v3543_v3 = vld [vmem:[%s3892_s25 + $0x10] ss:$8 sps:$4 sm:$0xff]  }
 0x35c   :  { %v571_v6 = vmul.f32 %v569_v4, %v569_v4  ;;  %v574_v11 = vsub.f32 %v556_v56, %v569_v4  ;;  %v3528_v56 = vld [vmem:[%s3892_s25 + $0x60] ss:$8 sps:$4 sm:$0xff]   ;;  %v3548_v4 = vld [vmem:[%s3892_s25 + $0x4] ss:$8 sps:$4 sm:$0xff]  }
 0x35d   :  { %v568_v5 = vpop.xlane.xlu1 %567 }
 0x35e   :  { %v570_v7 = vmul.f32 0.015625, %v568_v5  ;;  %v3546_v5 = vld [vmem:[%s3892_s25] ss:$8 sps:$4 sm:$0xff]   ;;  %s4638_s25 = sld [smem:[#allocation32_spill]] }
 0x360   :  { %v572_v8 = vsub.f32 %v570_v7, %v571_v6  ;;  %v3551_v6 = vld [vmem:[%s4634_s9 + $0x74] ss:$8 sps:$4 sm:$0xff]   ;;  %v3549_v7 = vld [vmem:[%s4634_s9 + $0x70] ss:$8 sps:$4 sm:$0xff]  }
 0x362   :  { %v573_v9 = vmax.f32 %v572_v8, 0.0  ;;  %v3554_v8 = vld [vmem:[%s4634_s9 + $0x64] ss:$8 sps:$4 sm:$0xff]  }
 0x364   :  { %v575_v10 = vadd.f32 1e-05, %v573_v9  ;;  %v3552_v9 = vld [vmem:[%s4634_s9 + $0x60] ss:$8 sps:$4 sm:$0xff]  }
 0x366   :  { %3744 = vrsqrt.f32 %v575_v10  ;;  %v3557_v10 = vld [vmem:[%s4634_s9 + $0x54] ss:$8 sps:$4 sm:$0xff]  }
 0x373   :  { %v3745_v12 = vpop.eup %3744 }
 0x374   :  { %v577_v15 = vmul.f32 %v3745_v12, %v574_v11  ;;  %v3555_v11 = vld [vmem:[%s4634_s9 + $0x50] ss:$8 sps:$4 sm:$0xff]   ;;  %v3560_v12 = vld [vmem:[%s4634_s9 + $0x44] ss:$8 sps:$4 sm:$0xff]  }
 0x376   :  { %v585_v17 = vmul.f32 %v2942_v14, %v577_v15  ;;  %v3558_v14 = vld [vmem:[%s4634_s9 + $0x40] ss:$8 sps:$4 sm:$0xff]   ;;  %v3563_v15 = vld [vmem:[%s4634_s9 + $0x34] ss:$8 sps:$4 sm:$0xff]  }
 0x378   :  { %v593_v18 = vadd.f32 %v2943_v16, %v585_v17  ;;  %v3561_v16 = vld [vmem:[%s4634_s9 + $0x30] ss:$8 sps:$4 sm:$0xff]   ;;  %v3564_v17 = vld [vmem:[%s4634_s9 + $0x20] ss:$8 sps:$4 sm:$0xff]  }
 0x37a   :  { %v4212_v20 = vmax.f32 %v593_v18, 0.0  ;;  %v3569_v18 = vld [vmem:[%s4634_s9 + $0x14] ss:$8 sps:$4 sm:$0xff]  }
 0x37c   :  { %v4216_v21 = vpack.c.bf16 %v4212_v20, %v4212_v20 }
 0x37e   :  { %3279 = vmatmul.mubr.msk.bf16.vlgmr.msra.gmra.mxu0 %vm561_vm1, %v4216_v21 }
 0x43e   :  { %v672_v23 = vpop.f32.mrf.mxu0 }
 0x43f   :  { %v673_v24 = vadd.f32 %v2944_v22, %v672_v23  ;;  %v3567_v22 = vld [vmem:[%s4634_s9 + $0x10] ss:$8 sps:$4 sm:$0xff]   ;;  %v3572_v23 = vld [vmem:[%s4634_s9 + $0x4] ss:$8 sps:$4 sm:$0xff]  }
 0x440   :  { %v3280_v25 = vpop.f32.mrf.mxu0 }
 0x441   :  { %v679_v26 = vsel %vm678_vm2, %v673_v24, 0.0  ;;  %v682_v27 = vmul.f32 %v673_v24, %v673_v24  ;;  %v3575_v25 = vld [vmem:[%s4634_s9 + $0xf4] ss:$8 sps:$4 sm:$0xff]  }
 0x442   :  { %680 = vadd.xlane.f32.xlu0 %v679_v26  ;;  %v675_v28 = vpop.f32.mrf.mxu0  ;;  %v3573_v26 = vld [vmem:[%s4634_s9 + $0xf0] ss:$8 sps:$4 sm:$0xff]  }
 0x443   :  { %v683_v30 = vsel %vm678_vm2, %v682_v27, 0.0  ;;  %v3578_v27 = vld [vmem:[%s4634_s9 + $0xe4] ss:$8 sps:$4 sm:$0xff]   ;;  %v3576_v28 = vld [vmem:[%s4634_s9 + $0xe0] ss:$8 sps:$4 sm:$0xff]  }
 0x444   :  { %684 = vadd.xlane.f32.xlu1 %v683_v30  ;;  %v3281_v31 = vpop.f32.mrf.mxu0  ;;  %v3581_v30 = vld [vmem:[%s4634_s9 + $0xd4] ss:$8 sps:$4 sm:$0xff]  }
 0x445   :  { %v3579_v31 = vld [vmem:[%s4634_s9 + $0xd0] ss:$8 sps:$4 sm:$0xff]  }
 0x4cb   :  { %v681_v35 = vpop.xlane.xlu0 %680 }
 0x4cc   :  { %v686_v36 = vmul.f32 0.03125, %v681_v35  ;;  %v3585_v35 = vld [vmem:[%s4634_s9 + $0xb0] ss:$8 sps:$4 sm:$0xff]  }
 0x4cd   :  { %v685_v37 = vpop.xlane.xlu1 %684 }
 0x4ce   :  { %v688_v38 = vmul.f32 %v686_v36, %v686_v36  ;;  %v687_v39 = vmul.f32 0.03125, %v685_v37  ;;  %v691_v43 = vsub.f32 %v673_v24, %v686_v36  ;;  %v3570_v24 = vld [vmem:[%s4634_s9] ss:$8 sps:$4 sm:$0xff]   ;;  %v3590_v36 = vld [vmem:[%s4634_s9 + $0xa4] ss:$8 sps:$4 sm:$0xff]  }
 0x4cf   :  { %v3588_v37 = vld [vmem:[%s4634_s9 + $0xa0] ss:$8 sps:$4 sm:$0xff]  }
 0x4d0   :  { %v689_v40 = vsub.f32 %v687_v39, %v688_v38  ;;  %v3593_v38 = vld [vmem:[%s4634_s9 + $0x94] ss:$8 sps:$4 sm:$0xff]   ;;  %v3591_v39 = vld [vmem:[%s4634_s9 + $0x90] ss:$8 sps:$4 sm:$0xff]  }
 0x4d2   :  { %v690_v41 = vmax.f32 %v689_v40, 0.0  ;;  %v3596_v40 = vld [vmem:[%s4634_s9 + $0x84] ss:$8 sps:$4 sm:$0xff]  }
 0x4d4   :  { %v692_v42 = vadd.f32 1e-05, %v690_v41  ;;  %v3594_v41 = vld [vmem:[%s4634_s9 + $0x80] ss:$8 sps:$4 sm:$0xff]  }
 0x4d6   :  { %3746 = vrsqrt.f32 %v692_v42  ;;  %v3597_v42 = vld [vmem:[%s4635_s13 + $0x18] sm:$0xff]  }
 0x4e3   :  { %v3747_v44 = vpop.eup %3746 }
 0x4e4   :  { %v694_v46 = vmul.f32 %v3747_v44, %v691_v43  ;;  %v3598_v43 = vld [vmem:[%s4635_s13 + $0x10] sm:$0xff]   ;;  %v3599_v44 = vld [vmem:[%s4635_s13 + $0x8] sm:$0xff]  }
 0x4e6   :  { %v702_v48 = vmul.f32 %v2950_v45, %v694_v46  ;;  %v3600_v45 = vld [vmem:[%s4635_s13] sm:$0xff]   ;;  %v3603_v46 = vld [vmem:[%s4636_s17 + $0x74] ss:$8 sps:$4 sm:$0xff]   ;;  %s4660_s13 = sld [smem:[#allocation21_spill]] }
 0x4e7   :  { %1252 = vmatprep.subr.bf16.mxu0 %v3603_v46  ;;  %v3071_v46 = vld [vmem:[%s4639_s3] ss:$0 sm:$0xff]  ;;  %s3137_s3 = sld [smem:[#allocation2 + $0x3]] }
 0x4e8   :  { %v710_v49 = vadd.f32 %v2951_v47, %v702_v48  ;;  %v3606_v47 = vld [vmem:[%s4636_s17 + $0x64] ss:$8 sps:$4 sm:$0xff]   ;;  %v3604_v48 = vld [vmem:[%s4636_s17 + $0x60] ss:$8 sps:$4 sm:$0xff]  }
 0x4ea   :  { %v4229_v50 = vmax.f32 %v710_v49, 0.0  ;;  %v3609_v49 = vld [vmem:[%s4636_s17 + $0x54] ss:$8 sps:$4 sm:$0xff]  }
 0x4ec   :  { %v4234_v54 = vpack.c.bf16 %v4229_v50, %v4229_v50 }
 0x4ee   :  { %3287 = vmatmul.mubr.msk.bf16.vlgmr.msra.gmra.mxu1 %vm678_vm2, %v4234_v54 }
 0x4ef   :  { %923 = vmatpush1.bf16.msra.mxu1 %v3525_v51  ;;  %954 = vmatprep.mubr.bf16.mxu1 %v3858_v57 }
 0x4f0   :  { %924 = vmatprep.subr.bf16.mxu1 %v3530_v55  ;;  %v3607_v55 = vld [vmem:[%s4636_s17 + $0x50] ss:$8 sps:$4 sm:$0xff]  }
 0x4f3   :  { %925 = vmatpush1.bf16.msra.mxu1 %v3528_v56  ;;  %v3612_v56 = vld [vmem:[%s4636_s17 + $0x44] ss:$8 sps:$4 sm:$0xff]  }
 0x4f4   :  { %926 = vmatprep.subr.bf16.mxu1 %v3533_v58 }
 0x4f7   :  { %927 = vmatpush1.bf16.msra.mxu1 %v3531_v59  ;;  %v3610_v59 = vld [vmem:[%s4636_s17 + $0x40] ss:$8 sps:$4 sm:$0xff]  }
 0x4f8   :  { %928 = vmatprep.subr.bf16.mxu1 %v3536_v60 }
 0x4fb   :  { %929 = vmatpush1.bf16.msra.mxu1 %v3534_v61  ;;  %v832_v61 = vlaneseq }
 0x4fc   :  { %930 = vmatprep.subr.bf16.mxu1 %v3539_v62 }
 0x4fd   :  { %v833_v62 = vshrl.u32 %v832_v61, 7  ;;  %v3649_v61 = vld [vmem:[%s4640_s8 + $0x38] sm:$0xff]  }
 0x4ff   :  { %931 = vmatpush1.bf16.msra.mxu1 %v3537_v63  ;;  %v4312_v63 = vsub.s32 0, %v833_v62 }
 0x500   :  { %932 = vmatprep.subr.bf16.mxu1 %v3542_v0  ;;  %v830_v0 = vld [vmem:[%s4637_s21] sm:$0x3]  ;;  %s4662_s21 = sld [smem:[#allocation30_spill]] }
 0x503   :  { %933 = vmatpush1.bf16.msra.mxu1 %v3540_v1  ;;  %v4315_v1 = vsub.s32 1, %v833_v62  ;;  %v3650_v62 = vld [vmem:[%s4640_s8 + $0x30] sm:$0xff]  }
 0x504   :  { %934 = vmatprep.subr.bf16.mxu1 %v3545_v2  ;;  %v835_v2 = vrot.slane %v830_v0, %v4312_v63 }
 0x507   :  { %935 = vmatpush1.bf16.msra.mxu1 %v3543_v3  ;;  %v839_v3 = vrot.slane %v830_v0, %v4315_v1  ;;  %v3651_v0 = vld [vmem:[%s4640_s8 + $0x28] sm:$0xff]  }
 0x508   :  { %936 = vmatprep.subr.bf16.mxu1 %v3548_v4 }
 0x50b   :  { %937 = vmatpush1.bf16.msra.mxu1 %v3546_v5 }
 0x50c   :  { %1453 = vmatprep.subr.bf16.mxu1 %v3551_v6 }
 0x50e   :  { %955 = vmatmul.mubr.bf16.vlgmr.msra.gmra.mxu1 %v4195_v53 }
 0x50f   :  { %1454 = vmatpush1.bf16.msra.mxu1 %v3549_v7  ;;  %1485 = vmatprep.mubr.bf16.mxu1 %v4155_v13  ;;  %v3566_v13 = vld [vmem:[%s4634_s9 + $0x24] ss:$8 sps:$4 sm:$0xff]   ;;  %s4659_s9 = sld [smem:[#allocation26_spill]] }
 0x510   :  { %1455 = vmatprep.subr.bf16.mxu1 %v3554_v8 }
 0x513   :  { %1456 = vmatpush1.bf16.msra.mxu1 %v3552_v9 }
 0x514   :  { %1457 = vmatprep.subr.bf16.mxu1 %v3557_v10 }
 0x517   :  { %1458 = vmatpush1.bf16.msra.mxu1 %v3555_v11 }
 0x518   :  { %1459 = vmatprep.subr.bf16.mxu1 %v3560_v12 }
 0x51b   :  { %1460 = vmatpush1.bf16.msra.mxu1 %v3558_v14 }
 0x51c   :  { %1461 = vmatprep.subr.bf16.mxu1 %v3563_v15  ;;  %v3615_v15 = vld [vmem:[%s4636_s17 + $0x34] ss:$8 sps:$4 sm:$0xff]  }
 0x51f   :  { %1462 = vmatpush1.bf16.msra.mxu1 %v3561_v16  ;;  %v3613_v16 = vld [vmem:[%s4636_s17 + $0x30] ss:$8 sps:$4 sm:$0xff]  }
 0x520   :  { %1463 = vmatprep.subr.bf16.mxu1 %v3566_v13  ;;  %v3618_v13 = vld [vmem:[%s4636_s17 + $0x24] ss:$8 sps:$4 sm:$0xff]  }
 0x523   :  { %1464 = vmatpush1.bf16.msra.mxu1 %v3564_v17  ;;  %v3616_v17 = vld [vmem:[%s4636_s17 + $0x20] ss:$8 sps:$4 sm:$0xff]  }
 0x524   :  { %1465 = vmatprep.subr.bf16.mxu1 %v3569_v18  ;;  %v3621_v18 = vld [vmem:[%s4636_s17 + $0x14] ss:$8 sps:$4 sm:$0xff]  }
 0x527   :  { %1466 = vmatpush1.bf16.msra.mxu1 %v3567_v22  ;;  %v3619_v22 = vld [vmem:[%s4636_s17 + $0x10] ss:$8 sps:$4 sm:$0xff]  }
 0x528   :  { %1467 = vmatprep.subr.bf16.mxu1 %v3572_v23  ;;  %v3624_v23 = vld [vmem:[%s4636_s17 + $0x4] ss:$8 sps:$4 sm:$0xff]  }
 0x52b   :  { %1468 = vmatpush1.bf16.msra.mxu1 %v3570_v24  ;;  %v3622_v24 = vld [vmem:[%s4636_s17] ss:$8 sps:$4 sm:$0xff]  }
 0x52c   :  { %1469 = vmatprep.subr.bf16.mxu1 %v3575_v25  ;;  %v3627_v25 = vld [vmem:[%s4636_s17 + $0xf4] ss:$8 sps:$4 sm:$0xff]  }
 0x52f   :  { %1470 = vmatpush2.bf16.msra.mxu1 %v3573_v26  ;;  %v3625_v26 = vld [vmem:[%s4636_s17 + $0xf0] ss:$8 sps:$4 sm:$0xff]  }
 0x530   :  { %1471 = vmatprep.subr.bf16.mxu1 %v3578_v27  ;;  %v3630_v27 = vld [vmem:[%s4636_s17 + $0xe4] ss:$8 sps:$4 sm:$0xff]  }
 0x533   :  { %1472 = vmatpush2.bf16.msra.mxu1 %v3576_v28  ;;  %v3628_v28 = vld [vmem:[%s4636_s17 + $0xe0] ss:$8 sps:$4 sm:$0xff]  }
 0x534   :  { %1473 = vmatprep.subr.bf16.mxu1 %v3581_v30  ;;  %v3633_v30 = vld [vmem:[%s4636_s17 + $0xd4] ss:$8 sps:$4 sm:$0xff]  }
 0x537   :  { %1474 = vmatpush2.bf16.msra.mxu1 %v3579_v31  ;;  %v3631_v31 = vld [vmem:[%s4636_s17 + $0xd0] ss:$8 sps:$4 sm:$0xff]  }
 0x538   :  { %1475 = vmatprep.subr.bf16.mxu1 %v3584_v32  ;;  %v3636_v32 = vld [vmem:[%s4636_s17 + $0xc4] ss:$8 sps:$4 sm:$0xff]  }
 0x53b   :  { %1476 = vmatpush2.bf16.msra.mxu1 %v3582_v33  ;;  %v3634_v33 = vld [vmem:[%s4636_s17 + $0xc0] ss:$8 sps:$4 sm:$0xff]  }
 0x53c   :  { %1477 = vmatprep.subr.bf16.mxu1 %v3587_v34  ;;  %v3639_v34 = vld [vmem:[%s4636_s17 + $0xb4] ss:$8 sps:$4 sm:$0xff]  }
 0x53f   :  { %1478 = vmatpush2.bf16.msra.mxu1 %v3585_v35  ;;  %v3637_v35 = vld [vmem:[%s4636_s17 + $0xb0] ss:$8 sps:$4 sm:$0xff]  }
 0x540   :  { %1479 = vmatprep.subr.bf16.mxu1 %v3590_v36  ;;  %v3642_v36 = vld [vmem:[%s4636_s17 + $0xa4] ss:$8 sps:$4 sm:$0xff]  }
 0x543   :  { %1480 = vmatpush2.bf16.msra.mxu1 %v3588_v37  ;;  %v3640_v37 = vld [vmem:[%s4636_s17 + $0xa0] ss:$8 sps:$4 sm:$0xff]  }
 0x544   :  { %1481 = vmatprep.subr.bf16.mxu1 %v3593_v38  ;;  %v3645_v38 = vld [vmem:[%s4636_s17 + $0x94] ss:$8 sps:$4 sm:$0xff]  }
 0x547   :  { %1482 = vmatpush2.bf16.msra.mxu1 %v3591_v39  ;;  %v3643_v39 = vld [vmem:[%s4636_s17 + $0x90] ss:$8 sps:$4 sm:$0xff]  }
 0x548   :  { %1483 = vmatprep.subr.bf16.mxu1 %v3596_v40  ;;  %v3646_v40 = vld [vmem:[%s4636_s17 + $0x80] ss:$8 sps:$4 sm:$0xff]  }
 0x54b   :  { %1484 = vmatpush2.bf16.msra.mxu1 %v3594_v41  ;;  %v3648_v41 = vld [vmem:[%s4636_s17 + $0x84] ss:$8 sps:$4 sm:$0xff]  }
 0x54c   :  { %3290 = vmatprep.subr.bf16.mxu1 %v3856_v29 }
 0x54e   :  { %1486 = vmatmul.mubr.bf16.vlgmr.msra.gmra.mxu1 %v4163_v19  ;;  %v3601_v19 = vld [vmem:[%s4636_s17 + $0x70] ss:$8 sps:$4 sm:$0xff]   ;;  %s4661_s17 = sld [smem:[#allocation36_spill]] }
 0x54f   :  { %3291 = vmatpush3.bf16.msra.mxu1 %v3597_v42  ;;  %3298 = vmatprep.mubr.msk.bf16.mxu1 %vm3857_vm0, %v3856_v29 }
 0x550   :  { %3292 = vmatprep.subr.bf16.mxu1 %v3856_v29  ;;  %1253 = vmatpush1.bf16.msra.mxu0 %v3601_v19  ;;  %v2952_v19 = vld [vmem:[%s4638_s25] ss:$0 sm:$0xff]  ;;  %s4663_s25 = sld [smem:[#allocation40_spill]] }
 0x551   :  { %1254 = vmatprep.subr.bf16.mxu0 %v3606_v47 }
 0x553   :  { %3293 = vmatpush3.bf16.msra.mxu1 %v3598_v43 }
 0x554   :  { %3294 = vmatprep.subr.bf16.mxu1 %v3856_v29  ;;  %1255 = vmatpush1.bf16.msra.mxu0 %v3604_v48 }
 0x555   :  { %1256 = vmatprep.subr.bf16.mxu0 %v3609_v49 }
 0x557   :  { %3295 = vmatpush3.bf16.msra.mxu1 %v3599_v44 }
 0x558   :  { %3296 = vmatprep.subr.bf16.mxu1 %v3856_v29  ;;  %1257 = vmatpush1.bf16.msra.mxu0 %v3607_v55 }
 0x559   :  { %1258 = vmatprep.subr.bf16.mxu0 %v3612_v56 }
 0x55b   :  { %3297 = vmatpush3.bf16.msra.mxu1 %v3600_v45 }
 0x55c   :  { %3302 = vmatprep.subr.bf16.mxu1 %v3856_v29  ;;  %1259 = vmatpush1.bf16.msra.mxu0 %v3610_v59 }
 0x55d   :  { %1260 = vmatprep.subr.bf16.mxu0 %v3615_v15 }
 0x55e   :  { %3299 = vmatmul.mubr.msk.bf16.vlgmr.msra.gmra.mxu1 %vm561_vm1, %v4216_v21 }
 0x55f   :  { %3318 = vmatprep.mubr.msk.bf16.mxu1 %vm3857_vm0, %v3856_v29  ;;  %3303 = vmatpush3.bf16.msra.mxu1 %v3649_v61  ;;  %v3663_v61 = vld [vmem:[%s4641_s19 + $0x50] ss:$8 sps:$4 sm:$0xff]  }
 0x560   :  { %1261 = vmatpush1.bf16.msra.mxu0 %v3613_v16  ;;  %3304 = vmatprep.subr.bf16.mxu1 %v3856_v29  ;;  %v1015_v16 = vstv %s1014_s24  ;;  %s4666_s24 = sld [smem:[#allocation29_spill]] }
 0x561   :  { %1262 = vmatprep.subr.bf16.mxu0 %v3618_v13 }
 0x563   :  { %3305 = vmatpush3.bf16.msra.mxu1 %v3650_v62  ;;  %v3668_v62 = vld [vmem:[%s4641_s19 + $0x44] ss:$8 sps:$4 sm:$0xff]  }
 0x564   :  { %1263 = vmatpush1.bf16.msra.mxu0 %v3616_v17  ;;  %3306 = vmatprep.subr.bf16.mxu1 %v3856_v29  ;;  %v2974_v17 = vmul.f32 -1.442695, %v1015_v16 }
 0x565   :  { %1264 = vmatprep.subr.bf16.mxu0 %v3621_v18 }
 0x566   :  { %3748 = vpow2.f32 %v2974_v17 }
 0x567   :  { %3307 = vmatpush3.bf16.msra.mxu1 %v3651_v0  ;;  %v3666_v0 = vld [vmem:[%s4641_s19 + $0x40] ss:$8 sps:$4 sm:$0xff]  }
 0x568   :  { %1265 = vmatpush1.bf16.msra.mxu0 %v3619_v22  ;;  %3308 = vmatprep.subr.bf16.mxu1 %v3856_v29 }
 0x569   :  { %1266 = vmatprep.subr.bf16.mxu0 %v3624_v23  ;;  %v982_v23 = vld [vmem:[%s4642_s6] sm:$0x3]  ;;  %s4667_s6 = sld [smem:[#allocation39_spill]] }
 0x56c   :  { %1267 = vmatpush1.bf16.msra.mxu0 %v3622_v24  ;;  %v996_v24 = vld [vmem:[%s4643_s12] sm:$0x3]  ;;  %s4668_s12 = sld [smem:[#allocation42_spill]] }
 0x56d   :  { %1268 = vmatprep.subr.bf16.mxu0 %v3627_v25 }
 0x570   :  { %1269 = vmatpush2.bf16.msra.mxu0 %v3625_v26 }
 0x571   :  { %1270 = vmatprep.subr.bf16.mxu0 %v3630_v27 }
 0x573   :  { %v3749_v25 = vpop.eup %3748 }
 0x574   :  { %1271 = vmatpush2.bf16.msra.mxu0 %v3628_v28  ;;  %v987_v28 = vrot.slane %v982_v23, %v4312_v63 }
 0x575   :  { %1272 = vmatprep.subr.bf16.mxu0 %v3633_v30  ;;  %v991_v30 = vrot.slane %v982_v23, %v4315_v1 }
 0x578   :  { %1273 = vmatpush2.bf16.msra.mxu0 %v3631_v31 }
 0x579   :  { %1274 = vmatprep.subr.bf16.mxu0 %v3636_v32  ;;  %v1001_v32 = vrot.slane %v996_v24, %v4312_v63 }
 0x57c   :  { %1275 = vmatpush2.bf16.msra.mxu0 %v3634_v33 }
 0x57d   :  { %1276 = vmatprep.subr.bf16.mxu0 %v3639_v34 }
 0x580   :  { %1277 = vmatpush2.bf16.msra.mxu0 %v3637_v35  ;;  %v1005_v35 = vrot.slane %v996_v24, %v4315_v1  ;;  %v3681_v24 = vld [vmem:[%s4641_s19 + $0xf0] ss:$8 sps:$4 sm:$0xff]  }
 0x581   :  { %1278 = vmatprep.subr.bf16.mxu0 %v3642_v36  ;;  %v1019_v36 = vadd.f32 1.0, %v3749_v25 }
 0x584   :  { %1279 = vmatpush2.bf16.msra.mxu0 %v3640_v37 }
 0x585   :  { %1280 = vmatprep.subr.bf16.mxu0 %v3645_v38 }
 0x588   :  { %1281 = vmatpush2.bf16.msra.mxu0 %v3643_v39 }
 0x589   :  { %1282 = vmatprep.subr.bf16.mxu0 %v3648_v41 }
 0x58c   :  { %1283 = vmatpush2.bf16.msra.mxu0 %v3646_v40 }
 0x5ae   :  { %v4307_v51 = vpop.f32.mrf.mxu1 }
 0x5af   :  { %v4360_v47 = vadd.f32 %v2952_v19, %v4307_v51  ;;  %v3785_v19 = vld [vmem:[%s3867_s5 + $0x8] sm:$0xff] }
 0x5b0   :  { %v3288_v57 = vpop.f32.mrf.mxu1 }
 0x5b1   :  { %v780_v59 = vsel %vm779_vm3, %v4360_v47, 0.0 }
 0x5b2   :  { %v776_v58 = vpop.f32.mrf.mxu1 }
 0x5b3   :  { %v783_v58 = vmul.f32 %v4360_v47, %v4360_v47 }
 0x5b4   :  { %v3289_v60 = vpop.f32.mrf.mxu1 }
 0x5b5   :  { %v784_v60 = vsel %vm779_vm3, %v783_v58, 0.0  ;;  %v3657_v58 = vld [vmem:[%s4641_s19 + $0x70] ss:$8 sps:$4 sm:$0xff]  }
 0x5ce   :  { %v956_v4 = vpop.f32.mrf.mxu1 }
 0x5cf   :  { %v4319_v5 = vadd.f32 %v956_v4, %v835_v2  ;;  %v3652_v2 = vld [vmem:[%s4640_s8 + $0x20] sm:$0xff]   ;;  %v3654_v4 = vld [vmem:[%s4640_s8 + $0x10] sm:$0xff]  }
 0x5d0   :  { %v958_v6 = vpop.f32.mrf.mxu1  ;;  %3309 = vmatpush3.bf16.msra.mxu1 %v3652_v2  ;;  %v3671_v2 = vld [vmem:[%s4641_s19 + $0x34] ss:$8 sps:$4 sm:$0xff]  }
 0x5d1   :  { %v4321_v7 = vadd.f32 %v958_v6, %v839_v3  ;;  %v966_v10 = vmul.f32 %v4319_v5, %v4319_v5  ;;  %3310 = vmatprep.subr.bf16.mxu1 %v3856_v29  ;;  %v3653_v3 = vld [vmem:[%s4640_s8 + $0x18] sm:$0xff]   ;;  %v3655_v6 = vld [vmem:[%s4640_s8 + $0x8] sm:$0xff]  }
 0x5d2   :  { %v960_v8 = vpop.f32.mrf.mxu1 }
 0x5d3   :  { %v963_v9 = vadd.f32 %v4321_v7, %v4319_v5  ;;  %v967_v11 = vmul.f32 %v4321_v7, %v4321_v7  ;;  %v3656_v8 = vld [vmem:[%s4640_s8] sm:$0xff]   ;;  %s4664_s8 = sld [smem:[#allocation37_spill]] }
 0x5d4   :  { %v961_v12 = vpop.f32.mrf.mxu1  ;;  %3311 = vmatpush3.bf16.msra.mxu1 %v3653_v3  ;;  %v3669_v3 = vld [vmem:[%s4641_s19 + $0x30] ss:$8 sps:$4 sm:$0xff]  }
 0x5d5   :  { %964 = vadd.xlane.f32.xlu0 %v963_v9  ;;  %v968_v14 = vadd.f32 %v967_v11, %v966_v10  ;;  %3312 = vmatprep.subr.bf16.mxu1 %v3856_v29  ;;  %v3659_v9 = vld [vmem:[%s4641_s19 + $0x74] ss:$8 sps:$4 sm:$0xff]  }
 0x5d6   :  { %1716 = vmatprep.subr.bf16.mxu0 %v3659_v9  ;;  %v3675_v9 = vld [vmem:[%s4641_s19 + $0x10] ss:$8 sps:$4 sm:$0xff]  }
 0x5d7   :  { %969 = vadd.xlane.f32.xlu1 %v968_v14 }
 0x5d8   :  { %3313 = vmatpush3.bf16.msra.mxu1 %v3654_v4  ;;  %v3674_v4 = vld [vmem:[%s4641_s19 + $0x24] ss:$8 sps:$4 sm:$0xff]  }
 0x5d9   :  { %3314 = vmatprep.subr.bf16.mxu1 %v3856_v29 }
 0x5dc   :  { %3315 = vmatpush3.bf16.msra.mxu1 %v3655_v6  ;;  %v3672_v6 = vld [vmem:[%s4641_s19 + $0x20] ss:$8 sps:$4 sm:$0xff]  }
 0x5dd   :  { %3316 = vmatprep.subr.bf16.mxu1 %v3856_v29 }
 0x5e0   :  { %3317 = vmatpush3.bf16.msra.mxu1 %v3656_v8  ;;  %v3677_v8 = vld [vmem:[%s4641_s19 + $0x14] ss:$8 sps:$4 sm:$0xff]  }
 0x5e1   :  { %3342 = vmatprep.subr.bf16.mxu1 %v3856_v29 }
 0x60e   :  { %v4353_v42 = vpop.f32.mrf.mxu1 }
 0x610   :  { %v4355_v43 = vpop.f32.mrf.mxu1 }
 0x612   :  { %v1491_v44 = vpop.f32.mrf.mxu1 }
 0x613   :  { %v3784_v44 = vld [vmem:[%s3867_s5] sm:$0xff]  ;;  %s3079_s5 = sld [smem:[#allocation2 + $0x1]] }
 0x614   :  { %v1492_v45 = vpop.f32.mrf.mxu1 }
 0x619   :  { %v1871_v17 = vstv %s3079_s5  ;;  %s4669_s5 = sld [smem:[#allocation31_spill]] }
 0x61a   :  { %v3080_v23 = vmul.f32 -1.442695, %v1871_v17  ;;  %v3710_v17 = vld [vmem:[%s4647_s28 + $0x10] sm:$0xff]  }
 0x61e   :  { %v1832_v48 = vpop.f32.mrf.mxu1 }
 0x61f   :  { %v4362_v49 = vadd.f32 %v3071_v46, %v1832_v48 }
 0x620   :  { %v3300_v55 = vpop.f32.mrf.mxu1 }
 0x621   :  { %1838 = vadd.xlane.f32.xlu0 %v4362_v49  ;;  %v1840_v56 = vmul.f32 %v4362_v49, %v4362_v49 }
 0x622   :  { %v1835_v57 = vpop.f32.mrf.mxu1 }
 0x623   :  { %1841 = vadd.xlane.f32.xlu1 %v1840_v56 }
 0x624   :  { %v3301_v51 = vpop.f32.mrf.mxu1 }
 0x625   :  { %781 = vadd.xlane.f32.xlu0 %v780_v59  ;;  %v3662_v51 = vld [vmem:[%s4641_s19 + $0x64] ss:$8 sps:$4 sm:$0xff]   ;;  %v3660_v59 = vld [vmem:[%s4641_s19 + $0x60] ss:$8 sps:$4 sm:$0xff]  }
 0x627   :  { %785 = vadd.xlane.f32.xlu1 %v784_v60  ;;  %v3665_v60 = vld [vmem:[%s4641_s19 + $0x54] ss:$8 sps:$4 sm:$0xff]  }
 0x65e   :  { %v965_v10 = vpop.xlane.xlu0 %964 }
 0x65f   :  { %v971_v11 = vmul.f32 0.00390625, %v965_v10  ;;  %v3680_v10 = vld [vmem:[%s4641_s19 + $0x4] ss:$8 sps:$4 sm:$0xff]  }
 0x660   :  { %v970_v12 = vpop.xlane.xlu1 %969 }
 0x661   :  { %v972_v14 = vmul.f32 0.00390625, %v970_v12  ;;  %v973_v15 = vmul.f32 %v971_v11, %v971_v11  ;;  %v976_v26 = vsub.f32 %v4319_v5, %v971_v11  ;;  %v977_v27 = vsub.f32 %v4321_v7, %v971_v11 }
 0x663   :  { %v974_v13 = vsub.f32 %v972_v14, %v973_v15  ;;  %v3678_v15 = vld [vmem:[%s4641_s19] ss:$8 sps:$4 sm:$0xff]  }
 0x665   :  { %v975_v18 = vmax.f32 %v974_v13, 0.0 }
 0x667   :  { %v978_v22 = vadd.f32 1e-05, %v975_v18  ;;  %v3683_v18 = vld [vmem:[%s4641_s19 + $0xf4] ss:$8 sps:$4 sm:$0xff]  }
 0x669   :  { %3750 = vrsqrt.f32 %v978_v22 }
 0x66a   :  { %3752 = vrcp.f32 %v1019_v36 }
 0x676   :  { %v3751_v31 = vpop.eup %3750 }
 0x677   :  { %v980_v33 = vmul.f32 %v3751_v31, %v976_v26  ;;  %v981_v34 = vmul.f32 %v3751_v31, %v977_v27  ;;  %v3753_v39 = vpop.eup %3752  ;;  %v3686_v26 = vld [vmem:[%s4641_s19 + $0xe4] ss:$8 sps:$4 sm:$0xff]   ;;  %v3687_v31 = vld [vmem:[%s4641_s19 + $0xd0] ss:$8 sps:$4 sm:$0xff]  }
 0x679   :  { %v994_v37 = vmul.f32 %v987_v28, %v980_v33  ;;  %v995_v5 = vmul.f32 %v991_v30, %v981_v34  ;;  %v3684_v28 = vld [vmem:[%s4641_s19 + $0xe0] ss:$8 sps:$4 sm:$0xff]   ;;  %v3689_v30 = vld [vmem:[%s4641_s19 + $0xd4] ss:$8 sps:$4 sm:$0xff]  }
 0x67a   :  { %v3690_v33 = vld [vmem:[%s4641_s19 + $0xc0] ss:$8 sps:$4 sm:$0xff]   ;;  %v3695_v34 = vld [vmem:[%s4641_s19 + $0xb4] ss:$8 sps:$4 sm:$0xff]  }
 0x67b   :  { %v1008_v38 = vadd.f32 %v1001_v32, %v994_v37  ;;  %v1009_v7 = vadd.f32 %v1005_v35, %v995_v5  ;;  %v3692_v32 = vld [vmem:[%s4641_s19 + $0xc4] ss:$8 sps:$4 sm:$0xff]   ;;  %v3693_v35 = vld [vmem:[%s4641_s19 + $0xb0] ss:$8 sps:$4 sm:$0xff]  }
 0x67c   :  { %v3698_v5 = vld [vmem:[%s4641_s19 + $0xa4] ss:$8 sps:$4 sm:$0xff]  }
 0x67d   :  { %3754 = vtanh.f32 %v1008_v38 }
 0x67e   :  { %3756 = vtanh.f32 %v1009_v7  ;;  %v3077_v7 = vld [vmem:[%s4644_s20] ss:$0 sm:$0xff]  ;;  %s4670_s20 = sld [smem:[#allocation41_spill]] }
 0x67f   :  { %3758 = vpow2.f32 %v3080_v23  ;;  %v3713_v23 = vld [vmem:[%s4648_s1 + $0x8] sm:$0xff]  }
 0x68a   :  { %v3755_v40 = vpop.eup %3754 }
 0x68b   :  { %v3757_v41 = vpop.eup %3756  ;;  %1012 = vst [vmem:[%s4135_s14] sm:$0xff] %v3755_v40  ;;  %v1022_v45 = vsub.f32 %v3784_v44, %v3755_v40  ;;  %v3078_v40 = vld [vmem:[%s4645_s27] ss:$0 sm:$0xff] }
 0x68c   :  { %1013 = vst [vmem:[%s4135_s14 + $0x8] sm:$0xff] %v3757_v41  ;;  %v1023_v46 = vsub.f32 %v3785_v19, %v3757_v41  ;;  %v3759_v36 = vpop.eup %3758  ;;  %v3696_v44 = vld [vmem:[%s4641_s19 + $0xa0] ss:$8 sps:$4 sm:$0xff]  }
 0x68d   :  { %v1024_v48 = vmul.f32 %v3753_v39, %v1022_v45  ;;  %v1875_v41 = vadd.f32 1.0, %v3759_v36  ;;  %v3722_v36 = vld [vmem:[%s4649_s2] sm:$0xff]  }
 0x68e   :  { %v1025_v55 = vmul.f32 %v3753_v39, %v1023_v46 }
 0x68f   :  { %v1058_v56 = vpack.c.bf16 %v1024_v48, %v1024_v48  ;;  %v3699_v48 = vld [vmem:[%s4641_s19 + $0x90] ss:$8 sps:$4 sm:$0xff]  }
 0x690   :  { %v1059_v57 = vpack.c.bf16 %v1025_v55, %v1025_v55 }
 0x692   :  { %1284 = vmatprep.mubr.bf16.mxu0 %v1059_v57  ;;  %v3704_v57 = vld [vmem:[%s4641_s19 + $0x84] ss:$8 sps:$4 sm:$0xff]  }
 0x693   :  { %1285 = vmatmul.mubr.bf16.vlgmr.msra.gmra.mxu0 %v1058_v56 }
 0x694   :  { %1717 = vmatpush1.bf16.msra.mxu0 %v3657_v58 }
 0x695   :  { %1718 = vmatprep.subr.bf16.mxu0 %v3662_v51  ;;  %v3702_v51 = vld [vmem:[%s4641_s19 + $0x80] ss:$8 sps:$4 sm:$0xff]  }
 0x698   :  { %1719 = vmatpush1.bf16.msra.mxu0 %v3660_v59 }
 0x699   :  { %1720 = vmatprep.subr.bf16.mxu0 %v3665_v60  ;;  %v1494_v60 = vld [vmem:[%s4646_s4] sm:$0x3] }
 0x69c   :  { %1721 = vmatpush1.bf16.msra.mxu0 %v3663_v61  ;;  %v1499_v61 = vrot.slane %v1494_v60, %v4312_v63 }
 0x69d   :  { %1722 = vmatprep.subr.bf16.mxu0 %v3668_v62 }
 0x6a0   :  { %1723 = vmatpush1.bf16.msra.mxu0 %v3666_v0  ;;  %v1503_v0 = vrot.slane %v1494_v60, %v4315_v1 }
 0x6a1   :  { %1724 = vmatprep.subr.bf16.mxu0 %v3671_v2 }
 0x6a4   :  { %1725 = vmatpush1.bf16.msra.mxu0 %v3669_v3 }
 0x6a5   :  { %1726 = vmatprep.subr.bf16.mxu0 %v3674_v4 }
 0x6a8   :  { %1727 = vmatpush1.bf16.msra.mxu0 %v3672_v6 }
 0x6a9   :  { %1728 = vmatprep.subr.bf16.mxu0 %v3677_v8 }
 0x6aa   :  { %v1839_v11 = vpop.xlane.xlu0 %1838 }
 0x6ab   :  { %v1843_v12 = vmul.f32 0.0078125, %v1839_v11 }
 0x6ac   :  { %v1842_v14 = vpop.xlane.xlu1 %1841  ;;  %1729 = vmatpush1.bf16.msra.mxu0 %v3675_v9 }
 0x6ad   :  { %v1845_v16 = vmul.f32 %v1843_v12, %v1843_v12  ;;  %v1844_v13 = vmul.f32 0.0078125, %v1842_v14  ;;  %1730 = vmatprep.subr.bf16.mxu0 %v3680_v10  ;;  %v1848_v37 = vsub.f32 %v4362_v49, %v1843_v12  ;;  %v3701_v49 = vld [vmem:[%s4641_s19 + $0x94] ss:$8 sps:$4 sm:$0xff]   ;;  %s4665_s19 = sld [smem:[#allocation38_spill]] }
 0x6ae   :  { %v3705_v14 = vld [vmem:[%s4647_s28 + $0x38] sm:$0xff]  }
 0x6af   :  { %v1846_v22 = vsub.f32 %v1844_v13, %v1845_v16  ;;  %v3708_v16 = vld [vmem:[%s4647_s28 + $0x20] sm:$0xff]   ;;  %v3709_v13 = vld [vmem:[%s4647_s28 + $0x18] sm:$0xff]  }
 0x6b0   :  { %1731 = vmatpush1.bf16.msra.mxu0 %v3678_v15 }
 0x6b1   :  { %v1847_v25 = vmax.f32 %v1846_v22, 0.0  ;;  %1732 = vmatprep.subr.bf16.mxu0 %v3683_v18  ;;  %v3711_v18 = vld [vmem:[%s4647_s28 + $0x8] sm:$0xff]   ;;  %v3712_v22 = vld [vmem:[%s4647_s28] sm:$0xff]  }
 0x6b3   :  { %v1849_v27 = vadd.f32 1e-05, %v1847_v25 }
 0x6b4   :  { %1733 = vmatpush2.bf16.msra.mxu0 %v3681_v24  ;;  %v3714_v24 = vld [vmem:[%s4648_s1] sm:$0xff]  }
 0x6b5   :  { %3760 = vrsqrt.f32 %v1849_v27  ;;  %1734 = vmatprep.subr.bf16.mxu0 %v3686_v26 }
 0x6b6   :  { %3762 = vrcp.f32 %v1875_v41 }
 0x6b8   :  { %1735 = vmatpush2.bf16.msra.mxu0 %v3684_v28  ;;  %v3715_v28 = vld [vmem:[%s4649_s2 + $0x38] sm:$0xff]  }
 0x6b9   :  { %1736 = vmatprep.subr.bf16.mxu0 %v3689_v30  ;;  %v3716_v30 = vld [vmem:[%s4649_s2 + $0x30] sm:$0xff]  }
 0x6bc   :  { %1737 = vmatpush2.bf16.msra.mxu0 %v3687_v31  ;;  %v3717_v31 = vld [vmem:[%s4649_s2 + $0x28] sm:$0xff]  }
 0x6bd   :  { %1738 = vmatprep.subr.bf16.mxu0 %v3692_v32  ;;  %v3718_v32 = vld [vmem:[%s4649_s2 + $0x20] sm:$0xff]  }
 0x6c0   :  { %1739 = vmatpush2.bf16.msra.mxu0 %v3690_v33  ;;  %v3719_v33 = vld [vmem:[%s4649_s2 + $0x18] sm:$0xff]  }
 0x6c1   :  { %1740 = vmatprep.subr.bf16.mxu0 %v3695_v34  ;;  %v3720_v34 = vld [vmem:[%s4649_s2 + $0x10] sm:$0xff]  }
 0x6c2   :  { %v3761_v38 = vpop.eup %3760 }
 0x6c3   :  { %v1851_v39 = vmul.f32 %v3761_v38, %v1848_v37  ;;  %v3763_v46 = vpop.eup %3762  ;;  %v1544_v37 = vld [vmem:[%s4650_s10] sm:$0x3] }
 0x6c4   :  { %1741 = vmatpush2.bf16.msra.mxu0 %v3693_v35  ;;  %v3721_v35 = vld [vmem:[%s4649_s2 + $0x8] sm:$0xff]   ;;  %v1553_v38 = vrot.slane %v1544_v37, %v4315_v1 }
 0x6c5   :  { %v1859_v45 = vmul.f32 %v3077_v7, %v1851_v39  ;;  %1742 = vmatprep.subr.bf16.mxu0 %v3698_v5  ;;  %v1549_v5 = vrot.slane %v1544_v37, %v4312_v63 }
 0x6c7   :  { %v1867_v19 = vadd.f32 %v3078_v40, %v1859_v45 }
 0x6c8   :  { %1743 = vmatpush2.bf16.msra.mxu0 %v3696_v44 }
 0x6c9   :  { %3764 = vtanh.f32 %v1867_v19  ;;  %1744 = vmatprep.subr.bf16.mxu0 %v3701_v49  ;;  %v782_v19 = vpop.xlane.xlu0 %781 }
 0x6ca   :  { %v787_v49 = vmul.f32 0.0625, %v782_v19 }
 0x6cc   :  { %1745 = vmatpush2.bf16.msra.mxu0 %v3699_v48  ;;  %v789_v48 = vmul.f32 %v787_v49, %v787_v49 }
 0x6cd   :  { %1746 = vmatprep.subr.bf16.mxu0 %v3704_v57 }
 0x6d0   :  { %1747 = vmatpush2.bf16.msra.mxu0 %v3702_v51 }
 0x6d1   :  { %3322 = vmatprep.subr.bf16.mxu0 %v3856_v29 }
 0x6d6   :  { %v3765_v55 = vpop.eup %3764 }
 0x6d7   :  { %1869 = vst [vmem:[%s4135_s14 + $0x10] sm:$0xff] %v3765_v55  ;;  %v1878_v56 = vsub.f32 %v4191_v52, %v3765_v55 }
 0x6d9   :  { %v1879_v58 = vmul.f32 %v3763_v46, %v1878_v56  ;;  %v786_v46 = vpop.xlane.xlu1 %785 }
 0x6da   :  { %v788_v55 = vmul.f32 0.0625, %v786_v46 }
 0x6db   :  { %v1896_v59 = vpack.c.bf16 %v1879_v58, %v1879_v58  ;;  %v3097_v58 = vld [vmem:[%s4651_s7] ss:$0 sm:$0xff] }
 0x6dc   :  { %v790_v56 = vsub.f32 %v788_v55, %v789_v48 }
 0x6dd   :  { %3319 = vmatmul.mubr.bf16.vlgmr.msra.gmra.mxu1 %v1896_v59 }
 0x6de   :  { %3358 = vmatprep.mubr.msk.bf16.mxu1 %vm3857_vm0, %v3856_v29  ;;  %3343 = vmatpush3.bf16.msra.mxu1 %v3715_v28  ;;  %v791_v63 = vmax.f32 %v790_v56, 0.0 }
 0x6df   :  { %3344 = vmatprep.subr.bf16.mxu1 %v3856_v29 }
 0x6e0   :  { %v793_v57 = vadd.f32 1e-05, %v791_v63  ;;  %v3098_v63 = vld [vmem:[%s4660_s13] ss:$0 sm:$0xff] }
 0x6e2   :  { %3345 = vmatpush3.bf16.msra.mxu1 %v3716_v30  ;;  %3766 = vrsqrt.f32 %v793_v57 }
 0x6e3   :  { %3346 = vmatprep.subr.bf16.mxu1 %v3856_v29 }
 0x6e6   :  { %3347 = vmatpush3.bf16.msra.mxu1 %v3717_v31 }
 0x6e7   :  { %3348 = vmatprep.subr.bf16.mxu1 %v3856_v29 }
 0x6ea   :  { %3349 = vmatpush3.bf16.msra.mxu1 %v3718_v32 }
 0x6eb   :  { %3350 = vmatprep.subr.bf16.mxu1 %v3856_v29 }
 0x6ee   :  { %3351 = vmatpush3.bf16.msra.mxu1 %v3719_v33  ;;  %v2307_v33 = vstv %s3113_s26 }
 0x6ef   :  { %3352 = vmatprep.subr.bf16.mxu1 %v3856_v29 }
 0x6f2   :  { %3353 = vmatpush3.bf16.msra.mxu1 %v3720_v34 }
 0x6f3   :  { %3354 = vmatprep.subr.bf16.mxu1 %v3856_v29 }
 0x6f6   :  { %3355 = vmatpush3.bf16.msra.mxu1 %v3721_v35  ;;  %v3114_v35 = vmul.f32 -1.442695, %v2307_v33 }
 0x6f7   :  { %3356 = vmatprep.subr.bf16.mxu1 %v3856_v29 }
 0x6f8   :  { %3768 = vpow2.f32 %v3114_v35 }
 0x6fa   :  { %3357 = vmatpush3.bf16.msra.mxu1 %v3722_v36 }
 0x6fb   :  { %3382 = vmatprep.subr.bf16.mxu1 %v3856_v29 }
 0x753   :  { %v1286_v62 = vpop.f32.mrf.mxu0 }
 0x754   :  { %v1488_v52 = vadd.f32 %v4353_v42, %v1286_v62  ;;  %v3706_v42 = vld [vmem:[%s4647_s28 + $0x30] sm:$0xff]  }
 0x755   :  { %v1288_v2 = vpop.f32.mrf.mxu0 }
 0x756   :  { %v1506_v3 = vadd.f32 %v1499_v61, %v1488_v52  ;;  %v1490_v4 = vadd.f32 %v4355_v43, %v1288_v2  ;;  %v3707_v43 = vld [vmem:[%s4647_s28 + $0x28] sm:$0xff]   ;;  %v3723_v2 = vld [vmem:[%s4653_s16 + $0x18] sm:$0xff]  }
 0x757   :  { %v1290_v6 = vpop.f32.mrf.mxu0 }
 0x758   :  { %v1507_v8 = vadd.f32 %v1503_v0, %v1490_v4  ;;  %v1508_v9 = vmax.f32 %v1506_v3, 0.0  ;;  %v3107_v0 = vld [vmem:[%s4652_s11] ss:$0 sm:$0xff] }
 0x759   :  { %v1291_v10 = vpop.f32.mrf.mxu0 }
 0x75a   :  { %v1509_v11 = vmax.f32 %v1507_v8, 0.0  ;;  %v1510_v15 = vpack.c.bf16 %v1508_v9, %v1508_v9  ;;  %v3724_v9 = vld [vmem:[%s4653_s16 + $0x10] sm:$0xff]  }
 0x75c   :  { %v1511_v12 = vpack.c.bf16 %v1509_v11, %v1509_v11  ;;  %v3767_v11 = vpop.eup %3766 }
 0x75e   :  { %1748 = vmatprep.mubr.bf16.mxu0 %v1511_v12 }
 0x75f   :  { %1749 = vmatmul.mubr.bf16.vlgmr.msra.gmra.mxu0 %v1510_v15 }
 0x760   :  { %3323 = vmatpush3.bf16.msra.mxu0 %v3705_v14  ;;  %3338 = vmatprep.mubr.msk.bf16.mxu0 %vm3857_vm0, %v3856_v29  ;;  %v792_v14 = vsub.f32 %v4360_v47, %v787_v49 }
 0x761   :  { %3324 = vmatprep.subr.bf16.mxu0 %v3856_v29 }
 0x764   :  { %3325 = vmatpush3.bf16.msra.mxu0 %v3706_v42  ;;  %v3725_v42 = vld [vmem:[%s4653_s16 + $0x8] sm:$0xff]  }
 0x765   :  { %3326 = vmatprep.subr.bf16.mxu0 %v3856_v29 }
 0x768   :  { %3327 = vmatpush3.bf16.msra.mxu0 %v3707_v43  ;;  %v795_v43 = vmul.f32 %v3767_v11, %v792_v14  ;;  %v3734_v11 = vld [vmem:[%s4662_s21 + $0x8] sm:$0xff]  }
 0x769   :  { %3328 = vmatprep.subr.bf16.mxu0 %v3856_v29  ;;  %v3738_v14 = vld [vmem:[%s4663_s25 + $0x8] sm:$0xff]  }
 0x76c   :  { %3329 = vmatpush3.bf16.msra.mxu0 %v3708_v16  ;;  %v2956_v16 = vld [vmem:[%s4654_s15] ss:$0 sm:$0xff] }
 0x76d   :  { %3330 = vmatprep.subr.bf16.mxu0 %v3856_v29 }
 0x770   :  { %3331 = vmatpush3.bf16.msra.mxu0 %v3709_v13  ;;  %v3726_v13 = vld [vmem:[%s4653_s16] sm:$0xff]  }
 0x771   :  { %3332 = vmatprep.subr.bf16.mxu0 %v3856_v29 }
 0x774   :  { %3333 = vmatpush3.bf16.msra.mxu0 %v3710_v17  ;;  %v803_v17 = vmul.f32 %v2956_v16, %v795_v43 }
 0x775   :  { %3334 = vmatprep.subr.bf16.mxu0 %v3856_v29 }
 0x778   :  { %3335 = vmatpush3.bf16.msra.mxu0 %v3711_v18  ;;  %v2957_v18 = vld [vmem:[%s4655_s18] ss:$0 sm:$0xff] }
 0x779   :  { %3336 = vmatprep.subr.bf16.mxu0 %v3856_v29  ;;  %v811_v47 = vadd.f32 %v2957_v18, %v803_v17  ;;  %v2648_v18 = vstv %s3137_s3 }
 0x77c   :  { %3337 = vmatpush3.bf16.msra.mxu0 %v3712_v22  ;;  %v3727_v22 = vld [vmem:[%s4656_s22] sm:$0xff]  }
 0x77d   :  { %3362 = vmatprep.subr.bf16.mxu0 %v3856_v29 }
 0x77f   :  { %3339 = vmatmul.mubr.bf16.vlgmr.msra.gmra.mxu0 %v4195_v53 }
 0x780   :  { %3363 = vmatpush3.bf16.msra.mxu0 %v3713_v23  ;;  %3366 = vmatprep.mubr.msk.bf16.mxu0 %vm3857_vm0, %v3856_v29  ;;  %v812_v23 = vmax.f32 %v811_v47, 0.0  ;;  %v3138_v47 = vmul.f32 -1.442695, %v2648_v18 }
 0x781   :  { %3364 = vmatprep.subr.bf16.mxu0 %v3856_v29 }
 0x784   :  { %3365 = vmatpush3.bf16.msra.mxu0 %v3714_v24  ;;  %v813_v24 = vpack.c.bf16 %v812_v23, %v812_v23 }
 0x785   :  { %3370 = vmatprep.subr.bf16.mxu0 %v3856_v29 }
 0x787   :  { %3367 = vmatmul.mubr.msk.bf16.vlgmr.msra.gmra.mxu0 %vm678_vm2, %v4234_v54 }
 0x788   :  { %3378 = vmatprep.mubr.msk.bf16.mxu0 %vm3857_vm0, %v3856_v29 }
 0x79d   :  { %v1995_v53 = vpop.f32.mrf.mxu1 }
 0x79f   :  { %v3320_v25 = vpop.f32.mrf.mxu1 }
 0x7a0   :  { %v3729_v25 = vld [vmem:[%s4657_s23 + $0x10] sm:$0xff]  }
 0x7a1   :  { %v1998_v26 = vpop.f32.mrf.mxu1 }
 0x7a2   :  { %v3731_v26 = vld [vmem:[%s4657_s23] sm:$0xff]  }
 0x7a3   :  { %v3321_v27 = vpop.f32.mrf.mxu1 }
 0x81f   :  { %v1750_v7 = vpop.f32.mrf.mxu0 }
 0x820   :  { %v1751_v39 = vadd.f32 %v1750_v7, %v1549_v5  ;;  %v3769_v5 = vpop.eup %3768 }
 0x821   :  { %v1752_v40 = vpop.f32.mrf.mxu0 }
 0x822   :  { %1757 = vst [vmem:[%s4140_s29] sm:$0xff] %v1751_v39  ;;  %v1753_v41 = vadd.f32 %v1752_v40, %v1553_v38  ;;  %v3111_v39 = vld [vmem:[%s4658_s0] ss:$0 sm:$0xff] }
 0x823   :  { %v1754_v44 = vpop.f32.mrf.mxu0 }
 0x824   :  { %1758 = vst [vmem:[%s4140_s29 + $0x8] sm:$0xff] %v1753_v41  ;;  %v3112_v41 = vld [vmem:[%s4659_s9] ss:$0 sm:$0xff]  ;;  %v2311_v44 = vadd.f32 1.0, %v3769_v5 }
 0x825   :  { %v1755_v45 = vpop.f32.mrf.mxu0 }
 0x83f   :  { %v2083_v1 = vpop.f32.mrf.mxu0 }
 0x840   :  { %v2084_v51 = vadd.f32 %v2083_v1, %v1995_v53  ;;  %v3728_v53 = vld [vmem:[%s4657_s23 + $0x18] sm:$0xff]  }
 0x841   :  { %v3340_v59 = vpop.f32.mrf.mxu0  ;;  %3371 = vmatpush3.bf16.msra.mxu0 %v3728_v53 }
 0x842   :  { %v2096_v60 = vadd.f32 %v3097_v58, %v2084_v51  ;;  %3372 = vmatprep.subr.bf16.mxu0 %v3856_v29 }
 0x843   :  { %v2086_v61 = vpop.f32.mrf.mxu0 }
 0x844   :  { %v2097_v62 = vmax.f32 %v2096_v60, 0.0 }
 0x845   :  { %v3341_v52 = vpop.f32.mrf.mxu0  ;;  %3373 = vmatpush3.bf16.msra.mxu0 %v3729_v25 }
 0x846   :  { %v2098_v3 = vpack.c.bf16 %v2097_v62, %v2097_v62  ;;  %3374 = vmatprep.subr.bf16.mxu0 %v3856_v29  ;;  %v3132_v52 = vld [vmem:[%s4661_s17] ss:$0 sm:$0xff] }
 0x847   :  { %v2268_v4 = vpop.f32.mrf.mxu0 }
 0x848   :  { %v4498_v6 = vadd.f32 %v3107_v0, %v2268_v4  ;;  %3359 = vmatmul.mubr.bf16.vlgmr.msra.gmra.mxu1 %v2098_v3 }
 0x849   :  { %3383 = vmatpush3.bf16.msra.mxu1 %v3723_v2  ;;  %v3368_v8 = vpop.f32.mrf.mxu0  ;;  %3390 = vmatprep.mubr.msk.bf16.mxu1 %vm3857_vm0, %v3856_v29 }
 0x84a   :  { %2274 = vadd.xlane.f32.xlu0 %v4498_v6  ;;  %3384 = vmatprep.subr.bf16.mxu1 %v3856_v29  ;;  %v2276_v10 = vmul.f32 %v4498_v6, %v4498_v6 }
 0x84b   :  { %v2271_v12 = vpop.f32.mrf.mxu0 }
 0x84c   :  { %2277 = vadd.xlane.f32.xlu1 %v2276_v10  ;;  %v3733_v10 = vld [vmem:[%s4662_s21 + $0x10] sm:$0xff]   ;;  %v3735_v12 = vld [vmem:[%s4662_s21] sm:$0xff]  }
 0x84d   :  { %3385 = vmatpush3.bf16.msra.mxu1 %v3724_v9  ;;  %v3369_v15 = vpop.f32.mrf.mxu0  ;;  %v3732_v9 = vld [vmem:[%s4662_s21 + $0x18] sm:$0xff]  }
 0x84e   :  { %3386 = vmatprep.subr.bf16.mxu1 %v3856_v29  ;;  %v3739_v15 = vld [vmem:[%s4663_s25] sm:$0xff]  }
 0x851   :  { %3387 = vmatpush3.bf16.msra.mxu1 %v3725_v42 }
 0x852   :  { %3388 = vmatprep.subr.bf16.mxu1 %v3856_v29 }
 0x855   :  { %3389 = vmatpush3.bf16.msra.mxu1 %v3726_v13 }
 0x856   :  { %3406 = vmatprep.subr.bf16.mxu1 %v3856_v29 }
 0x858   :  { %3391 = vmatmul.mubr.msk.bf16.vlgmr.msra.gmra.mxu1 %vm561_vm1, %v4216_v21  ;;  %v3730_v21 = vld [vmem:[%s4657_s23 + $0x8] sm:$0xff]  }
 0x859   :  { %3407 = vmatpush3.bf16.msra.mxu1 %v3727_v22  ;;  %3408 = vmatprep.mubr.msk.bf16.mxu1 %vm3857_vm0, %v3856_v29 }
 0x85a   :  { %3412 = vmatprep.subr.bf16.mxu1 %v3856_v29  ;;  %3375 = vmatpush3.bf16.msra.mxu0 %v3730_v21 }
 0x85b   :  { %3376 = vmatprep.subr.bf16.mxu0 %v3856_v29 }
 0x85e   :  { %3377 = vmatpush3.bf16.msra.mxu0 %v3731_v26  ;;  %v3135_v26 = vld [vmem:[%s4664_s8] ss:$0 sm:$0xff] }
 0x85f   :  { %3394 = vmatprep.subr.bf16.mxu0 %v3856_v29 }
 0x860   :  { %3409 = vmatmul.mubr.msk.bf16.vlgmr.msra.gmra.mxu1 %vm779_vm3, %v813_v24 }
 0x861   :  { %3416 = vmatprep.mubr.msk.bf16.mxu1 %vm3857_vm0, %v3856_v29  ;;  %3413 = vmatpush3.bf16.msra.mxu1 %v3738_v14 }
 0x862   :  { %3414 = vmatprep.subr.bf16.mxu1 %v3856_v29 }
 0x865   :  { %3415 = vmatpush3.bf16.msra.mxu1 %v3739_v15 }
 0x866   :  { %3428 = vmatprep.subr.bf16.mxu1 %v3856_v29 }
 0x8d3   :  { %v2275_v27 = vpop.xlane.xlu0 %2274 }
 0x8d4   :  { %v2279_v28 = vmul.f32 0.015625, %v2275_v27 }
 0x8d5   :  { %v2278_v30 = vpop.xlane.xlu1 %2277 }
 0x8d6   :  { %v2281_v31 = vmul.f32 %v2279_v28, %v2279_v28  ;;  %v2280_v32 = vmul.f32 0.015625, %v2278_v30  ;;  %v2284_v38 = vsub.f32 %v4498_v6, %v2279_v28  ;;  %v3136_v28 = vld [vmem:[%s4665_s19] ss:$0 sm:$0xff] }
 0x8d8   :  { %v2282_v34 = vsub.f32 %v2280_v32, %v2281_v31  ;;  %v3125_v31 = vld [vmem:[%s4666_s24] ss:$0 sm:$0xff] }
 0x8da   :  { %v2283_v36 = vmax.f32 %v2282_v34, 0.0 }
 0x8dc   :  { %v2285_v37 = vadd.f32 1e-05, %v2283_v36 }
 0x8de   :  { %3770 = vrsqrt.f32 %v2285_v37 }
 0x8df   :  { %3772 = vrcp.f32 %v2311_v44 }
 0x8eb   :  { %v3771_v7 = vpop.eup %3770 }
 0x8ec   :  { %v2287_v40 = vmul.f32 %v3771_v7, %v2284_v38  ;;  %v3773_v49 = vpop.eup %3772 }
 0x8ee   :  { %v2295_v45 = vmul.f32 %v3111_v39, %v2287_v40  ;;  %v3736_v39 = vld [vmem:[%s4667_s6 + $0x8] sm:$0xff]  }
 0x8f0   :  { %v2303_v19 = vadd.f32 %v3112_v41, %v2295_v45  ;;  %v3737_v41 = vld [vmem:[%s4667_s6] sm:$0xff]  }
 0x8f2   :  { %3774 = vtanh.f32 %v2303_v19 }
 0x8f3   :  { %3776 = vpow2.f32 %v3138_v47 }
 0x8ff   :  { %v3775_v46 = vpop.eup %3774 }
 0x900   :  { %2305 = vst [vmem:[%s4135_s14 + $0x18] sm:$0xff] %v3775_v46  ;;  %v2314_v48 = vsub.f32 %v4212_v20, %v3775_v46  ;;  %v3777_v53 = vpop.eup %3776 }
 0x901   :  { %v2652_v32 = vadd.f32 1.0, %v3777_v53 }
 0x902   :  { %v2315_v55 = vmul.f32 %v3773_v49, %v2314_v48  ;;  %v3740_v48 = vld [vmem:[%s4668_s12 + $0x8] sm:$0xff]  }
 0x904   :  { %v2324_v56 = vpack.c.bf16 %v2315_v55, %v2315_v55  ;;  %v3741_v55 = vld [vmem:[%s4668_s12] sm:$0xff]  }
 0x906   :  { %3379 = vmatmul.mubr.msk.bf16.vlgmr.msra.gmra.mxu0 %vm561_vm1, %v2324_v56 }
 0x907   :  { %3402 = vmatprep.mubr.msk.bf16.mxu0 %vm3857_vm0, %v3856_v29  ;;  %3395 = vmatpush3.bf16.msra.mxu0 %v3732_v9 }
 0x908   :  { %v2204_v57 = vpop.f32.mrf.mxu1  ;;  %3396 = vmatprep.subr.bf16.mxu0 %v3856_v29 }
 0x909   :  { %v2205_v1 = vadd.f32 %v3098_v63, %v2204_v57 }
 0x90a   :  { %v3360_v58 = vpop.f32.mrf.mxu1 }
 0x90b   :  { %2210 = vst [vmem:[%s4140_s29 + $0x10] sm:$0xff] %v2205_v1  ;;  %3397 = vmatpush3.bf16.msra.mxu0 %v3733_v10 }
 0x90c   :  { %v2207_v51 = vpop.f32.mrf.mxu1  ;;  %3398 = vmatprep.subr.bf16.mxu0 %v3856_v29 }
 0x90e   :  { %v3361_v59 = vpop.f32.mrf.mxu1 }
 0x90f   :  { %3399 = vmatpush3.bf16.msra.mxu0 %v3734_v11 }
 0x910   :  { %3400 = vmatprep.subr.bf16.mxu0 %v3856_v29 }
 0x913   :  { %3401 = vmatpush3.bf16.msra.mxu0 %v3735_v12 }
 0x914   :  { %3420 = vmatprep.subr.bf16.mxu0 %v3856_v29 }
 0x918   :  { %v2458_v60 = vpop.f32.mrf.mxu1 }
 0x91a   :  { %v3392_v61 = vpop.f32.mrf.mxu1 }
 0x91c   :  { %v2461_v20 = vpop.f32.mrf.mxu1 }
 0x91d   :  { %v3145_v20 = vld [vmem:[%s4670_s20] ss:$0 sm:$0xff] }
 0x91e   :  { %v3393_v62 = vpop.f32.mrf.mxu1 }
 0x920   :  { %v2609_v0 = vpop.f32.mrf.mxu1 }
 0x921   :  { %v2610_v2 = vadd.f32 %v3132_v52, %v2609_v0 }
 0x922   :  { %v3410_v3 = vpop.f32.mrf.mxu1 }
 0x923   :  { %2615 = vadd.xlane.f32.xlu0 %v2610_v2  ;;  %v2617_v4 = vmul.f32 %v2610_v2, %v2610_v2 }
 0x924   :  { %v2612_v6 = vpop.f32.mrf.mxu1 }
 0x925   :  { %2618 = vadd.xlane.f32.xlu1 %v2617_v4  ;;  %v3146_v6 = vld [vmem:[%s4127_s30] ss:$0 sm:$0xff] }
 0x926   :  { %v3411_v8 = vpop.f32.mrf.mxu1 }
 0x9ac   :  { %v2616_v42 = vpop.xlane.xlu0 %2615 }
 0x9ad   :  { %v2620_v43 = vmul.f32 0.03125, %v2616_v42 }
 0x9ae   :  { %v2619_v16 = vpop.xlane.xlu1 %2618 }
 0x9af   :  { %v2622_v13 = vmul.f32 %v2620_v43, %v2620_v43  ;;  %v2621_v17 = vmul.f32 0.03125, %v2619_v16  ;;  %v2625_v25 = vsub.f32 %v2610_v2, %v2620_v43 }
 0x9b1   :  { %v2623_v22 = vsub.f32 %v2621_v17, %v2622_v13 }
 0x9b3   :  { %v2624_v23 = vmax.f32 %v2623_v22, 0.0 }
 0x9b5   :  { %v2626_v24 = vadd.f32 1e-05, %v2624_v23 }
 0x9b7   :  { %3778 = vrsqrt.f32 %v2626_v24 }
 0x9b8   :  { %3780 = vrcp.f32 %v2652_v32 }
 0x9c4   :  { %v3779_v21 = vpop.eup %3778 }
 0x9c5   :  { %v2628_v27 = vmul.f32 %v3779_v21, %v2625_v25  ;;  %v3781_v44 = vpop.eup %3780 }
 0x9c6   :  { %v2394_v30 = vpop.f32.mrf.mxu0 }
 0x9c7   :  { %v2636_v33 = vmul.f32 %v3135_v26, %v2628_v27  ;;  %v2459_v34 = vadd.f32 %v2458_v60, %v2394_v30 }
 0x9c8   :  { %v3380_v35 = vpop.f32.mrf.mxu0 }
 0x9c9   :  { %v2644_v36 = vadd.f32 %v3136_v28, %v2636_v33  ;;  %v2471_v37 = vadd.f32 %v3125_v31, %v2459_v34 }
 0x9ca   :  { %v2397_v5 = vpop.f32.mrf.mxu0 }
 0x9cb   :  { %3782 = vtanh.f32 %v2644_v36  ;;  %v2472_v38 = vmax.f32 %v2471_v37, 0.0 }
 0x9cc   :  { %v3381_v7 = vpop.f32.mrf.mxu0 }
 0x9cd   :  { %v2473_v40 = vpack.c.bf16 %v2472_v38, %v2472_v38 }
 0x9cf   :  { %3403 = vmatmul.mubr.msk.bf16.vlgmr.msra.gmra.mxu0 %vm561_vm1, %v2473_v40 }
 0x9d0   :  { %3421 = vmatpush3.bf16.msra.mxu0 %v3736_v39  ;;  %3424 = vmatprep.mubr.msk.bf16.mxu0 %vm3857_vm0, %v3856_v29 }
 0x9d1   :  { %3422 = vmatprep.subr.bf16.mxu0 %v3856_v29 }
 0x9d4   :  { %3423 = vmatpush3.bf16.msra.mxu0 %v3737_v41 }
 0x9d7   :  { %3425 = vmatmul.mubr.msk.bf16.vlgmr.msra.gmra.mxu0 %vm678_vm2, %v4234_v54  ;;  %v3126_v54 = vld [vmem:[%s4669_s5] ss:$0 sm:$0xff] }
 0x9d8   :  { %v3783_v45 = vpop.eup %3782 }
 0x9d9   :  { %2646 = vst [vmem:[%s4135_s14 + $0x20] sm:$0xff] %v3783_v45  ;;  %v2655_v19 = vsub.f32 %v4229_v50, %v3783_v45 }
 0x9db   :  { %v2656_v49 = vmul.f32 %v3781_v44, %v2655_v19 }
 0x9dd   :  { %v2661_v46 = vpack.c.bf16 %v2656_v49, %v2656_v49 }
 0x9df   :  { %3417 = vmatmul.mubr.msk.bf16.vlgmr.msra.gmra.mxu1 %vm678_vm2, %v2661_v46 }
 0x9e0   :  { %3432 = vmatprep.mubr.msk.bf16.mxu1 %vm3857_vm0, %v3856_v29  ;;  %3429 = vmatpush3.bf16.msra.mxu1 %v3740_v48 }
 0x9e1   :  { %3430 = vmatprep.subr.bf16.mxu1 %v3856_v29 }
 0x9e4   :  { %3431 = vmatpush3.bf16.msra.mxu1 %v3741_v55 }
 0xa8f   :  { %v2550_v56 = vpop.f32.mrf.mxu0 }
 0xa90   :  { %v2551_v63 = vadd.f32 %v3126_v54, %v2550_v56 }
 0xa91   :  { %v3404_v57 = vpop.f32.mrf.mxu0 }
 0xa92   :  { %2556 = vst [vmem:[%s4140_s29 + $0x18] sm:$0xff] %v2551_v63 }
 0xa93   :  { %v2553_v50 = vpop.f32.mrf.mxu0 }
 0xa95   :  { %v3405_v1 = vpop.f32.mrf.mxu0 }
 0xa97   :  { %v2767_v58 = vpop.f32.mrf.mxu0 }
 0xa99   :  { %v3426_v51 = vpop.f32.mrf.mxu0 }
 0xa9b   :  { %v2770_v59 = vpop.f32.mrf.mxu0 }
 0xa9d   :  { %v3427_v60 = vpop.f32.mrf.mxu0 }
 0xa9f   :  { %v2715_v61 = vpop.f32.mrf.mxu1 }
 0xaa0   :  { %v2768_v62 = vadd.f32 %v2767_v58, %v2715_v61 }
 0xaa1   :  { %v3418_v52 = vpop.f32.mrf.mxu1 }
 0xaa2   :  { %v2780_v29 = vadd.f32 %v3145_v20, %v2768_v62 }
 0xaa3   :  { %v2718_v0 = vpop.f32.mrf.mxu1 }
 0xaa4   :  { %v2781_v2 = vmax.f32 %v2780_v29, 0.0 }
 0xaa5   :  { %v3419_v3 = vpop.f32.mrf.mxu1 }
 0xaa6   :  { %v2782_v4 = vpack.c.bf16 %v2781_v2, %v2781_v2 }
 0xaa8   :  { %3433 = vmatmul.mubr.msk.bf16.vlgmr.msra.gmra.mxu1 %vm678_vm2, %v2782_v4 }
 0xb68   :  { %v2843_v8 = vpop.f32.mrf.mxu1 }
 0xb69   :  { %v2844_v9 = vadd.f32 %v3146_v6, %v2843_v8 }
 0xb6a   :  { %v3434_v10 = vpop.f32.mrf.mxu1 }
 0xb6b   :  { %2849 = vst [vmem:[%s4140_s29 + $0x20] sm:$0xff] %v2844_v9 }
 0xb6c   :  { %v2846_v11 = vpop.f32.mrf.mxu1 }
 0xb6e   :  { %v3435_v12 = vpop.f32.mrf.mxu1 }
 0xb6f   :  { %2858 = vsyncpa [#allocation3], 1 }

</bundles_post_ra>
